<compile_context>
chip_gen: v7x
topology: tpu7x:2x2x1
jax: 0.10.0
libtpu: 0.0.40
codegen_flags: <defaults>
</compile_context>

<pallas_src>
import math

import jax
import jax.numpy as jnp
from jax import lax
from jax.experimental import pallas as pl
from jax.experimental.pallas import tpu as pltpu

# ---- model hyper-parameters (small, consistent with the module) -------------
B_TOTAL = 16     # total sequences per call (>=8 fills f32 sublanes)
BLOCK_B = 8      # sequences per grid step
S = 8            # sequence length
INPUT_SIZE = 8   # input_size
DIM_VAL = 32     # dim_val (== LSTM hidden size)
DIM_ATTN = 32    # dim_attn
N_HEADS = 2      # n_heads
N_LAYERS = 2     # n_layers (forward reads hn[-2] and hn[-1])
T_FEATS = 15     # fc4 input features
DROPOUT = 0.0    # inference: dropout is identity
# TODO(synk): training-mode dropout (nn.LSTM inter-layer dropout) not implemented; eval semantics only.

assert BLOCK_B == 8, "bias slab is pre-replicated across 8 sublanes; keep BLOCK_B == 8"
assert B_TOTAL % BLOCK_B == 0

# --------------------------------------------------------------------------- #
# Packed parameter slab layout (all row offsets 8-aligned, 128 lanes wide).    #
# --------------------------------------------------------------------------- #
_W_SHAPES = (
    ("fc1_w", INPUT_SIZE, DIM_VAL),                  # (8, 32)
    ("wap",   DIM_VAL, 2 * N_HEADS * DIM_VAL),       # (32, 128) [M0*s | M1*s | V0 | V1]
    ("ow",    N_HEADS * DIM_VAL, DIM_VAL),           # (64, 32)  head-combine
    ("wih0",  DIM_VAL, 4 * DIM_VAL),                 # (32, 128)
    ("whh0",  DIM_VAL, 4 * DIM_VAL),                 # (32, 128)
    ("wih1",  DIM_VAL, 4 * DIM_VAL),                 # (32, 128)
    ("whh1",  DIM_VAL, 4 * DIM_VAL),                 # (32, 128)
    ("fc2a",  DIM_VAL, 2 * DIM_VAL),                 # (32, 64)  fc2_w rows :D
    ("fc2b",  DIM_VAL, 2 * DIM_VAL),                 # (32, 64)  fc2_w rows D:
    ("fc3x",  2 * DIM_VAL, 1),                       # (64, 1)   fc3_w rows :2D
    ("fc3t",  5, 1),                                 # (5, 1)    fc3_w rows 2D:
    ("fc4",   T_FEATS, 5),                           # (15, 5)
)


def _round8(n):
    return ((n + 7) // 8) * 8


def _build_layout():
    layout = {}
    off = 0
    for name, r, c in _W_SHAPES:
        layout[name] = (off, r, c)
        off += _round8(r)
    return layout, off


_W_LAYOUT, _W_ROWS = _build_layout()

# bias slab: each bias occupies an 8-row block, replicated across its 8 sublanes.
_B_ROWS = (
    ("fc1_b", DIM_VAL),       # block 0
    ("ln_g", DIM_VAL),        # block 1
    ("ln_b", DIM_VAL),        # block 2
    ("b0", 4 * DIM_VAL),      # block 3
    ("b1", 4 * DIM_VAL),      # block 4
    ("fc2_b", 2 * DIM_VAL),   # block 5
    ("fc3_b", 1),             # block 6
    ("fc4_b", 5),             # block 7
)
_B_SLAB_ROWS = 8 * len(_B_ROWS)


def _elu(x):
    # nn.ELU / F.elu with alpha=1
    return jnp.where(x > 0, x, jnp.exp(jnp.minimum(x, 0.0)) - 1.0)


# --------------------------------------------------------------------------- #
# Pallas kernel (one batch block of BLOCK_B sequences per grid step)           #
# --------------------------------------------------------------------------- #
def _attention_rnn_kernel(x_ref, t_ref, w_ref, b_ref, out_ref):
    D, nH, H, Sk, BB = DIM_VAL, N_HEADS, DIM_VAL, S, BLOCK_B

    def w(name):
        off, r, c = _W_LAYOUT[name]
        return w_ref[off:off + r, 0:c]

    def b(idx, c):
        # (8, c) tile, all 8 rows identical (pre-replicated at pack time).
        return b_ref[idx * 8:(idx + 1) * 8, 0:c]

    x2d = x_ref[...]                                   # (BB*S, I), row = b*S + s
    t = t_ref[...]                                     # (BB, 15)

    # ---- fc1 ----------------------------------------------------------------
    xf3 = (jnp.dot(x2d, w("fc1_w"), preferred_element_type=jnp.float32)
           .reshape(BB, Sk, D) + b(0, D))              # (BB, S, D)
    xf2d = xf3.reshape(BB * Sk, D)

    # ---- multi-head attention -----------------------------------------------
    # One fused projection: [Wq0 Wk0^T * scale | Wq1 Wk1^T * scale | Wv0 | Wv1]
    proj = jnp.dot(xf2d, w("wap"), preferred_element_type=jnp.float32)   # (BB*S, 4D)
    oh_heads = []
    for h in range(nH):
        qm = proj[:, h * D:(h + 1) * D].reshape(BB, Sk, D)               # xf @ M_h
        v = proj[:, (nH + h) * D:(nH + h + 1) * D].reshape(BB, Sk, D)
        s = jnp.einsum('bsd,btd->bst', qm, xf3,
                       preferred_element_type=jnp.float32)               # scores (scaled)
        m = jnp.max(s, axis=-1, keepdims=True)
        e = jnp.exp(s - m)
        p = e / jnp.sum(e, axis=-1, keepdims=True)
        oh = jnp.einsum('bst,btd->bsd', p, v, preferred_element_type=jnp.float32)
        oh_heads.append(oh.reshape(BB * Sk, D))
    oh_all = jnp.concatenate(oh_heads, axis=1)                            # (BB*S, nH*D)
    attn_out = jnp.dot(oh_all, w("ow"), preferred_element_type=jnp.float32)  # (BB*S, D)

    # ---- residual + LayerNorm(dim_val), eps=1e-5, biased variance ------------
    r = attn_out.reshape(BB, Sk, D) + xf3
    mu = jnp.mean(r, axis=-1, keepdims=True)
    var = jnp.mean((r - mu) ** 2, axis=-1, keepdims=True)
    xn3 = (r - mu) * lax.rsqrt(var + 1e-5) * b(1, D) + b(2, D)            # (BB, S, D)

    # ---- 2-layer LSTM (batch_first), unrolled over time ----------------------
    # Hoist the layer-0 input projection and store it time-major so the per-step
    # read is an aligned leading-axis index (one transpose outside the loop).
    xn_t = jnp.transpose(xn3, (1, 0, 2))                                  # (S, BB, D)
    xp0_t = (jnp.dot(xn_t.reshape(Sk * BB, D), w("wih0"),
                     preferred_element_type=jnp.float32)
             .reshape(Sk, BB, 4 * H) + b(3, 4 * H))                       # (S, BB, 4H)

    whh0 = w("whh0")
    wih1 = w("wih1")
    whh1 = w("whh1")
    b1b = b(4, 4 * H)                                                     # (BB, 4H)

    h0 = jnp.zeros((BB, H), jnp.float32)
    c0 = jnp.zeros((BB, H), jnp.float32)
    h1 = jnp.zeros((BB, H), jnp.float32)
    c1 = jnp.zeros((BB, H), jnp.float32)

    def cell(gates, c):
        # PyTorch gate order i, f, g, o.  One sigmoid + one tanh over the full
        # (BB, 4H) gate vreg, then static lane slices (3 EUP pushes / cell).
        sg = jax.nn.sigmoid(gates)
        tg = jnp.tanh(gates)
        i = sg[:, 0:H]
        f = sg[:, H:2 * H]
        g = tg[:, 2 * H:3 * H]
        o = sg[:, 3 * H:4 * H]
        c_new = f * c + i * g
        h_new = o * jnp.tanh(c_new)
        return h_new, c_new

    for ti in range(Sk):
        # r1 depends only on the previous h1: issued here it overlaps the layer-0 chain.
        r1 = jnp.dot(h1, whh1, preferred_element_type=jnp.float32) + b1b
        g0 = xp0_t[ti] + jnp.dot(h0, whh0, preferred_element_type=jnp.float32)
        h0, c0 = cell(g0, c0)
        g1 = jnp.dot(h0, wih1, preferred_element_type=jnp.float32) + r1
        h1, c1 = cell(g1, c1)

    # ---- heads: split matmuls instead of lane concats ------------------------
    # hn = cat(h_layer0_final, h_layer1_final); fc2/fc3 split along their input rows.
    x2 = _elu(jnp.dot(h0, w("fc2a"), preferred_element_type=jnp.float32)
              + jnp.dot(h1, w("fc2b"), preferred_element_type=jnp.float32)
              + b(5, 2 * D))                                              # (BB, 2D)
    tt = _elu(jnp.dot(t, w("fc4"), preferred_element_type=jnp.float32) + b(7, 5))  # (BB, 5)
    out = (jnp.dot(x2, w("fc3x"), preferred_element_type=jnp.float32)
           + jnp.dot(tt, w("fc3t"), preferred_element_type=jnp.float32)
           + b(6, 1))                                                     # (BB, 1)
    out_ref[...] = out


@jax.jit
def attention_rnn_forward(x, t, w_slab, b_slab):
    Bt = x.shape[0]
    assert Bt % BLOCK_B == 0
    n_blocks = Bt // BLOCK_B
    x_flat = x.reshape(Bt * S, INPUT_SIZE)   # flatten outside the kernel (free in XLA)
    return pl.pallas_call(
        _attention_rnn_kernel,
        out_shape=jax.ShapeDtypeStruct((Bt, 1), jnp.float32),
        grid=(n_blocks,),
        in_specs=[
            pl.BlockSpec((BLOCK_B * S, INPUT_SIZE), lambda i: (i, 0)),
            pl.BlockSpec((BLOCK_B, T_FEATS), lambda i: (i, 0)),
            pl.BlockSpec((_W_ROWS, 128), lambda i: (0, 0)),      # weight slab, grid-invariant
            pl.BlockSpec((_B_SLAB_ROWS, 128), lambda i: (0, 0)),  # bias slab, grid-invariant
        ],
        out_specs=pl.BlockSpec((BLOCK_B, 1), lambda i: (i, 0)),
        compiler_params=pltpu.CompilerParams(
            dimension_semantics=("parallel",)),   # batch blocks shard across TCs on v7x
        cost_estimate=pl.CostEstimate(
            flops=3_300_000 * n_blocks,
            transcendentals=50_000 * n_blocks,
            bytes_accessed=4 * (x_flat.size + t.size + w_slab.size + b_slab.size + Bt),
        ),
    )(x_flat, t, w_slab, b_slab)


# --------------------------------------------------------------------------- #
# Parameter packing (done ONCE, outside the per-call hot path)                 #
# --------------------------------------------------------------------------- #
def pack_params(p):
    D, A, nH = DIM_VAL, DIM_ATTN, N_HEADS
    scale = 1.0 / math.sqrt(float(A))
    # Fold Wq_h @ Wk_h^T * scale per head; fuse with the V projections into one slab.
    m_heads = [jnp.dot(p["qw"][h], p["kw"][h].T) * scale for h in range(nH)]
    wap = jnp.concatenate(m_heads + [p["vw"][h] for h in range(nH)], axis=1)  # (D, 4D)

    blocks = {
        "fc1_w": p["fc1_w"],
        "wap": wap,
        "ow": p["ow"].reshape(nH * D, D),
        "wih0": p["wih0"],
        "whh0": p["whh0"],
        "wih1": p["wih1"],
        "whh1": p["whh1"],
        "fc2a": p["fc2_w"][:D, :],
        "fc2b": p["fc2_w"][D:, :],
        "fc3x": p["fc3_w"][:2 * D, :],
        "fc3t": p["fc3_w"][2 * D:, :],
        "fc4": p["fc4_w"],
    }
    w_slab = jnp.zeros((_W_ROWS, 128), jnp.float32)
    for name, (off, r, c) in _W_LAYOUT.items():
        arr = jnp.asarray(blocks[name], jnp.float32)
        assert arr.shape == (r, c), (name, arr.shape, (r, c))
        w_slab = w_slab.at[off:off + r, :c].set(arr)

    # Bias slab: each bias replicated across its 8-row block (tile-aligned loads in-kernel).
    b_slab = jnp.zeros((_B_SLAB_ROWS, 128), jnp.float32)
    for idx, (name, c) in enumerate(_B_ROWS):
        vec = jnp.asarray(p[name], jnp.float32).reshape(-1)[:c]
        b_slab = b_slab.at[idx * 8:(idx + 1) * 8, :c].set(
            jnp.broadcast_to(vec[None, :], (8, c)))
    return w_slab, b_slab


# --------------------------------------------------------------------------- #
# Pure-JAX reference (original, unfused formulation) for validation            #
# --------------------------------------------------------------------------- #
def _lstm_cell_ref(x_t, h, c, w_ih, w_hh, bias):
    H = h.shape[-1]
    gates = jnp.dot(x_t, w_ih) + jnp.dot(h, w_hh) + bias
    i = jax.nn.sigmoid(gates[:, 0:H])
    f = jax.nn.sigmoid(gates[:, H:2 * H])
    g = jnp.tanh(gates[:, 2 * H:3 * H])
    o = jax.nn.sigmoid(gates[:, 3 * H:4 * H])
    c_new = f * c + i * g
    h_new = o * jnp.tanh(c_new)
    return h_new, c_new


def attention_rnn_reference(x, t, p):
    Bk, Sk, Ik = x.shape
    D, A, nH = DIM_VAL, DIM_ATTN, N_HEADS

    xf = jnp.dot(x.reshape(Bk * Sk, Ik), p["fc1_w"]) + p["fc1_b"]

    scale = 1.0 / math.sqrt(float(A))
    attn_out = jnp.zeros((Bk * Sk, D), jnp.float32)
    for h in range(nH):
        q = jnp.dot(xf, p["qw"][h]).reshape(Bk, Sk, A)
        k = jnp.dot(xf, p["kw"][h]).reshape(Bk, Sk, A)
        v = jnp.dot(xf, p["vw"][h]).reshape(Bk, Sk, D)
        s = jnp.einsum('bsa,bta->bst', q, k) * scale
        m = jnp.max(s, axis=-1, keepdims=True)
        e = jnp.exp(s - m)
        pr = e / jnp.sum(e, axis=-1, keepdims=True)
        oh = jnp.einsum('bst,btd->bsd', pr, v)
        attn_out = attn_out + jnp.dot(oh.reshape(Bk * Sk, D), p["ow"][h])

    r = attn_out + xf
    mu = jnp.mean(r, axis=-1, keepdims=True)
    var = jnp.mean((r - mu) ** 2, axis=-1, keepdims=True)
    xn = (r - mu) * lax.rsqrt(var + 1e-5) * p["ln_g"] + p["ln_b"]
    xn3 = xn.reshape(Bk, Sk, D)

    H = D
    h0 = jnp.zeros((Bk, H), jnp.float32)
    c0 = jnp.zeros((Bk, H), jnp.float32)
    h1 = jnp.zeros((Bk, H), jnp.float32)
    c1 = jnp.zeros((Bk, H), jnp.float32)
    for ti in range(Sk):
        x_t = xn3[:, ti, :]
        h0, c0 = _lstm_cell_ref(x_t, h0, c0, p["wih0"], p["whh0"], p["b0"])
        h1, c1 = _lstm_cell_ref(h0, h1, c1, p["wih1"], p["whh1"], p["b1"])

    hn = jnp.concatenate([h0, h1], axis=1)
    x2 = _elu(jnp.dot(hn, p["fc2_w"]) + p["fc2_b"])
    tt = _elu(jnp.dot(t, p["fc4_w"]) + p["fc4_b"])
    cat = jnp.concatenate([x2, tt], axis=1)
    return jnp.dot(cat, p["fc3_w"]) + p["fc3_b"]


# --------------------------------------------------------------------------- #
# Parameter init (PyTorch-style uniform fan-in init)                           #
# --------------------------------------------------------------------------- #
def init_params(key):
    D, A, I, H = DIM_VAL, DIM_ATTN, INPUT_SIZE, DIM_VAL
    keys = iter(jax.random.split(key, 24))

    def u(shape, fan_in):
        bound = 1.0 / math.sqrt(float(fan_in))
        return jax.random.uniform(next(keys), shape, jnp.float32, -bound, bound)

    p = {}
    p["fc1_w"] = u((I, D), I)
    p["fc1_b"] = u((1, D), I)
    # per-head Q/K/V projections (bias-free)
    p["qw"] = u((N_HEADS, D, A), D)
    p["kw"] = u((N_HEADS, D, A), D)
    p["vw"] = u((N_HEADS, D, D), D)
    # head-combining Linear(n_heads*dim_val, dim_val, bias=False): PyTorch layout
    # (D_out, n_heads*D) with column index d*n_heads + h (stack(dim=-1)+flatten),
    # reordered into per-head (n_heads, D_in, D_out) slabs.
    w_pt = u((D, N_HEADS * D), N_HEADS * D)
    p["ow"] = jnp.transpose(w_pt.reshape(D, D, N_HEADS), (2, 1, 0))
    # LayerNorm affine params (PyTorch default init)
    p["ln_g"] = jnp.ones((1, D), jnp.float32)
    p["ln_b"] = jnp.zeros((1, D), jnp.float32)
    # LSTM layer 0 / layer 1 (biases = b_ih + b_hh combined)
    p["wih0"] = u((D, 4 * H), H)
    p["whh0"] = u((H, 4 * H), H)
    p["b0"] = u((1, 4 * H), H) + u((1, 4 * H), H)
    p["wih1"] = u((H, 4 * H), H)
    p["whh1"] = u((H, 4 * H), H)
    p["b1"] = u((1, 4 * H), H) + u((1, 4 * H), H)
    # heads
    p["fc2_w"] = u((2 * D, 2 * D), 2 * D)
    p["fc2_b"] = u((1, 2 * D), 2 * D)
    p["fc3_w"] = u((2 * D + 5, 1), 2 * D + 5)
    p["fc3_b"] = u((1, 1), 2 * D + 5)
    p["fc4_w"] = u((T_FEATS, 5), T_FEATS)
    p["fc4_b"] = u((1, 5), T_FEATS)
    return p


if __name__ == "__main__":
    key = jax.random.PRNGKey(0)
    kx, kt, kp = jax.random.split(key, 3)
    x = jax.random.normal(kx, (B_TOTAL, S, INPUT_SIZE), dtype=jnp.float32)
    t = jax.random.normal(kt, (B_TOTAL, T_FEATS), dtype=jnp.float32)
    params = init_params(kp)

    # One-time parameter packing into two VMEM slabs (fused / pre-folded weights, biases
    # replicated across sublanes) -> 4 input DMAs per call.
    w_slab, b_slab = pack_params(params)
    w_slab = jax.block_until_ready(w_slab)
    b_slab = jax.block_until_ready(b_slab)

    out = attention_rnn_forward(x, t, w_slab, b_slab)
    out = jax.block_until_ready(out)
    assert out.shape == (B_TOTAL, 1), out.shape

    ref = jax.block_until_ready(attention_rnn_reference(x, t, params))
    if not bool(jnp.allclose(out, ref, atol=1e-3, rtol=1e-3)):
        raise SystemExit(f"kernel/reference mismatch:\nkernel={out}\nref={ref}")

    print("KERNEL_OK")
</pallas_src>

<mosaic_0001>
module attributes {stable_mosaic.version = 11 : i64} {
  func.func @_attention_rnn_kernel(%arg0: i32, %arg1: memref<64x8xf32, #tpu.memory_space<vmem>>, %arg2: memref<8x15xf32, #tpu.memory_space<vmem>>, %arg3: memref<384x128xf32, #tpu.memory_space<vmem>>, %arg4: memref<64x128xf32, #tpu.memory_space<vmem>>, %arg5: memref<8x1xf32, #tpu.memory_space<vmem>>) attributes {dimension_semantics = [#tpu.dimension_semantics<parallel>], iteration_bounds = array<i64: 2>, scalar_prefetch = 0 : i64, scratch_operands = 0 : i64, tpu.core_type = #tpu.core_type<tc>, window_params = [{transform_indices = @transform_0, window_bounds = array<i64: 64, 8>}, {transform_indices = @transform_1, window_bounds = array<i64: 8, 15>}, {pipeline_mode = #tpu.pipeline_mode<synchronous>, transform_indices = @transform_2, window_bounds = array<i64: 384, 128>}, {pipeline_mode = #tpu.pipeline_mode<synchronous>, transform_indices = @transform_3, window_bounds = array<i64: 64, 128>}, {transform_indices = @transform_4, window_bounds = array<i64: 8, 1>}]} {
    %c0 = arith.constant 0 : index
    %c0_0 = arith.constant 0 : index
    %0 = vector.load %arg1[%c0, %c0_0] : memref<64x8xf32, #tpu.memory_space<vmem>>, vector<64x8xf32>
    %c0_1 = arith.constant 0 : index
    %c0_2 = arith.constant 0 : index
    %1 = vector.load %arg2[%c0_1, %c0_2] : memref<8x15xf32, #tpu.memory_space<vmem>>, vector<8x15xf32>
    %c0_3 = arith.constant 0 : index
    %c0_4 = arith.constant 0 : index
    %2 = vector.load %arg3[%c0_3, %c0_4] : memref<384x128xf32, #tpu.memory_space<vmem>>, vector<8x32xf32>
    %cst = arith.constant dense<0.000000e+00> : vector<64x32xf32>
    %3 = tpu.matmul %0, %2, %cst {dimension_numbers = #tpu.dot_dimension_numbers<[1], [0], [0], [1], [0, 0, 1, 1], [], []>} : vector<64x8xf32>, vector<8x32xf32>, vector<64x32xf32> -> vector<64x32xf32>
    %4 = vector.shape_cast %3 : vector<64x32xf32> to vector<8x8x32xf32>
    %c0_5 = arith.constant 0 : index
    %c0_6 = arith.constant 0 : index
    %5 = vector.load %arg4[%c0_5, %c0_6] : memref<64x128xf32, #tpu.memory_space<vmem>>, vector<8x32xf32>
    %6 = vector.shape_cast %5 : vector<8x32xf32> to vector<1x8x32xf32>
    %7 = vector.broadcast %6 : vector<1x8x32xf32> to vector<8x8x32xf32>
    %8 = arith.addf %4, %7 : vector<8x8x32xf32>
    %9 = vector.shape_cast %8 : vector<8x8x32xf32> to vector<64x32xf32>
    %c8 = arith.constant 8 : index
    %c0_7 = arith.constant 0 : index
    %10 = vector.load %arg3[%c8, %c0_7] : memref<384x128xf32, #tpu.memory_space<vmem>>, vector<32x128xf32>
    %cst_8 = arith.constant dense<0.000000e+00> : vector<64x128xf32>
    %11 = tpu.matmul %9, %10, %cst_8 {dimension_numbers = #tpu.dot_dimension_numbers<[1], [0], [0], [1], [0, 0, 1, 1], [], []>} : vector<64x32xf32>, vector<32x128xf32>, vector<64x128xf32> -> vector<64x128xf32>
    %12 = vector.extract_strided_slice %11 {offsets = [0, 0], sizes = [64, 32], strides = [1, 1]} : vector<64x128xf32> to vector<64x32xf32>
    %13 = vector.shape_cast %12 : vector<64x32xf32> to vector<8x8x32xf32>
    %14 = vector.extract_strided_slice %11 {offsets = [0, 64], sizes = [64, 32], strides = [1, 1]} : vector<64x128xf32> to vector<64x32xf32>
    %15 = vector.shape_cast %14 : vector<64x32xf32> to vector<8x8x32xf32>
    "tpu.trace_start"() <{level = 10 : i32, message = "bsd,btd->bst"}> : () -> ()
    %cst_9 = arith.constant dense<0.000000e+00> : vector<8x8x8xf32>
    %16 = tpu.matmul %13, %8, %cst_9 {dimension_numbers = #tpu.dot_dimension_numbers<[2], [2], [1], [1], [0, 0, 0, 1, 1, 1], [0], [0]>} : vector<8x8x32xf32>, vector<8x8x32xf32>, vector<8x8x8xf32> -> vector<8x8x8xf32>
    "tpu.trace_stop"() : () -> ()
    %cst_10 = arith.constant dense<0xFF800000> : vector<8x8xf32>
    %17 = vector.multi_reduction <maximumf>, %16, %cst_10 [2] : vector<8x8x8xf32> to vector<8x8xf32>
    %18 = vector.shape_cast %17 : vector<8x8xf32> to vector<8x8x1xf32>
    %19 = vector.broadcast %18 : vector<8x8x1xf32> to vector<8x8x8xf32>
    %20 = arith.subf %16, %19 : vector<8x8x8xf32>
    %21 = math.exp %20 : vector<8x8x8xf32>
    %cst_11 = arith.constant dense<0.000000e+00> : vector<8x8xf32>
    %22 = vector.multi_reduction <add>, %21, %cst_11 [2] : vector<8x8x8xf32> to vector<8x8xf32>
    %23 = vector.shape_cast %22 : vector<8x8xf32> to vector<8x8x1xf32>
    %24 = vector.broadcast %23 : vector<8x8x1xf32> to vector<8x8x8xf32>
    %25 = arith.divf %21, %24 : vector<8x8x8xf32>
    "tpu.trace_start"() <{level = 10 : i32, message = "bst,btd->bsd"}> : () -> ()
    %cst_12 = arith.constant dense<0.000000e+00> : vector<8x8x32xf32>
    %26 = tpu.matmul %25, %15, %cst_12 {dimension_numbers = #tpu.dot_dimension_numbers<[2], [1], [1], [2], [0, 0, 0, 1, 1, 2], [0], [0]>} : vector<8x8x8xf32>, vector<8x8x32xf32>, vector<8x8x32xf32> -> vector<8x8x32xf32>
    "tpu.trace_stop"() : () -> ()
    %27 = vector.shape_cast %26 : vector<8x8x32xf32> to vector<64x32xf32>
    %28 = vector.extract_strided_slice %11 {offsets = [0, 32], sizes = [64, 32], strides = [1, 1]} : vector<64x128xf32> to vector<64x32xf32>
    %29 = vector.shape_cast %28 : vector<64x32xf32> to vector<8x8x32xf32>
    %30 = vector.extract_strided_slice %11 {offsets = [0, 96], sizes = [64, 32], strides = [1, 1]} : vector<64x128xf32> to vector<64x32xf32>
    %31 = vector.shape_cast %30 : vector<64x32xf32> to vector<8x8x32xf32>
    "tpu.trace_start"() <{level = 10 : i32, message = "bsd,btd->bst"}> : () -> ()
    %cst_13 = arith.constant dense<0.000000e+00> : vector<8x8x8xf32>
    %32 = tpu.matmul %29, %8, %cst_13 {dimension_numbers = #tpu.dot_dimension_numbers<[2], [2], [1], [1], [0, 0, 0, 1, 1, 1], [0], [0]>} : vector<8x8x32xf32>, vector<8x8x32xf32>, vector<8x8x8xf32> -> vector<8x8x8xf32>
    "tpu.trace_stop"() : () -> ()
    %cst_14 = arith.constant dense<0xFF800000> : vector<8x8xf32>
    %33 = vector.multi_reduction <maximumf>, %32, %cst_14 [2] : vector<8x8x8xf32> to vector<8x8xf32>
    %34 = vector.shape_cast %33 : vector<8x8xf32> to vector<8x8x1xf32>
    %35 = vector.broadcast %34 : vector<8x8x1xf32> to vector<8x8x8xf32>
    %36 = arith.subf %32, %35 : vector<8x8x8xf32>
    %37 = math.exp %36 : vector<8x8x8xf32>
    %cst_15 = arith.constant dense<0.000000e+00> : vector<8x8xf32>
    %38 = vector.multi_reduction <add>, %37, %cst_15 [2] : vector<8x8x8xf32> to vector<8x8xf32>
    %39 = vector.shape_cast %38 : vector<8x8xf32> to vector<8x8x1xf32>
    %40 = vector.broadcast %39 : vector<8x8x1xf32> to vector<8x8x8xf32>
    %41 = arith.divf %37, %40 : vector<8x8x8xf32>
    "tpu.trace_start"() <{level = 10 : i32, message = "bst,btd->bsd"}> : () -> ()
    %cst_16 = arith.constant dense<0.000000e+00> : vector<8x8x32xf32>
    %42 = tpu.matmul %41, %31, %cst_16 {dimension_numbers = #tpu.dot_dimension_numbers<[2], [1], [1], [2], [0, 0, 0, 1, 1, 2], [0], [0]>} : vector<8x8x8xf32>, vector<8x8x32xf32>, vector<8x8x32xf32> -> vector<8x8x32xf32>
    "tpu.trace_stop"() : () -> ()
    %43 = vector.shape_cast %42 : vector<8x8x32xf32> to vector<64x32xf32>
    %44 = tpu.concatenate %27, %43 in 1 : vector<64x32xf32>, vector<64x32xf32> -> vector<64x64xf32>
    %c40 = arith.constant 40 : index
    %c0_17 = arith.constant 0 : index
    %45 = vector.load %arg3[%c40, %c0_17] : memref<384x128xf32, #tpu.memory_space<vmem>>, vector<64x32xf32>
    %cst_18 = arith.constant dense<0.000000e+00> : vector<64x32xf32>
    %46 = tpu.matmul %44, %45, %cst_18 {dimension_numbers = #tpu.dot_dimension_numbers<[1], [0], [0], [1], [0, 0, 1, 1], [], []>} : vector<64x64xf32>, vector<64x32xf32>, vector<64x32xf32> -> vector<64x32xf32>
    %47 = vector.shape_cast %46 : vector<64x32xf32> to vector<8x8x32xf32>
    %48 = arith.addf %47, %8 : vector<8x8x32xf32>
    %cst_19 = arith.constant dense<0.000000e+00> : vector<8x8xf32>
    %49 = vector.multi_reduction <add>, %48, %cst_19 [2] : vector<8x8x32xf32> to vector<8x8xf32>
    %50 = vector.shape_cast %49 : vector<8x8xf32> to vector<8x8x1xf32>
    %cst_20 = arith.constant 3.200000e+01 : f32
    %51 = vector.broadcast %cst_20 : f32 to vector<8x8x1xf32>
    %52 = arith.divf %50, %51 : vector<8x8x1xf32>
    %53 = vector.broadcast %52 : vector<8x8x1xf32> to vector<8x8x32xf32>
    %54 = arith.subf %48, %53 : vector<8x8x32xf32>
    %55 = arith.mulf %54, %54 : vector<8x8x32xf32>
    %cst_21 = arith.constant dense<0.000000e+00> : vector<8x8xf32>
    %56 = vector.multi_reduction <add>, %55, %cst_21 [2] : vector<8x8x32xf32> to vector<8x8xf32>
    %57 = vector.shape_cast %56 : vector<8x8xf32> to vector<8x8x1xf32>
    %cst_22 = arith.constant 3.200000e+01 : f32
    %58 = vector.broadcast %cst_22 : f32 to vector<8x8x1xf32>
    %59 = arith.divf %57, %58 : vector<8x8x1xf32>
    %60 = vector.broadcast %52 : vector<8x8x1xf32> to vector<8x8x32xf32>
    %61 = arith.subf %48, %60 : vector<8x8x32xf32>
    %cst_23 = arith.constant 9.99999974E-6 : f32
    %62 = vector.broadcast %cst_23 : f32 to vector<8x8x1xf32>
    %63 = arith.addf %59, %62 : vector<8x8x1xf32>
    %64 = math.rsqrt %63 : vector<8x8x1xf32>
    %65 = vector.broadcast %64 : vector<8x8x1xf32> to vector<8x8x32xf32>
    %66 = arith.mulf %61, %65 : vector<8x8x32xf32>
    %c8_24 = arith.constant 8 : index
    %c0_25 = arith.constant 0 : index
    %67 = vector.load %arg4[%c8_24, %c0_25] : memref<64x128xf32, #tpu.memory_space<vmem>>, vector<8x32xf32>
    %68 = vector.shape_cast %67 : vector<8x32xf32> to vector<1x8x32xf32>
    %69 = vector.broadcast %68 : vector<1x8x32xf32> to vector<8x8x32xf32>
    %70 = arith.mulf %66, %69 : vector<8x8x32xf32>
    %c16 = arith.constant 16 : index
    %c0_26 = arith.constant 0 : index
    %71 = vector.load %arg4[%c16, %c0_26] : memref<64x128xf32, #tpu.memory_space<vmem>>, vector<8x32xf32>
    %72 = vector.shape_cast %71 : vector<8x32xf32> to vector<1x8x32xf32>
    %73 = vector.broadcast %72 : vector<1x8x32xf32> to vector<8x8x32xf32>
    %74 = arith.addf %70, %73 : vector<8x8x32xf32>
    %75 = tpu.transpose %74, [1, 0, 2] : vector<8x8x32xf32> -> vector<8x8x32xf32>
    %76 = vector.shape_cast %75 : vector<8x8x32xf32> to vector<64x32xf32>
    %c104 = arith.constant 104 : index
    %c0_27 = arith.constant 0 : index
    %77 = vector.load %arg3[%c104, %c0_27] : memref<384x128xf32, #tpu.memory_space<vmem>>, vector<32x128xf32>
    %cst_28 = arith.constant dense<0.000000e+00> : vector<64x128xf32>
    %78 = tpu.matmul %76, %77, %cst_28 {dimension_numbers = #tpu.dot_dimension_numbers<[1], [0], [0], [1], [0, 0, 1, 1], [], []>} : vector<64x32xf32>, vector<32x128xf32>, vector<64x128xf32> -> vector<64x128xf32>
    %79 = vector.shape_cast %78 : vector<64x128xf32> to vector<8x8x128xf32>
    %c24 = arith.constant 24 : index
    %c0_29 = arith.constant 0 : index
    %80 = vector.load %arg4[%c24, %c0_29] : memref<64x128xf32, #tpu.memory_space<vmem>>, vector<8x128xf32>
    %81 = vector.shape_cast %80 : vector<8x128xf32> to vector<1x8x128xf32>
    %82 = vector.broadcast %81 : vector<1x8x128xf32> to vector<8x8x128xf32>
    %83 = arith.addf %79, %82 : vector<8x8x128xf32>
    %c136 = arith.constant 136 : index
    %c0_30 = arith.constant 0 : index
    %84 = vector.load %arg3[%c136, %c0_30] : memref<384x128xf32, #tpu.memory_space<vmem>>, vector<32x128xf32>
    %c168 = arith.constant 168 : index
    %c0_31 = arith.constant 0 : index
    %85 = vector.load %arg3[%c168, %c0_31] : memref<384x128xf32, #tpu.memory_space<vmem>>, vector<32x128xf32>
    %c200 = arith.constant 200 : index
    %c0_32 = arith.constant 0 : index
    %86 = vector.load %arg3[%c200, %c0_32] : memref<384x128xf32, #tpu.memory_space<vmem>>, vector<32x128xf32>
    %c32 = arith.constant 32 : index
    %c0_33 = arith.constant 0 : index
    %87 = vector.load %arg4[%c32, %c0_33] : memref<64x128xf32, #tpu.memory_space<vmem>>, vector<8x128xf32>
    %cst_34 = arith.constant 0.000000e+00 : f32
    %88 = vector.broadcast %cst_34 : f32 to vector<8x32xf32>
    %cst_35 = arith.constant 0.000000e+00 : f32
    %89 = vector.broadcast %cst_35 : f32 to vector<8x32xf32>
    %cst_36 = arith.constant 0.000000e+00 : f32
    %90 = vector.broadcast %cst_36 : f32 to vector<8x32xf32>
    %cst_37 = arith.constant 0.000000e+00 : f32
    %91 = vector.broadcast %cst_37 : f32 to vector<8x32xf32>
    %cst_38 = arith.constant dense<0.000000e+00> : vector<8x128xf32>
    %92 = tpu.matmul %90, %86, %cst_38 {dimension_numbers = #tpu.dot_dimension_numbers<[1], [0], [0], [1], [0, 0, 1, 1], [], []>} : vector<8x32xf32>, vector<32x128xf32>, vector<8x128xf32> -> vector<8x128xf32>
    %93 = arith.addf %92, %87 : vector<8x128xf32>
    %94 = vector.extract_strided_slice %83 {offsets = [0, 0, 0], sizes = [1, 8, 128], strides = [1, 1, 1]} : vector<8x8x128xf32> to vector<1x8x128xf32>
    %95 = vector.shape_cast %94 : vector<1x8x128xf32> to vector<8x128xf32>
    %cst_39 = arith.constant dense<0.000000e+00> : vector<8x128xf32>
    %96 = tpu.matmul %88, %84, %cst_39 {dimension_numbers = #tpu.dot_dimension_numbers<[1], [0], [0], [1], [0, 0, 1, 1], [], []>} : vector<8x32xf32>, vector<32x128xf32>, vector<8x128xf32> -> vector<8x128xf32>
    %97 = arith.addf %95, %96 : vector<8x128xf32>
    %98 = arith.negf %97 : vector<8x128xf32>
    %99 = math.exp %98 : vector<8x128xf32>
    %cst_40 = arith.constant 1.000000e+00 : f32
    %100 = vector.broadcast %cst_40 : f32 to vector<8x128xf32>
    %101 = arith.addf %100, %99 : vector<8x128xf32>
    %102 = arith.divf %100, %101 : vector<8x128xf32>
    %103 = math.tanh %97 : vector<8x128xf32>
    %104 = vector.extract_strided_slice %102 {offsets = [0, 0], sizes = [8, 32], strides = [1, 1]} : vector<8x128xf32> to vector<8x32xf32>
    %105 = vector.extract_strided_slice %102 {offsets = [0, 32], sizes = [8, 32], strides = [1, 1]} : vector<8x128xf32> to vector<8x32xf32>
    %106 = vector.extract_strided_slice %103 {offsets = [0, 64], sizes = [8, 32], strides = [1, 1]} : vector<8x128xf32> to vector<8x32xf32>
    %107 = vector.extract_strided_slice %102 {offsets = [0, 96], sizes = [8, 32], strides = [1, 1]} : vector<8x128xf32> to vector<8x32xf32>
    %108 = arith.mulf %105, %89 : vector<8x32xf32>
    %109 = arith.mulf %104, %106 : vector<8x32xf32>
    %110 = arith.addf %108, %109 : vector<8x32xf32>
    %111 = math.tanh %110 : vector<8x32xf32>
    %112 = arith.mulf %107, %111 : vector<8x32xf32>
    %cst_41 = arith.constant dense<0.000000e+00> : vector<8x128xf32>
    %113 = tpu.matmul %112, %85, %cst_41 {dimension_numbers = #tpu.dot_dimension_numbers<[1], [0], [0], [1], [0, 0, 1, 1], [], []>} : vector<8x32xf32>, vector<32x128xf32>, vector<8x128xf32> -> vector<8x128xf32>
    %114 = arith.addf %113, %93 : vector<8x128xf32>
    %115 = arith.negf %114 : vector<8x128xf32>
    %116 = math.exp %115 : vector<8x128xf32>
    %cst_42 = arith.constant 1.000000e+00 : f32
    %117 = vector.broadcast %cst_42 : f32 to vector<8x128xf32>
    %118 = arith.addf %117, %116 : vector<8x128xf32>
    %119 = arith.divf %117, %118 : vector<8x128xf32>
    %120 = math.tanh %114 : vector<8x128xf32>
    %121 = vector.extract_strided_slice %119 {offsets = [0, 0], sizes = [8, 32], strides = [1, 1]} : vector<8x128xf32> to vector<8x32xf32>
    %122 = vector.extract_strided_slice %119 {offsets = [0, 32], sizes = [8, 32], strides = [1, 1]} : vector<8x128xf32> to vector<8x32xf32>
    %123 = vector.extract_strided_slice %120 {offsets = [0, 64], sizes = [8, 32], strides = [1, 1]} : vector<8x128xf32> to vector<8x32xf32>
    %124 = vector.extract_strided_slice %119 {offsets = [0, 96], sizes = [8, 32], strides = [1, 1]} : vector<8x128xf32> to vector<8x32xf32>
    %125 = arith.mulf %122, %91 : vector<8x32xf32>
    %126 = arith.mulf %121, %123 : vector<8x32xf32>
    %127 = arith.addf %125, %126 : vector<8x32xf32>
    %128 = math.tanh %127 : vector<8x32xf32>
    %129 = arith.mulf %124, %128 : vector<8x32xf32>
    %cst_43 = arith.constant dense<0.000000e+00> : vector<8x128xf32>
    %130 = tpu.matmul %129, %86, %cst_43 {dimension_numbers = #tpu.dot_dimension_numbers<[1], [0], [0], [1], [0, 0, 1, 1], [], []>} : vector<8x32xf32>, vector<32x128xf32>, vector<8x128xf32> -> vector<8x128xf32>
    %131 = arith.addf %130, %87 : vector<8x128xf32>
    %132 = vector.extract_strided_slice %83 {offsets = [1, 0, 0], sizes = [1, 8, 128], strides = [1, 1, 1]} : vector<8x8x128xf32> to vector<1x8x128xf32>
    %133 = vector.shape_cast %132 : vector<1x8x128xf32> to vector<8x128xf32>
    %cst_44 = arith.constant dense<0.000000e+00> : vector<8x128xf32>
    %134 = tpu.matmul %112, %84, %cst_44 {dimension_numbers = #tpu.dot_dimension_numbers<[1], [0], [0], [1], [0, 0, 1, 1], [], []>} : vector<8x32xf32>, vector<32x128xf32>, vector<8x128xf32> -> vector<8x128xf32>
    %135 = arith.addf %133, %134 : vector<8x128xf32>
    %136 = arith.negf %135 : vector<8x128xf32>
    %137 = math.exp %136 : vector<8x128xf32>
    %cst_45 = arith.constant 1.000000e+00 : f32
    %138 = vector.broadcast %cst_45 : f32 to vector<8x128xf32>
    %139 = arith.addf %138, %137 : vector<8x128xf32>
    %140 = arith.divf %138, %139 : vector<8x128xf32>
    %141 = math.tanh %135 : vector<8x128xf32>
    %142 = vector.extract_strided_slice %140 {offsets = [0, 0], sizes = [8, 32], strides = [1, 1]} : vector<8x128xf32> to vector<8x32xf32>
    %143 = vector.extract_strided_slice %140 {offsets = [0, 32], sizes = [8, 32], strides = [1, 1]} : vector<8x128xf32> to vector<8x32xf32>
    %144 = vector.extract_strided_slice %141 {offsets = [0, 64], sizes = [8, 32], strides = [1, 1]} : vector<8x128xf32> to vector<8x32xf32>
    %145 = vector.extract_strided_slice %140 {offsets = [0, 96], sizes = [8, 32], strides = [1, 1]} : vector<8x128xf32> to vector<8x32xf32>
    %146 = arith.mulf %143, %110 : vector<8x32xf32>
    %147 = arith.mulf %142, %144 : vector<8x32xf32>
    %148 = arith.addf %146, %147 : vector<8x32xf32>
    %149 = math.tanh %148 : vector<8x32xf32>
    %150 = arith.mulf %145, %149 : vector<8x32xf32>
    %cst_46 = arith.constant dense<0.000000e+00> : vector<8x128xf32>
    %151 = tpu.matmul %150, %85, %cst_46 {dimension_numbers = #tpu.dot_dimension_numbers<[1], [0], [0], [1], [0, 0, 1, 1], [], []>} : vector<8x32xf32>, vector<32x128xf32>, vector<8x128xf32> -> vector<8x128xf32>
    %152 = arith.addf %151, %131 : vector<8x128xf32>
    %153 = arith.negf %152 : vector<8x128xf32>
    %154 = math.exp %153 : vector<8x128xf32>
    %cst_47 = arith.constant 1.000000e+00 : f32
    %155 = vector.broadcast %cst_47 : f32 to vector<8x128xf32>
    %156 = arith.addf %155, %154 : vector<8x128xf32>
    %157 = arith.divf %155, %156 : vector<8x128xf32>
    %158 = math.tanh %152 : vector<8x128xf32>
    %159 = vector.extract_strided_slice %157 {offsets = [0, 0], sizes = [8, 32], strides = [1, 1]} : vector<8x128xf32> to vector<8x32xf32>
    %160 = vector.extract_strided_slice %157 {offsets = [0, 32], sizes = [8, 32], strides = [1, 1]} : vector<8x128xf32> to vector<8x32xf32>
    %161 = vector.extract_strided_slice %158 {offsets = [0, 64], sizes = [8, 32], strides = [1, 1]} : vector<8x128xf32> to vector<8x32xf32>
    %162 = vector.extract_strided_slice %157 {offsets = [0, 96], sizes = [8, 32], strides = [1, 1]} : vector<8x128xf32> to vector<8x32xf32>
    %163 = arith.mulf %160, %127 : vector<8x32xf32>
    %164 = arith.mulf %159, %161 : vector<8x32xf32>
    %165 = arith.addf %163, %164 : vector<8x32xf32>
    %166 = math.tanh %165 : vector<8x32xf32>
    %167 = arith.mulf %162, %166 : vector<8x32xf32>
    %cst_48 = arith.constant dense<0.000000e+00> : vector<8x128xf32>
    %168 = tpu.matmul %167, %86, %cst_48 {dimension_numbers = #tpu.dot_dimension_numbers<[1], [0], [0], [1], [0, 0, 1, 1], [], []>} : vector<8x32xf32>, vector<32x128xf32>, vector<8x128xf32> -> vector<8x128xf32>
    %169 = arith.addf %168, %87 : vector<8x128xf32>
    %170 = vector.extract_strided_slice %83 {offsets = [2, 0, 0], sizes = [1, 8, 128], strides = [1, 1, 1]} : vector<8x8x128xf32> to vector<1x8x128xf32>
    %171 = vector.shape_cast %170 : vector<1x8x128xf32> to vector<8x128xf32>
    %cst_49 = arith.constant dense<0.000000e+00> : vector<8x128xf32>
    %172 = tpu.matmul %150, %84, %cst_49 {dimension_numbers = #tpu.dot_dimension_numbers<[1], [0], [0], [1], [0, 0, 1, 1], [], []>} : vector<8x32xf32>, vector<32x128xf32>, vector<8x128xf32> -> vector<8x128xf32>
    %173 = arith.addf %171, %172 : vector<8x128xf32>
    %174 = arith.negf %173 : vector<8x128xf32>
    %175 = math.exp %174 : vector<8x128xf32>
    %cst_50 = arith.constant 1.000000e+00 : f32
    %176 = vector.broadcast %cst_50 : f32 to vector<8x128xf32>
    %177 = arith.addf %176, %175 : vector<8x128xf32>
    %178 = arith.divf %176, %177 : vector<8x128xf32>
    %179 = math.tanh %173 : vector<8x128xf32>
    %180 = vector.extract_strided_slice %178 {offsets = [0, 0], sizes = [8, 32], strides = [1, 1]} : vector<8x128xf32> to vector<8x32xf32>
    %181 = vector.extract_strided_slice %178 {offsets = [0, 32], sizes = [8, 32], strides = [1, 1]} : vector<8x128xf32> to vector<8x32xf32>
    %182 = vector.extract_strided_slice %179 {offsets = [0, 64], sizes = [8, 32], strides = [1, 1]} : vector<8x128xf32> to vector<8x32xf32>
    %183 = vector.extract_strided_slice %178 {offsets = [0, 96], sizes = [8, 32], strides = [1, 1]} : vector<8x128xf32> to vector<8x32xf32>
    %184 = arith.mulf %181, %148 : vector<8x32xf32>
    %185 = arith.mulf %180, %182 : vector<8x32xf32>
    %186 = arith.addf %184, %185 : vector<8x32xf32>
    %187 = math.tanh %186 : vector<8x32xf32>
    %188 = arith.mulf %183, %187 : vector<8x32xf32>
    %cst_51 = arith.constant dense<0.000000e+00> : vector<8x128xf32>
    %189 = tpu.matmul %188, %85, %cst_51 {dimension_numbers = #tpu.dot_dimension_numbers<[1], [0], [0], [1], [0, 0, 1, 1], [], []>} : vector<8x32xf32>, vector<32x128xf32>, vector<8x128xf32> -> vector<8x128xf32>
    %190 = arith.addf %189, %169 : vector<8x128xf32>
    %191 = arith.negf %190 : vector<8x128xf32>
    %192 = math.exp %191 : vector<8x128xf32>
    %cst_52 = arith.constant 1.000000e+00 : f32
    %193 = vector.broadcast %cst_52 : f32 to vector<8x128xf32>
    %194 = arith.addf %193, %192 : vector<8x128xf32>
    %195 = arith.divf %193, %194 : vector<8x128xf32>
    %196 = math.tanh %190 : vector<8x128xf32>
    %197 = vector.extract_strided_slice %195 {offsets = [0, 0], sizes = [8, 32], strides = [1, 1]} : vector<8x128xf32> to vector<8x32xf32>
    %198 = vector.extract_strided_slice %195 {offsets = [0, 32], sizes = [8, 32], strides = [1, 1]} : vector<8x128xf32> to vector<8x32xf32>
    %199 = vector.extract_strided_slice %196 {offsets = [0, 64], sizes = [8, 32], strides = [1, 1]} : vector<8x128xf32> to vector<8x32xf32>
    %200 = vector.extract_strided_slice %195 {offsets = [0, 96], sizes = [8, 32], strides = [1, 1]} : vector<8x128xf32> to vector<8x32xf32>
    %201 = arith.mulf %198, %165 : vector<8x32xf32>
    %202 = arith.mulf %197, %199 : vector<8x32xf32>
    %203 = arith.addf %201, %202 : vector<8x32xf32>
    %204 = math.tanh %203 : vector<8x32xf32>
    %205 = arith.mulf %200, %204 : vector<8x32xf32>
    %cst_53 = arith.constant dense<0.000000e+00> : vector<8x128xf32>
    %206 = tpu.matmul %205, %86, %cst_53 {dimension_numbers = #tpu.dot_dimension_numbers<[1], [0], [0], [1], [0, 0, 1, 1], [], []>} : vector<8x32xf32>, vector<32x128xf32>, vector<8x128xf32> -> vector<8x128xf32>
    %207 = arith.addf %206, %87 : vector<8x128xf32>
    %208 = vector.extract_strided_slice %83 {offsets = [3, 0, 0], sizes = [1, 8, 128], strides = [1, 1, 1]} : vector<8x8x128xf32> to vector<1x8x128xf32>
    %209 = vector.shape_cast %208 : vector<1x8x128xf32> to vector<8x128xf32>
    %cst_54 = arith.constant dense<0.000000e+00> : vector<8x128xf32>
    %210 = tpu.matmul %188, %84, %cst_54 {dimension_numbers = #tpu.dot_dimension_numbers<[1], [0], [0], [1], [0, 0, 1, 1], [], []>} : vector<8x32xf32>, vector<32x128xf32>, vector<8x128xf32> -> vector<8x128xf32>
    %211 = arith.addf %209, %210 : vector<8x128xf32>
    %212 = arith.negf %211 : vector<8x128xf32>
    %213 = math.exp %212 : vector<8x128xf32>
    %cst_55 = arith.constant 1.000000e+00 : f32
    %214 = vector.broadcast %cst_55 : f32 to vector<8x128xf32>
    %215 = arith.addf %214, %213 : vector<8x128xf32>
    %216 = arith.divf %214, %215 : vector<8x128xf32>
    %217 = math.tanh %211 : vector<8x128xf32>
    %218 = vector.extract_strided_slice %216 {offsets = [0, 0], sizes = [8, 32], strides = [1, 1]} : vector<8x128xf32> to vector<8x32xf32>
    %219 = vector.extract_strided_slice %216 {offsets = [0, 32], sizes = [8, 32], strides = [1, 1]} : vector<8x128xf32> to vector<8x32xf32>
    %220 = vector.extract_strided_slice %217 {offsets = [0, 64], sizes = [8, 32], strides = [1, 1]} : vector<8x128xf32> to vector<8x32xf32>
    %221 = vector.extract_strided_slice %216 {offsets = [0, 96], sizes = [8, 32], strides = [1, 1]} : vector<8x128xf32> to vector<8x32xf32>
    %222 = arith.mulf %219, %186 : vector<8x32xf32>
    %223 = arith.mulf %218, %220 : vector<8x32xf32>
    %224 = arith.addf %222, %223 : vector<8x32xf32>
    %225 = math.tanh %224 : vector<8x32xf32>
    %226 = arith.mulf %221, %225 : vector<8x32xf32>
    %cst_56 = arith.constant dense<0.000000e+00> : vector<8x128xf32>
    %227 = tpu.matmul %226, %85, %cst_56 {dimension_numbers = #tpu.dot_dimension_numbers<[1], [0], [0], [1], [0, 0, 1, 1], [], []>} : vector<8x32xf32>, vector<32x128xf32>, vector<8x128xf32> -> vector<8x128xf32>
    %228 = arith.addf %227, %207 : vector<8x128xf32>
    %229 = arith.negf %228 : vector<8x128xf32>
    %230 = math.exp %229 : vector<8x128xf32>
    %cst_57 = arith.constant 1.000000e+00 : f32
    %231 = vector.broadcast %cst_57 : f32 to vector<8x128xf32>
    %232 = arith.addf %231, %230 : vector<8x128xf32>
    %233 = arith.divf %231, %232 : vector<8x128xf32>
    %234 = math.tanh %228 : vector<8x128xf32>
    %235 = vector.extract_strided_slice %233 {offsets = [0, 0], sizes = [8, 32], strides = [1, 1]} : vector<8x128xf32> to vector<8x32xf32>
    %236 = vector.extract_strided_slice %233 {offsets = [0, 32], sizes = [8, 32], strides = [1, 1]} : vector<8x128xf32> to vector<8x32xf32>
    %237 = vector.extract_strided_slice %234 {offsets = [0, 64], sizes = [8, 32], strides = [1, 1]} : vector<8x128xf32> to vector<8x32xf32>
    %238 = vector.extract_strided_slice %233 {offsets = [0, 96], sizes = [8, 32], strides = [1, 1]} : vector<8x128xf32> to vector<8x32xf32>
    %239 = arith.mulf %236, %203 : vector<8x32xf32>
    %240 = arith.mulf %235, %237 : vector<8x32xf32>
    %241 = arith.addf %239, %240 : vector<8x32xf32>
    %242 = math.tanh %241 : vector<8x32xf32>
    %243 = arith.mulf %238, %242 : vector<8x32xf32>
    %cst_58 = arith.constant dense<0.000000e+00> : vector<8x128xf32>
    %244 = tpu.matmul %243, %86, %cst_58 {dimension_numbers = #tpu.dot_dimension_numbers<[1], [0], [0], [1], [0, 0, 1, 1], [], []>} : vector<8x32xf32>, vector<32x128xf32>, vector<8x128xf32> -> vector<8x128xf32>
    %245 = arith.addf %244, %87 : vector<8x128xf32>
    %246 = vector.extract_strided_slice %83 {offsets = [4, 0, 0], sizes = [1, 8, 128], strides = [1, 1, 1]} : vector<8x8x128xf32> to vector<1x8x128xf32>
    %247 = vector.shape_cast %246 : vector<1x8x128xf32> to vector<8x128xf32>
    %cst_59 = arith.constant dense<0.000000e+00> : vector<8x128xf32>
    %248 = tpu.matmul %226, %84, %cst_59 {dimension_numbers = #tpu.dot_dimension_numbers<[1], [0], [0], [1], [0, 0, 1, 1], [], []>} : vector<8x32xf32>, vector<32x128xf32>, vector<8x128xf32> -> vector<8x128xf32>
    %249 = arith.addf %247, %248 : vector<8x128xf32>
    %250 = arith.negf %249 : vector<8x128xf32>
    %251 = math.exp %250 : vector<8x128xf32>
    %cst_60 = arith.constant 1.000000e+00 : f32
    %252 = vector.broadcast %cst_60 : f32 to vector<8x128xf32>
    %253 = arith.addf %252, %251 : vector<8x128xf32>
    %254 = arith.divf %252, %253 : vector<8x128xf32>
    %255 = math.tanh %249 : vector<8x128xf32>
    %256 = vector.extract_strided_slice %254 {offsets = [0, 0], sizes = [8, 32], strides = [1, 1]} : vector<8x128xf32> to vector<8x32xf32>
    %257 = vector.extract_strided_slice %254 {offsets = [0, 32], sizes = [8, 32], strides = [1, 1]} : vector<8x128xf32> to vector<8x32xf32>
    %258 = vector.extract_strided_slice %255 {offsets = [0, 64], sizes = [8, 32], strides = [1, 1]} : vector<8x128xf32> to vector<8x32xf32>
    %259 = vector.extract_strided_slice %254 {offsets = [0, 96], sizes = [8, 32], strides = [1, 1]} : vector<8x128xf32> to vector<8x32xf32>
    %260 = arith.mulf %257, %224 : vector<8x32xf32>
    %261 = arith.mulf %256, %258 : vector<8x32xf32>
    %262 = arith.addf %260, %261 : vector<8x32xf32>
    %263 = math.tanh %262 : vector<8x32xf32>
    %264 = arith.mulf %259, %263 : vector<8x32xf32>
    %cst_61 = arith.constant dense<0.000000e+00> : vector<8x128xf32>
    %265 = tpu.matmul %264, %85, %cst_61 {dimension_numbers = #tpu.dot_dimension_numbers<[1], [0], [0], [1], [0, 0, 1, 1], [], []>} : vector<8x32xf32>, vector<32x128xf32>, vector<8x128xf32> -> vector<8x128xf32>
    %266 = arith.addf %265, %245 : vector<8x128xf32>
    %267 = arith.negf %266 : vector<8x128xf32>
    %268 = math.exp %267 : vector<8x128xf32>
    %cst_62 = arith.constant 1.000000e+00 : f32
    %269 = vector.broadcast %cst_62 : f32 to vector<8x128xf32>
    %270 = arith.addf %269, %268 : vector<8x128xf32>
    %271 = arith.divf %269, %270 : vector<8x128xf32>
    %272 = math.tanh %266 : vector<8x128xf32>
    %273 = vector.extract_strided_slice %271 {offsets = [0, 0], sizes = [8, 32], strides = [1, 1]} : vector<8x128xf32> to vector<8x32xf32>
    %274 = vector.extract_strided_slice %271 {offsets = [0, 32], sizes = [8, 32], strides = [1, 1]} : vector<8x128xf32> to vector<8x32xf32>
    %275 = vector.extract_strided_slice %272 {offsets = [0, 64], sizes = [8, 32], strides = [1, 1]} : vector<8x128xf32> to vector<8x32xf32>
    %276 = vector.extract_strided_slice %271 {offsets = [0, 96], sizes = [8, 32], strides = [1, 1]} : vector<8x128xf32> to vector<8x32xf32>
    %277 = arith.mulf %274, %241 : vector<8x32xf32>
    %278 = arith.mulf %273, %275 : vector<8x32xf32>
    %279 = arith.addf %277, %278 : vector<8x32xf32>
    %280 = math.tanh %279 : vector<8x32xf32>
    %281 = arith.mulf %276, %280 : vector<8x32xf32>
    %cst_63 = arith.constant dense<0.000000e+00> : vector<8x128xf32>
    %282 = tpu.matmul %281, %86, %cst_63 {dimension_numbers = #tpu.dot_dimension_numbers<[1], [0], [0], [1], [0, 0, 1, 1], [], []>} : vector<8x32xf32>, vector<32x128xf32>, vector<8x128xf32> -> vector<8x128xf32>
    %283 = arith.addf %282, %87 : vector<8x128xf32>
    %284 = vector.extract_strided_slice %83 {offsets = [5, 0, 0], sizes = [1, 8, 128], strides = [1, 1, 1]} : vector<8x8x128xf32> to vector<1x8x128xf32>
    %285 = vector.shape_cast %284 : vector<1x8x128xf32> to vector<8x128xf32>
    %cst_64 = arith.constant dense<0.000000e+00> : vector<8x128xf32>
    %286 = tpu.matmul %264, %84, %cst_64 {dimension_numbers = #tpu.dot_dimension_numbers<[1], [0], [0], [1], [0, 0, 1, 1], [], []>} : vector<8x32xf32>, vector<32x128xf32>, vector<8x128xf32> -> vector<8x128xf32>
    %287 = arith.addf %285, %286 : vector<8x128xf32>
    %288 = arith.negf %287 : vector<8x128xf32>
    %289 = math.exp %288 : vector<8x128xf32>
    %cst_65 = arith.constant 1.000000e+00 : f32
    %290 = vector.broadcast %cst_65 : f32 to vector<8x128xf32>
    %291 = arith.addf %290, %289 : vector<8x128xf32>
    %292 = arith.divf %290, %291 : vector<8x128xf32>
    %293 = math.tanh %287 : vector<8x128xf32>
    %294 = vector.extract_strided_slice %292 {offsets = [0, 0], sizes = [8, 32], strides = [1, 1]} : vector<8x128xf32> to vector<8x32xf32>
    %295 = vector.extract_strided_slice %292 {offsets = [0, 32], sizes = [8, 32], strides = [1, 1]} : vector<8x128xf32> to vector<8x32xf32>
    %296 = vector.extract_strided_slice %293 {offsets = [0, 64], sizes = [8, 32], strides = [1, 1]} : vector<8x128xf32> to vector<8x32xf32>
    %297 = vector.extract_strided_slice %292 {offsets = [0, 96], sizes = [8, 32], strides = [1, 1]} : vector<8x128xf32> to vector<8x32xf32>
    %298 = arith.mulf %295, %262 : vector<8x32xf32>
    %299 = arith.mulf %294, %296 : vector<8x32xf32>
    %300 = arith.addf %298, %299 : vector<8x32xf32>
    %301 = math.tanh %300 : vector<8x32xf32>
    %302 = arith.mulf %297, %301 : vector<8x32xf32>
    %cst_66 = arith.constant dense<0.000000e+00> : vector<8x128xf32>
    %303 = tpu.matmul %302, %85, %cst_66 {dimension_numbers = #tpu.dot_dimension_numbers<[1], [0], [0], [1], [0, 0, 1, 1], [], []>} : vector<8x32xf32>, vector<32x128xf32>, vector<8x128xf32> -> vector<8x128xf32>
    %304 = arith.addf %303, %283 : vector<8x128xf32>
    %305 = arith.negf %304 : vector<8x128xf32>
    %306 = math.exp %305 : vector<8x128xf32>
    %cst_67 = arith.constant 1.000000e+00 : f32
    %307 = vector.broadcast %cst_67 : f32 to vector<8x128xf32>
    %308 = arith.addf %307, %306 : vector<8x128xf32>
    %309 = arith.divf %307, %308 : vector<8x128xf32>
    %310 = math.tanh %304 : vector<8x128xf32>
    %311 = vector.extract_strided_slice %309 {offsets = [0, 0], sizes = [8, 32], strides = [1, 1]} : vector<8x128xf32> to vector<8x32xf32>
    %312 = vector.extract_strided_slice %309 {offsets = [0, 32], sizes = [8, 32], strides = [1, 1]} : vector<8x128xf32> to vector<8x32xf32>
    %313 = vector.extract_strided_slice %310 {offsets = [0, 64], sizes = [8, 32], strides = [1, 1]} : vector<8x128xf32> to vector<8x32xf32>
    %314 = vector.extract_strided_slice %309 {offsets = [0, 96], sizes = [8, 32], strides = [1, 1]} : vector<8x128xf32> to vector<8x32xf32>
    %315 = arith.mulf %312, %279 : vector<8x32xf32>
    %316 = arith.mulf %311, %313 : vector<8x32xf32>
    %317 = arith.addf %315, %316 : vector<8x32xf32>
    %318 = math.tanh %317 : vector<8x32xf32>
    %319 = arith.mulf %314, %318 : vector<8x32xf32>
    %cst_68 = arith.constant dense<0.000000e+00> : vector<8x128xf32>
    %320 = tpu.matmul %319, %86, %cst_68 {dimension_numbers = #tpu.dot_dimension_numbers<[1], [0], [0], [1], [0, 0, 1, 1], [], []>} : vector<8x32xf32>, vector<32x128xf32>, vector<8x128xf32> -> vector<8x128xf32>
    %321 = arith.addf %320, %87 : vector<8x128xf32>
    %322 = vector.extract_strided_slice %83 {offsets = [6, 0, 0], sizes = [1, 8, 128], strides = [1, 1, 1]} : vector<8x8x128xf32> to vector<1x8x128xf32>
    %323 = vector.shape_cast %322 : vector<1x8x128xf32> to vector<8x128xf32>
    %cst_69 = arith.constant dense<0.000000e+00> : vector<8x128xf32>
    %324 = tpu.matmul %302, %84, %cst_69 {dimension_numbers = #tpu.dot_dimension_numbers<[1], [0], [0], [1], [0, 0, 1, 1], [], []>} : vector<8x32xf32>, vector<32x128xf32>, vector<8x128xf32> -> vector<8x128xf32>
    %325 = arith.addf %323, %324 : vector<8x128xf32>
    %326 = arith.negf %325 : vector<8x128xf32>
    %327 = math.exp %326 : vector<8x128xf32>
    %cst_70 = arith.constant 1.000000e+00 : f32
    %328 = vector.broadcast %cst_70 : f32 to vector<8x128xf32>
    %329 = arith.addf %328, %327 : vector<8x128xf32>
    %330 = arith.divf %328, %329 : vector<8x128xf32>
    %331 = math.tanh %325 : vector<8x128xf32>
    %332 = vector.extract_strided_slice %330 {offsets = [0, 0], sizes = [8, 32], strides = [1, 1]} : vector<8x128xf32> to vector<8x32xf32>
    %333 = vector.extract_strided_slice %330 {offsets = [0, 32], sizes = [8, 32], strides = [1, 1]} : vector<8x128xf32> to vector<8x32xf32>
    %334 = vector.extract_strided_slice %331 {offsets = [0, 64], sizes = [8, 32], strides = [1, 1]} : vector<8x128xf32> to vector<8x32xf32>
    %335 = vector.extract_strided_slice %330 {offsets = [0, 96], sizes = [8, 32], strides = [1, 1]} : vector<8x128xf32> to vector<8x32xf32>
    %336 = arith.mulf %333, %300 : vector<8x32xf32>
    %337 = arith.mulf %332, %334 : vector<8x32xf32>
    %338 = arith.addf %336, %337 : vector<8x32xf32>
    %339 = math.tanh %338 : vector<8x32xf32>
    %340 = arith.mulf %335, %339 : vector<8x32xf32>
    %cst_71 = arith.constant dense<0.000000e+00> : vector<8x128xf32>
    %341 = tpu.matmul %340, %85, %cst_71 {dimension_numbers = #tpu.dot_dimension_numbers<[1], [0], [0], [1], [0, 0, 1, 1], [], []>} : vector<8x32xf32>, vector<32x128xf32>, vector<8x128xf32> -> vector<8x128xf32>
    %342 = arith.addf %341, %321 : vector<8x128xf32>
    %343 = arith.negf %342 : vector<8x128xf32>
    %344 = math.exp %343 : vector<8x128xf32>
    %cst_72 = arith.constant 1.000000e+00 : f32
    %345 = vector.broadcast %cst_72 : f32 to vector<8x128xf32>
    %346 = arith.addf %345, %344 : vector<8x128xf32>
    %347 = arith.divf %345, %346 : vector<8x128xf32>
    %348 = math.tanh %342 : vector<8x128xf32>
    %349 = vector.extract_strided_slice %347 {offsets = [0, 0], sizes = [8, 32], strides = [1, 1]} : vector<8x128xf32> to vector<8x32xf32>
    %350 = vector.extract_strided_slice %347 {offsets = [0, 32], sizes = [8, 32], strides = [1, 1]} : vector<8x128xf32> to vector<8x32xf32>
    %351 = vector.extract_strided_slice %348 {offsets = [0, 64], sizes = [8, 32], strides = [1, 1]} : vector<8x128xf32> to vector<8x32xf32>
    %352 = vector.extract_strided_slice %347 {offsets = [0, 96], sizes = [8, 32], strides = [1, 1]} : vector<8x128xf32> to vector<8x32xf32>
    %353 = arith.mulf %350, %317 : vector<8x32xf32>
    %354 = arith.mulf %349, %351 : vector<8x32xf32>
    %355 = arith.addf %353, %354 : vector<8x32xf32>
    %356 = math.tanh %355 : vector<8x32xf32>
    %357 = arith.mulf %352, %356 : vector<8x32xf32>
    %cst_73 = arith.constant dense<0.000000e+00> : vector<8x128xf32>
    %358 = tpu.matmul %357, %86, %cst_73 {dimension_numbers = #tpu.dot_dimension_numbers<[1], [0], [0], [1], [0, 0, 1, 1], [], []>} : vector<8x32xf32>, vector<32x128xf32>, vector<8x128xf32> -> vector<8x128xf32>
    %359 = arith.addf %358, %87 : vector<8x128xf32>
    %360 = vector.extract_strided_slice %83 {offsets = [7, 0, 0], sizes = [1, 8, 128], strides = [1, 1, 1]} : vector<8x8x128xf32> to vector<1x8x128xf32>
    %361 = vector.shape_cast %360 : vector<1x8x128xf32> to vector<8x128xf32>
    %cst_74 = arith.constant dense<0.000000e+00> : vector<8x128xf32>
    %362 = tpu.matmul %340, %84, %cst_74 {dimension_numbers = #tpu.dot_dimension_numbers<[1], [0], [0], [1], [0, 0, 1, 1], [], []>} : vector<8x32xf32>, vector<32x128xf32>, vector<8x128xf32> -> vector<8x128xf32>
    %363 = arith.addf %361, %362 : vector<8x128xf32>
    %364 = arith.negf %363 : vector<8x128xf32>
    %365 = math.exp %364 : vector<8x128xf32>
    %cst_75 = arith.constant 1.000000e+00 : f32
    %366 = vector.broadcast %cst_75 : f32 to vector<8x128xf32>
    %367 = arith.addf %366, %365 : vector<8x128xf32>
    %368 = arith.divf %366, %367 : vector<8x128xf32>
    %369 = math.tanh %363 : vector<8x128xf32>
    %370 = vector.extract_strided_slice %368 {offsets = [0, 0], sizes = [8, 32], strides = [1, 1]} : vector<8x128xf32> to vector<8x32xf32>
    %371 = vector.extract_strided_slice %368 {offsets = [0, 32], sizes = [8, 32], strides = [1, 1]} : vector<8x128xf32> to vector<8x32xf32>
    %372 = vector.extract_strided_slice %369 {offsets = [0, 64], sizes = [8, 32], strides = [1, 1]} : vector<8x128xf32> to vector<8x32xf32>
    %373 = vector.extract_strided_slice %368 {offsets = [0, 96], sizes = [8, 32], strides = [1, 1]} : vector<8x128xf32> to vector<8x32xf32>
    %374 = arith.mulf %371, %338 : vector<8x32xf32>
    %375 = arith.mulf %370, %372 : vector<8x32xf32>
    %376 = arith.addf %374, %375 : vector<8x32xf32>
    %377 = math.tanh %376 : vector<8x32xf32>
    %378 = arith.mulf %373, %377 : vector<8x32xf32>
    %cst_76 = arith.constant dense<0.000000e+00> : vector<8x128xf32>
    %379 = tpu.matmul %378, %85, %cst_76 {dimension_numbers = #tpu.dot_dimension_numbers<[1], [0], [0], [1], [0, 0, 1, 1], [], []>} : vector<8x32xf32>, vector<32x128xf32>, vector<8x128xf32> -> vector<8x128xf32>
    %380 = arith.addf %379, %359 : vector<8x128xf32>
    %381 = arith.negf %380 : vector<8x128xf32>
    %382 = math.exp %381 : vector<8x128xf32>
    %cst_77 = arith.constant 1.000000e+00 : f32
    %383 = vector.broadcast %cst_77 : f32 to vector<8x128xf32>
    %384 = arith.addf %383, %382 : vector<8x128xf32>
    %385 = arith.divf %383, %384 : vector<8x128xf32>
    %386 = math.tanh %380 : vector<8x128xf32>
    %387 = vector.extract_strided_slice %385 {offsets = [0, 0], sizes = [8, 32], strides = [1, 1]} : vector<8x128xf32> to vector<8x32xf32>
    %388 = vector.extract_strided_slice %385 {offsets = [0, 32], sizes = [8, 32], strides = [1, 1]} : vector<8x128xf32> to vector<8x32xf32>
    %389 = vector.extract_strided_slice %386 {offsets = [0, 64], sizes = [8, 32], strides = [1, 1]} : vector<8x128xf32> to vector<8x32xf32>
    %390 = vector.extract_strided_slice %385 {offsets = [0, 96], sizes = [8, 32], strides = [1, 1]} : vector<8x128xf32> to vector<8x32xf32>
    %391 = arith.mulf %388, %355 : vector<8x32xf32>
    %392 = arith.mulf %387, %389 : vector<8x32xf32>
    %393 = arith.addf %391, %392 : vector<8x32xf32>
    %394 = math.tanh %393 : vector<8x32xf32>
    %395 = arith.mulf %390, %394 : vector<8x32xf32>
    %c232 = arith.constant 232 : index
    %c0_78 = arith.constant 0 : index
    %396 = vector.load %arg3[%c232, %c0_78] : memref<384x128xf32, #tpu.memory_space<vmem>>, vector<32x64xf32>
    %cst_79 = arith.constant dense<0.000000e+00> : vector<8x64xf32>
    %397 = tpu.matmul %378, %396, %cst_79 {dimension_numbers = #tpu.dot_dimension_numbers<[1], [0], [0], [1], [0, 0, 1, 1], [], []>} : vector<8x32xf32>, vector<32x64xf32>, vector<8x64xf32> -> vector<8x64xf32>
    %c264 = arith.constant 264 : index
    %c0_80 = arith.constant 0 : index
    %398 = vector.load %arg3[%c264, %c0_80] : memref<384x128xf32, #tpu.memory_space<vmem>>, vector<32x64xf32>
    %cst_81 = arith.constant dense<0.000000e+00> : vector<8x64xf32>
    %399 = tpu.matmul %395, %398, %cst_81 {dimension_numbers = #tpu.dot_dimension_numbers<[1], [0], [0], [1], [0, 0, 1, 1], [], []>} : vector<8x32xf32>, vector<32x64xf32>, vector<8x64xf32> -> vector<8x64xf32>
    %400 = arith.addf %397, %399 : vector<8x64xf32>
    %c40_82 = arith.constant 40 : index
    %c0_83 = arith.constant 0 : index
    %401 = vector.load %arg4[%c40_82, %c0_83] : memref<64x128xf32, #tpu.memory_space<vmem>>, vector<8x64xf32>
    %402 = arith.addf %400, %401 : vector<8x64xf32>
    %cst_84 = arith.constant 0.000000e+00 : f32
    %403 = vector.broadcast %cst_84 : f32 to vector<8x64xf32>
    %404 = arith.cmpf ogt, %402, %403 : vector<8x64xf32>
    %cst_85 = arith.constant 0.000000e+00 : f32
    %405 = vector.broadcast %cst_85 : f32 to vector<8x64xf32>
    %406 = arith.minimumf %402, %405 : vector<8x64xf32>
    %407 = math.exp %406 : vector<8x64xf32>
    %cst_86 = arith.constant 1.000000e+00 : f32
    %408 = vector.broadcast %cst_86 : f32 to vector<8x64xf32>
    %409 = arith.subf %407, %408 : vector<8x64xf32>
    %410 = arith.select %404, %402, %409 : vector<8x64xi1>, vector<8x64xf32>
    %c368 = arith.constant 368 : index
    %c0_87 = arith.constant 0 : index
    %411 = vector.load %arg3[%c368, %c0_87] : memref<384x128xf32, #tpu.memory_space<vmem>>, vector<15x5xf32>
    %cst_88 = arith.constant dense<0.000000e+00> : vector<8x5xf32>
    %412 = tpu.matmul %1, %411, %cst_88 {dimension_numbers = #tpu.dot_dimension_numbers<[1], [0], [0], [1], [0, 0, 1, 1], [], []>} : vector<8x15xf32>, vector<15x5xf32>, vector<8x5xf32> -> vector<8x5xf32>
    %c56 = arith.constant 56 : index
    %c0_89 = arith.constant 0 : index
    %413 = vector.load %arg4[%c56, %c0_89] : memref<64x128xf32, #tpu.memory_space<vmem>>, vector<8x5xf32>
    %414 = arith.addf %412, %413 : vector<8x5xf32>
    %cst_90 = arith.constant 0.000000e+00 : f32
    %415 = vector.broadcast %cst_90 : f32 to vector<8x5xf32>
    %416 = arith.cmpf ogt, %414, %415 : vector<8x5xf32>
    %cst_91 = arith.constant 0.000000e+00 : f32
    %417 = vector.broadcast %cst_91 : f32 to vector<8x5xf32>
    %418 = arith.minimumf %414, %417 : vector<8x5xf32>
    %419 = math.exp %418 : vector<8x5xf32>
    %cst_92 = arith.constant 1.000000e+00 : f32
    %420 = vector.broadcast %cst_92 : f32 to vector<8x5xf32>
    %421 = arith.subf %419, %420 : vector<8x5xf32>
    %422 = arith.select %416, %414, %421 : vector<8x5xi1>, vector<8x5xf32>
    %c296 = arith.constant 296 : index
    %c0_93 = arith.constant 0 : index
    %423 = vector.load %arg3[%c296, %c0_93] : memref<384x128xf32, #tpu.memory_space<vmem>>, vector<64x1xf32>
    %cst_94 = arith.constant dense<0.000000e+00> : vector<8x1xf32>
    %424 = tpu.matmul %410, %423, %cst_94 {dimension_numbers = #tpu.dot_dimension_numbers<[1], [0], [0], [1], [0, 0, 1, 1], [], []>} : vector<8x64xf32>, vector<64x1xf32>, vector<8x1xf32> -> vector<8x1xf32>
    %c360 = arith.constant 360 : index
    %c0_95 = arith.constant 0 : index
    %425 = vector.load %arg3[%c360, %c0_95] : memref<384x128xf32, #tpu.memory_space<vmem>>, vector<5x1xf32>
    %cst_96 = arith.constant dense<0.000000e+00> : vector<8x1xf32>
    %426 = tpu.matmul %422, %425, %cst_96 {dimension_numbers = #tpu.dot_dimension_numbers<[1], [0], [0], [1], [0, 0, 1, 1], [], []>} : vector<8x5xf32>, vector<5x1xf32>, vector<8x1xf32> -> vector<8x1xf32>
    %427 = arith.addf %424, %426 : vector<8x1xf32>
    %c48 = arith.constant 48 : index
    %c0_97 = arith.constant 0 : index
    %428 = vector.load %arg4[%c48, %c0_97] : memref<64x128xf32, #tpu.memory_space<vmem>>, vector<8x1xf32>
    %429 = arith.addf %427, %428 : vector<8x1xf32>
    %c0_98 = arith.constant 0 : index
    %c0_99 = arith.constant 0 : index
    %430 = vector.load %arg5[%c0_98, %c0_99] : memref<8x1xf32, #tpu.memory_space<vmem>>, vector<8x1xf32>
    tpu.vector_store %arg5[%c0_98, %c0_99], %429 {strides = array<i32>} : memref<8x1xf32, #tpu.memory_space<vmem>>, vector<8x1xf32>,
    return
  }
  func.func @transform_0(%arg0: i32) -> (i32, i32) {
    %c0_i32 = arith.constant 0 : i32
    %c0_i32_0 = arith.constant 0 : i32
    return %arg0, %c0_i32 : i32, i32
  }
  func.func @transform_1(%arg0: i32) -> (i32, i32) {
    %c0_i32 = arith.constant 0 : i32
    %c0_i32_0 = arith.constant 0 : i32
    return %arg0, %c0_i32 : i32, i32
  }
  func.func @transform_2(%arg0: i32) -> (i32, i32) {
    %c0_i32 = arith.constant 0 : i32
    %c0_i32_0 = arith.constant 0 : i32
    %c0_i32_1 = arith.constant 0 : i32
    return %c0_i32, %c0_i32_0 : i32, i32
  }
  func.func @transform_3(%arg0: i32) -> (i32, i32) {
    %c0_i32 = arith.constant 0 : i32
    %c0_i32_0 = arith.constant 0 : i32
    %c0_i32_1 = arith.constant 0 : i32
    return %c0_i32, %c0_i32_0 : i32, i32
  }
  func.func @transform_4(%arg0: i32) -> (i32, i32) {
    %c0_i32 = arith.constant 0 : i32
    %c0_i32_0 = arith.constant 0 : i32
    return %arg0, %c0_i32 : i32, i32
  }
}

</mosaic_0001>

<bundles_post_ra>
// kernel: attention_rnn_forward.1
= control target key start
LH: loop header
LB: loop body
LE: loop exit
PB: predicated region body
PF: predicated region fallthrough
CT: control target
= control target key end

     0   :  { %9 = vsyncpa [#allocation3], 0  ;;  %s7823_s15 = smov 0   ;;  %s8729_s0 = inlined_call_operand.vmem [shape: f32[128,8], index: 0, kind: input, shape index: {}]   ;;  %s8730_s1 = inlined_call_operand.vmem [shape: f32[16,15], index: 1, kind: input, shape index: {}]   ;;  %s8731_s2 = inlined_call_operand.hbm [shape: f32[384,128], index: 2, kind: input, shape index: {}]   ;;  %s8732_s3 = inlined_call_operand.vmem [shape: f32[64,128], index: 3, kind: input, shape index: {}]   ;;  %s8733_s4 = inlined_call_operand.vmem [shape: f32[16,1], index: 4, kind: output, shape index: {}]  }
   0x1 LB: > { %s7829_s16 = sadd.s32 4294967295, %s7784_s15   ;;  %p6322_p0 = scmp.ge.s32.totalorder %s7784_s15, 1  ;;  %s7784_s15 = sphi %s7823_s15, %s15_s15  }
   0x2   : > { %p140_p1 = scmp.lt.s32.totalorder %s7784_s15, 3  ;;  %s7786_s17 = smov [#allocation2]  }
   0x3   : > { %s152_s18 = sshll.u32 %s7786_s17, 4  ;;  %p8734_p3 = scmp.eq.s32.totalorder %s7829_s16, 0  ;;  %s153_s18 = int_to_ptr.vmem [resolvable:$true] %s152_s18 }
   0x4   : > { %p7833_p2 = pnand %p6322_p0, %p140_p1  ;;  %s7746_s23 = scalar_lea.hbm %s8731_s2, 6144 }
   0x5   : > { %p7747_p6 = scmp.ne.s32.totalorder %s8731_s2, %s7746_s23  ;;  %p7753_p10 = scmp.lt.u32.totalorder %s7746_s23, %s8731_s2 }
   0x6   : > { %s8736_s19 = scalar_select %p7833_p2, 1, 0 }
   0x7   : > { %p7508_p4 = pneg %p7833_p2 }
   0x9   : > { %p7842_p5 = pnand %p8734_p3, %p7508_p4 }
   0xb   : > { %p7748_p7 = pneg %p7842_p5 }
   0xd   : > { %p7749_p8 = pnand %p7748_p7, %p7747_p6 }
   0xf   : > { %p7750_p9 = pneg %p7749_p8 }
  0x11   : > { %p7755_p11 = pnand %p7753_p10, %p7750_p9 }
  0x13   : > { %7758 = shalt.err (!%p7755_p11)
}
  0x14   : > { %s7759_s28 = scalar_lea.vmem %s153_s18, 6144  ;;  %p7767_p1 = scmp.lt.s32.totalorder %s153_s18, %s153_s18 }
  0x15   : > { %p7760_p12 = scmp.ne.s32.totalorder %s153_s18, %s7759_s28  ;;  %p7768_p4 = scmp.lt.s32.totalorder %s7759_s28, %s7759_s28 }
  0x17   : > { %p7762_p13 = pnand %p7760_p12, %p7748_p7  ;;  %p7769_p3 = por %p7768_p4, %p7767_p1 }
  0x19   : > { %p7763_p0 = pneg %p7762_p13 }
  0x1b   : > { %p7770_p2 = pnand %p7769_p3, %p7763_p0 }
  0x1d   : > { %7773 = shalt.err (!%p7770_p2)
}
  0x1e   : > { %s7787_s29 = smov 128   ;;  %s7788_s30 = smov 8  }
  0x1f   : > { %7511 = dma.hbm_to_vmem [thread:$0]  (!%p7842_p5), %s8731_s2, 6144, %s153_s18, [#allocation3], %s7787_s29, %s7787_s29, %s7788_s30  }
  0x20   : > { %p8738_p6 = scmp.ne.s32.totalorder %s8736_s19, 0 }
  0x21   : > { %p8739_p8 = scmp.eq.s32.totalorder (!%p8738_p6), %s7829_s16, 0 }
  0x22   : > { %187 = sbr.rel (%p8738_p6) target bundleno = 9383 (0x24a7), region = 36 }
  0x29   : > { %7779 = dma.done.wait (%p8739_p8), [#allocation3], 6144   ;;  %p8740_p7 = pmov %p8739_p8 }
  0x2a   : > { %s6327_s7 = sshll.u32 %s7829_s16, 3  ;;  %vm240_vm0 = vcmask 64512   ;;  %v239_v0 = vld [vmem:[#allocation2] sm:$0xff]  ;;  %v379_v4 = vld [vmem:[#allocation2 + $0x8] sm:$0xff]  ;;  %v380_v5 = vld [vmem:[#allocation2 + $0x10] sm:$0xff]  ;;  %v7789_v15 = vmov 0.0  }
  0x2b   : > { %7781 = vsyncadd (%p8740_p7), [#allocation3], 4294961152  ;;  %p217_p2 = scmp.lt.s32.totalorder %s6327_s7, 15  ;;  %6717 = vmatprep.subr.mxu0 %v239_v0  ;;  %v381_v6 = vld [vmem:[#allocation2 + $0x18] sm:$0xff]  ;;  %v7276_v8 = vpack.c.bf16 %v380_v5, %v379_v4  ;;  %v382_v9 = vld [vmem:[#allocation2 + $0x20] sm:$0xff]  ;;  %vm383_vm1 = vcmask 261120  }
  0x2c   : > { %6718 = vmatpush3.msra.mxu0 %v239_v0  ;;  %v7280_v11 = vpack.c.bf16 %v382_v9, %v381_v6  ;;  %v370_v16 = vld [vmem:[%s8732_s3] sm:$0xff]  ;;  %vm7790_vm2 = vmmov 0   ;;  %s7791_s14 = smov 64   ;;  %s7792_s17 = smov 96   ;;  %vm3129_vm3 = vcmask 523264   ;;  %vm5999_vm4 = vcmask 1046528  }
  0x2d   : > { %s8742_s7 = smov (!%p217_p2, %s6327_s7), 15  ;;  %7277 = vmatprep.subr.bf16.mxu1 %v7276_v8  ;;  %6751 = vmatprep.subr.mxu0 %v7789_v15  ;;  %s7793_s18 = smov 32   ;;  %vm7797_vm5 = vmmov 1   ;;  %vm5995_vm7 = vcmask 121856   ;;  %vm6092_vm8 = vcmask 1044480   ;;  %vm6088_vm10 = vcmask 39936  }
  0x2e   : > { %s6328_s8 = sshll.u32 %s8742_s7, 3  ;;  %7279 = vmatpush3.bf16.msra.mxu1 %v7276_v8  ;;  %p222_p3 = scmp.lt.s32.totalorder %s7829_s16, 1  ;;  %vm7466_vm6 = vmpackc.low %vm5999_vm4, %vm7797_vm5  ;;  %vm6241_vm12 = vcmask 7168  }
  0x2f   : > { %s220_s11 = scalar_lea.vmem %s8729_s0, %s6328_s8  ;;  %7281 = vmatprep.subr.bf16.mxu1 %v7280_v11 }
  0x30   : > { %v230_v1 = vld [vmem:[%s220_s11] sm:$0xff]  ;;  %v231_v2 = vld [vmem:[%s220_s11 + $0x8] sm:$0xff]  ;;  %v232_v3 = vld [vmem:[%s220_s11 + $0x10] sm:$0xff]  ;;  %s8744_s16 = smov (!%p222_p3, %s7829_s16), 1 }
  0x31   : > { %6719 = vmatprep.mubr.msk.f32.mxu0 %vm240_vm0, %v230_v1  ;;  %v233_v7 = vld [vmem:[%s220_s11 + $0x18] sm:$0xff]  ;;  %v234_v10 = vld [vmem:[%s220_s11 + $0x20] sm:$0xff]  ;;  %v235_v12 = vld [vmem:[%s220_s11 + $0x28] sm:$0xff]  ;;  %s6329_s27 = sshll.u32 %s8744_s16, 3 }
  0x32   : > { %6720 = vmatmul.mubr.msk.f32.vlgmr.msra.gmra.mrb[0].mxu0 %vm240_vm0, %v231_v2  ;;  %v236_v13 = vld [vmem:[%s220_s11 + $0x30] sm:$0xff]  ;;  %7283 = vmatpush3.bf16.msra.mxu1 %v7280_v11  ;;  %v237_v14 = vld [vmem:[%s220_s11 + $0x38] sm:$0xff]  ;;  %s225_s30 = scalar_lea.vmem %s8730_s1, %s6329_s27  ;;  %s229_s13 = scalar_lea.vmem %s8733_s4, %s6329_s27 }
  0x33   : > { %6722 = vmatprep.mubr.msk.f32.mxu0 %vm240_vm0, %v232_v3  ;;  %6761 = vmatprep.subr.mxu1 %v7789_v15 }
  0x36   : > { %6723 = vmatmul.mubr.msk.f32.gmra.mrb[2].mxu0 %vm240_vm0, %v233_v7 }
  0x37   : > { %6725 = vmatprep.mubr.msk.f32.mxu0 %vm240_vm0, %v234_v10 }
  0x3a   : > { %6726 = vmatmul.mubr.msk.f32.gmra.mrb[4].mxu0 %vm240_vm0, %v235_v12 }
  0x3b   : > { %6728 = vmatprep.mubr.msk.f32.mxu0 %vm240_vm0, %v236_v13 }
  0x3e   : > { %6729 = vmatmul.mubr.msk.f32.gmra.mrb[6].mxu0 %vm240_vm0, %v237_v14 }
  0x3f   : > { %6753 = vmatprep.mubr.msk.f32.mxu0 %vm7790_vm2, %v7789_v15 }
 0x105   : > { %v6721_v17 = vpop.f32.mrb[0].mxu0 }
 0x106   : > { %v331_v18 = vpop.f32.mrb[1].mxu0  ;;  %v7887_v20 = vadd.f32 %v6721_v17, %v370_v16 }
 0x107   : > { %v7885_v19 = vadd.f32 %v370_v16, %v331_v18 }
 0x109   : > { %v6724_v21 = vpop.f32.mrb[2].mxu0  ;;  %6739 = vmatprep.mubr.msk.f32.mxu1 %vm383_vm1, %v7885_v19  ;;  %6752 = vmatpush3.xpose.msk.msra.mxu0 %vm383_vm1, %v7885_v19 }
 0x10a   : > { %v341_v22 = vpop.f32.mrb[3].mxu0  ;;  %6740 = vmatmul.mubr.msk.f32.vlgmr.msra.gmra.mrb[0].mxu1 %vm383_vm1, %v7887_v20  ;;  %6756 = vmatprep.subr.mxu0 %v7789_v15  ;;  %v7898_v24 = vadd.f32 %v6724_v21, %v370_v16 }
 0x10b   : > { %v7896_v23 = vadd.f32 %v370_v16, %v341_v22 }
 0x10d   : > { %v6727_v25 = vpop.f32.mrb[4].mxu0  ;;  %6742 = vmatprep.mubr.msk.f32.mxu1 %vm383_vm1, %v7896_v23  ;;  %6762 = vmatpush3.xpose.msk.msra.mxu1 %vm383_vm1, %v7896_v23 }
 0x10e   : > { %v7904_v26 = vadd.f32 %v6727_v25, %v370_v16  ;;  %v351_v27 = vpop.f32.mrb[5].mxu0  ;;  %6743 = vmatmul.mubr.msk.f32.gmra.mrb[2].mxu1 %vm383_vm1, %v7898_v24  ;;  %6771 = vmatprep.subr.mxu1 %v7789_v15 }
 0x10f   : > { %v7909_v28 = vadd.f32 %v370_v16, %v351_v27 }
 0x111   : > { %v6730_v29 = vpop.f32.mrb[6].mxu0  ;;  %6745 = vmatprep.mubr.msk.f32.mxu1 %vm383_vm1, %v7909_v28 }
 0x112   : > { %v7913_v30 = vadd.f32 %v6730_v29, %v370_v16  ;;  %v361_v31 = vpop.f32.mrb[7].mxu0  ;;  %6746 = vmatmul.mubr.msk.f32.gmra.mrb[4].mxu1 %vm383_vm1, %v7904_v26 }
 0x113   : > { %v7917_v32 = vadd.f32 %v370_v16, %v361_v31 }
 0x115   : > { %6748 = vmatprep.mubr.msk.f32.mxu1 %vm383_vm1, %v7917_v32 }
 0x116   : > { %6749 = vmatmul.mubr.msk.f32.gmra.mrb[6].mxu1 %vm383_vm1, %v7913_v30 }
 0x117   : > { %6763 = vmatprep.mubr.msk.f32.mxu1 %vm7790_vm2, %v7789_v15 }
 0x1dd   : > { %v7927_v33 = vpop.f32.mrb[0].mxu1 }
 0x1de   : > { %1261 = vrot.lane.b32.xlu1 %v7927_v33, %s7791_s14  ;;  %v7931_v34 = vpop.f32.mrb[1].mxu1 }
 0x1df   : > { %1185 = vrot.lane.b32.xlu0 %v7931_v34, %s7791_s14  ;;  %6754 = vmatmul.mubr.msk.f32.vlgmr.msra.gmra.mrb[8].mxu0 %vm383_vm1, %v7931_v34 }
 0x1e0   : > { %6757 = vmatpush3.xpose.msk.msra.mxu0 %vm383_vm1, %v7887_v20  ;;  %6758 = vmatprep.mubr.msk.f32.mxu0 %vm7790_vm2, %v7789_v15 }
 0x1e1   : > { %v7941_v35 = vpop.f32.mrb[2].mxu1  ;;  %6766 = vmatprep.subr.mxu0 %v7789_v15 }
 0x1e2   : > { %1413 = vrot.lane.b32.xlu1 %v7941_v35, %s7791_s14  ;;  %v7946_v36 = vpop.f32.mrb[3].mxu1 }
 0x1e3   : > { %6759 = vmatmul.mubr.msk.f32.vlgmr.msra.gmra.mrb[10].mxu0 %vm383_vm1, %v7927_v33  ;;  %6764 = vmatmul.mubr.msk.f32.vlgmr.msra.gmra.mrb[8].mxu1 %vm383_vm1, %v7946_v36 }
 0x1e4   : > { %6767 = vmatpush3.xpose.msk.msra.mxu0 %vm383_vm1, %v7898_v24  ;;  %6772 = vmatpush3.xpose.msk.msra.mxu1 %vm383_vm1, %v7909_v28 }
 0x1e5   : > { %v7956_v37 = vpop.f32.mrb[4].mxu1  ;;  %6768 = vmatprep.mubr.msk.f32.mxu0 %vm7790_vm2, %v7789_v15  ;;  %6776 = vmatprep.subr.mxu0 %v7789_v15 }
 0x1e6   : > { %1337 = vrot.lane.b32.xlu1 %v7946_v36, %s7791_s14  ;;  %v7963_v38 = vpop.f32.mrb[5].mxu1  ;;  %6773 = vmatprep.mubr.msk.f32.mxu1 %vm7790_vm2, %v7789_v15 }
 0x1e7   : > { %6781 = vmatprep.subr.mxu1 %v7789_v15  ;;  %6769 = vmatmul.mubr.msk.f32.vlgmr.msra.gmra.mrb[12].mxu0 %vm383_vm1, %v7941_v35 }
 0x1e8   : > { %6774 = vmatmul.mubr.msk.f32.vlgmr.msra.gmra.mrb[10].mxu1 %vm383_vm1, %v7963_v38  ;;  %6777 = vmatpush3.xpose.msk.msra.mxu0 %vm383_vm1, %v7904_v26 }
 0x1e9   : > { %6782 = vmatpush3.xpose.msk.msra.mxu1 %vm383_vm1, %v7917_v32  ;;  %v7976_v39 = vpop.f32.mrb[6].mxu1  ;;  %6778 = vmatprep.mubr.msk.f32.mxu0 %vm7790_vm2, %v7789_v15 }
 0x1ea   : > { %v7980_v40 = vpop.f32.mrb[7].mxu1  ;;  %6783 = vmatprep.mubr.msk.f32.mxu1 %vm7790_vm2, %v7789_v15  ;;  %6786 = vmatprep.subr.mxu0 %v7789_v15 }
 0x1eb   : > { %6779 = vmatmul.mubr.msk.f32.vlgmr.msra.gmra.mrb[14].mxu0 %vm383_vm1, %v7956_v37  ;;  %6791 = vmatprep.subr.mxu1 %v7789_v15 }
 0x1ec   : > { %6784 = vmatmul.mubr.msk.f32.vlgmr.msra.gmra.mrb[12].mxu1 %vm383_vm1, %v7980_v40  ;;  %6787 = vmatpush3.xpose.msk.msra.mxu0 %vm383_vm1, %v7913_v30 }
 0x1ed   : > { %6788 = vmatprep.mubr.msk.f32.mxu0 %vm7790_vm2, %v7789_v15  ;;  %6796 = vmatprep.subr.mxu0 %v7789_v15 }
 0x1ee   : > { %6793 = vmatprep.mubr.msk.f32.mxu1 %vm7790_vm2, %v7789_v15 }
 0x1ef   : > { %6789 = vmatmul.mubr.msk.f32.vlgmr.msra.gmra.mrb[16].mxu0 %vm383_vm1, %v7976_v39 }
 0x1f0   : > { %6798 = vmatprep.mubr.msk.f32.mxu0 %vm7790_vm2, %v7789_v15 }
 0x250   : > { %v1262_v41 = vpop.permute.xlu1 %1261 }
 0x251   : > { %v1186_v42 = vpop.permute.xlu0 %1185  ;;  %6797 = vmatpush3.msra.mxu0 %v1262_v41 }
 0x252   : > { %6792 = vmatpush3.msra.mxu1 %v1186_v42  ;;  %6806 = vmatprep.subr.mxu0 %v7789_v15 }
 0x253   : > { %6801 = vmatprep.subr.mxu1 %v7789_v15 }
 0x254   : > { %v8018_v3 = vpop.permute.xlu1 %1413 }
 0x258   : > { %v8020_v4 = vpop.permute.xlu1 %1337 }
 0x2b2   : > { %v582_v43 = vpop.f32.mrb[8].mxu0 }
 0x2b3   : > { %v6755_v44 = vpop.f32.mrb[9].mxu0  ;;  %v1097_v45 = vsel %vm240_vm0, %v582_v43, -inf }
 0x2b4   : > { %1098 = vmax.xlane.f32.xlu0 %v1097_v45 }
 0x2b6   : > { %v655_v46 = vpop.f32.mrb[10].mxu0  ;;  %v728_v47 = vpop.f32.mrb[8].mxu1 }
 0x2b7   : > { %v6760_v48 = vpop.f32.mrb[11].mxu0  ;;  %v6765_v49 = vpop.f32.mrb[9].mxu1  ;;  %v1100_v50 = vsel %vm240_vm0, %v655_v46, -inf  ;;  %v1103_v51 = vsel %vm240_vm0, %v728_v47, -inf }
 0x2b8   : > { %1101 = vmax.xlane.f32.xlu0 %v1100_v50  ;;  %1104 = vmax.xlane.f32.xlu1 %v1103_v51 }
 0x2ba   : > { %v801_v52 = vpop.f32.mrb[12].mxu0 }
 0x2bb   : > { %v874_v53 = vpop.f32.mrb[10].mxu1  ;;  %v6770_v54 = vpop.f32.mrb[13].mxu0  ;;  %v1106_v55 = vsel %vm240_vm0, %v801_v52, -inf }
 0x2bc   : > { %1107 = vmax.xlane.f32.xlu1 %v1106_v55  ;;  %v1109_v56 = vsel %vm240_vm0, %v874_v53, -inf  ;;  %v6775_v57 = vpop.f32.mrb[11].mxu1 }
 0x2bd   : > { %1110 = vmax.xlane.f32.xlu0 %v1109_v56 }
 0x2be   : > { %v947_v58 = vpop.f32.mrb[14].mxu0 }
 0x2bf   : > { %v1020_v59 = vpop.f32.mrb[12].mxu1  ;;  %v1112_v60 = vsel %vm240_vm0, %v947_v58, -inf  ;;  %v6780_v61 = vpop.f32.mrb[15].mxu0 }
 0x2c0   : > { %1113 = vmax.xlane.f32.xlu1 %v1112_v60  ;;  %v1115_v62 = vsel %vm240_vm0, %v1020_v59, -inf  ;;  %v6785_v63 = vpop.f32.mrb[13].mxu1 }
 0x2c1   : > { %1116 = vmax.xlane.f32.xlu0 %v1115_v62 }
 0x2c2   : > { %v8010_v0 = vpop.f32.mrb[16].mxu0 }
 0x2c3   : > { %v6790_v1 = vpop.f32.mrb[17].mxu0  ;;  %v1118_v2 = vsel %vm240_vm0, %v8010_v0, -inf }
 0x2d1   : > { %1565 = vrot.lane.b32.xlu1 %v7956_v37, %s7791_s14 }
 0x2d7   : > { %1489 = vrot.lane.b32.xlu0 %v7963_v38, %s7791_s14 }
 0x2f5   : > { %1119 = vmax.xlane.f32.xlu1 %v1118_v2 }
 0x341   : > { %v1099_v5 = vpop.xlane.xlu0 %1098 }
 0x342   : > { %v1121_v6 = vsub.f32 %v582_v43, %v1099_v5 }
 0x344   : > { %v1129_v7 = vmul.f32 1.442695, %v1121_v6 }
 0x345   : > { %v1102_v8 = vpop.xlane.xlu0 %1101  ;;  %v1105_v9 = vpop.xlane.xlu1 %1104 }
 0x346   : > { %7534 = vpow2.f32 %v1129_v7  ;;  %v1122_v10 = vsub.f32 %v655_v46, %v1102_v8  ;;  %v1123_v11 = vsub.f32 %v728_v47, %v1105_v9 }
 0x348   : > { %v1131_v12 = vmul.f32 1.442695, %v1122_v10  ;;  %v1133_v13 = vmul.f32 1.442695, %v1123_v11 }
 0x349   : > { %v1108_v14 = vpop.xlane.xlu1 %1107 }
 0x34a   : > { %7536 = vpow2.f32 %v1131_v12  ;;  %v1124_v16 = vsub.f32 %v801_v52, %v1108_v14  ;;  %v1111_v17 = vpop.xlane.xlu0 %1110 }
 0x34b   : > { %7538 = vpow2.f32 %v1133_v13  ;;  %v1125_v18 = vsub.f32 %v874_v53, %v1111_v17 }
 0x34c   : > { %v1135_v21 = vmul.f32 1.442695, %v1124_v16 }
 0x34d   : > { %v1137_v22 = vmul.f32 1.442695, %v1125_v18  ;;  %v1114_v47 = vpop.xlane.xlu1 %1113 }
 0x34e   : > { %7540 = vpow2.f32 %v1135_v21  ;;  %v1117_v48 = vpop.xlane.xlu0 %1116  ;;  %v1126_v49 = vsub.f32 %v947_v58, %v1114_v47 }
 0x34f   : > { %7542 = vpow2.f32 %v1137_v22  ;;  %v1127_v50 = vsub.f32 %v1020_v59, %v1117_v48 }
 0x350   : > { %v7535_v25 = vpop.eup %7534  ;;  %v1139_v51 = vmul.f32 1.442695, %v1126_v49 }
 0x351   : > { %v1145_v27 = vsel %vm240_vm0, %v7535_v25, 0.0  ;;  %v1141_v52 = vmul.f32 1.442695, %v1127_v50  ;;  %v1566_v57 = vpop.permute.xlu1 %1565 }
 0x352   : > { %1146 = vadd.xlane.f32.xlu0 %v1145_v27  ;;  %7544 = vpow2.f32 %v1139_v51  ;;  %v1490_v63 = vpop.permute.xlu0 %1489 }
 0x353   : > { %7546 = vpow2.f32 %v1141_v52 }
 0x354   : > { %v8023_v29 = vpop.eup %7536 }
 0x355   : > { %v8025_v31 = vpop.eup %7538  ;;  %v1148_v41 = vsel %vm240_vm0, %v8023_v29, 0.0 }
 0x356   : > { %1149 = vadd.xlane.f32.xlu1 %v1148_v41  ;;  %v1151_v42 = vsel %vm240_vm0, %v8025_v31, 0.0 }
 0x357   : > { %1152 = vadd.xlane.f32.xlu0 %v1151_v42 }
 0x358   : > { %v8031_v43 = vpop.eup %7540 }
 0x359   : > { %v8033_v44 = vpop.eup %7542  ;;  %v1154_v45 = vsel %vm240_vm0, %v8031_v43, 0.0 }
 0x35a   : > { %1155 = vadd.xlane.f32.xlu1 %v1154_v45  ;;  %v1157_v46 = vsel %vm240_vm0, %v8033_v44, 0.0 }
 0x35b   : > { %1158 = vadd.xlane.f32.xlu0 %v1157_v46 }
 0x35c   : > { %v8043_v53 = vpop.eup %7544 }
 0x35d   : > { %v8045_v54 = vpop.eup %7546  ;;  %v1160_v55 = vsel %vm240_vm0, %v8043_v53, 0.0 }
 0x35e   : > { %v1163_v56 = vsel %vm240_vm0, %v8045_v54, 0.0 }
 0x36b   : > { %1717 = vrot.lane.b32.xlu1 %v7976_v39, %s7791_s14 }
 0x371   : > { %1641 = vrot.lane.b32.xlu0 %v7980_v40, %s7791_s14 }
 0x382   : > { %v1120_v58 = vpop.xlane.xlu1 %1119 }
 0x383   : > { %v1128_v59 = vsub.f32 %v8010_v0, %v1120_v58 }
 0x385   : > { %v1143_v60 = vmul.f32 1.442695, %v1128_v59 }
 0x387   : > { %7548 = vpow2.f32 %v1143_v60 }
 0x38f   : > { %1161 = vadd.xlane.f32.xlu1 %v1160_v55 }
 0x390   : > { %1164 = vadd.xlane.f32.xlu0 %v1163_v56 }
 0x391   : > { %v8057_v61 = vpop.eup %7548 }
 0x392   : > { %v1166_v62 = vsel %vm240_vm0, %v8057_v61, 0.0 }
 0x3a0   : > { %1867 = vrot.lane.b32.xlu1 %v7927_v33, %s7792_s17 }
 0x3a6   : > { %1793 = vrot.lane.b32.xlu0 %v7931_v34, %s7792_s17 }
 0x3aa   : > { %1941 = vrot.lane.b32.xlu0 %v7946_v36, %s7792_s17 }
 0x3ae   : > { %2089 = vrot.lane.b32.xlu0 %v7963_v38, %s7792_s17 }
 0x3b2   : > { %2237 = vrot.lane.b32.xlu0 %v7980_v40, %s7792_s17 }
 0x3c4   : > { %1167 = vadd.xlane.f32.xlu1 %v1166_v62 }
 0x3d5   : > { %2015 = vrot.lane.b32.xlu1 %v7941_v35, %s7792_s17 }
 0x3d9   : > { %2163 = vrot.lane.b32.xlu1 %v7956_v37, %s7792_s17 }
 0x3dd   : > { %2311 = vrot.lane.b32.xlu1 %v7976_v39, %s7792_s17 }
 0x3df   : > { %v1147_v0 = vpop.xlane.xlu0 %1146 }
 0x3e0   : > { %7550 = vrcp.f32 %v1147_v0 }
 0x3e3   : > { %v1150_v1 = vpop.xlane.xlu1 %1149 }
 0x3e4   : > { %7552 = vrcp.f32 %v1150_v1  ;;  %v1153_v2 = vpop.xlane.xlu0 %1152 }
 0x3e5   : > { %7554 = vrcp.f32 %v1153_v2 }
 0x3e7   : > { %v1156_v5 = vpop.xlane.xlu1 %1155 }
 0x3e8   : > { %7556 = vrcp.f32 %v1156_v5  ;;  %v1159_v6 = vpop.xlane.xlu0 %1158 }
 0x3e9   : > { %7558 = vrcp.f32 %v1159_v6 }
 0x3ea   : > { %v7551_v7 = vpop.eup %7550 }
 0x3eb   : > { %v1170_v8 = vmul.f32 %v7551_v7, %v7535_v25 }
 0x3ec   : > { %v1642_v17 = vpop.permute.xlu0 %1641 }
 0x3ed   : > { %6794 = vmatmul.mubr.msk.f32.vlgmr.msra.gmra.mrb[14].mxu1 %vm240_vm0, %v1170_v8 }
 0x3ee   : > { %v7553_v9 = vpop.eup %7552  ;;  %6802 = vmatpush3.msra.mxu1 %v8020_v4  ;;  %6803 = vmatprep.mubr.msk.f32.mxu1 %vm7790_vm2, %v7789_v15 }
 0x3ef   : > { %v7555_v10 = vpop.eup %7554  ;;  %6811 = vmatprep.subr.mxu1 %v7789_v15  ;;  %v1172_v11 = vmul.f32 %v7553_v9, %v8023_v29 }
 0x3f0   : > { %v1174_v12 = vmul.f32 %v7555_v10, %v8025_v31 }
 0x3f1   : > { %6799 = vmatmul.mubr.msk.f32.vlgmr.msra.gmra.mrb[18].mxu0 %vm240_vm0, %v1172_v11 }
 0x3f2   : > { %v7557_v13 = vpop.eup %7556  ;;  %6804 = vmatmul.mubr.msk.f32.vlgmr.msra.gmra.mrb[16].mxu1 %vm240_vm0, %v1174_v12  ;;  %6807 = vmatpush3.msra.mxu0 %v8018_v3  ;;  %v1718_v3 = vpop.permute.xlu1 %1717 }
 0x3f3   : > { %v7559_v14 = vpop.eup %7558  ;;  %6812 = vmatpush3.msra.mxu1 %v1490_v63  ;;  %6808 = vmatprep.mubr.msk.f32.mxu0 %vm7790_vm2, %v7789_v15  ;;  %v1176_v4 = vmul.f32 %v7557_v13, %v8031_v43 }
 0x3f4   : > { %6813 = vmatprep.mubr.msk.f32.mxu1 %vm7790_vm2, %v7789_v15  ;;  %6816 = vmatprep.subr.mxu0 %v7789_v15  ;;  %v1178_v16 = vmul.f32 %v7559_v14, %v8033_v44 }
 0x3f5   : > { %6821 = vmatprep.subr.mxu1 %v7789_v15  ;;  %6809 = vmatmul.mubr.msk.f32.vlgmr.msra.gmra.mrb[20].mxu0 %vm240_vm0, %v1176_v4 }
 0x3f6   : > { %6814 = vmatmul.mubr.msk.f32.vlgmr.msra.gmra.mrb[18].mxu1 %vm240_vm0, %v1178_v16  ;;  %6817 = vmatpush3.msra.mxu0 %v1566_v57 }
 0x3f7   : > { %6822 = vmatpush3.msra.mxu1 %v1642_v17  ;;  %6818 = vmatprep.mubr.msk.f32.mxu0 %vm7790_vm2, %v7789_v15 }
 0x3f8   : > { %6823 = vmatprep.mubr.msk.f32.mxu1 %vm7790_vm2, %v7789_v15  ;;  %6826 = vmatprep.subr.mxu0 %v7789_v15 }
 0x3f9   : > { %6831 = vmatprep.subr.mxu1 %v7789_v15 }
 0x41c   : > { %v1162_v18 = vpop.xlane.xlu1 %1161 }
 0x41d   : > { %7560 = vrcp.f32 %v1162_v18  ;;  %v1165_v21 = vpop.xlane.xlu0 %1164 }
 0x41e   : > { %7562 = vrcp.f32 %v1165_v21 }
 0x420   : > { %v1868_v44 = vpop.permute.xlu1 %1867 }
 0x421   : > { %v1794_v27 = vpop.permute.xlu0 %1793 }
 0x425   : > { %v1942_v41 = vpop.permute.xlu0 %1941 }
 0x427   : > { %v7561_v22 = vpop.eup %7560 }
 0x428   : > { %v7563_v25 = vpop.eup %7562  ;;  %v1180_v29 = vmul.f32 %v7561_v22, %v8043_v53 }
 0x429   : > { %v1182_v31 = vmul.f32 %v7563_v25, %v8045_v54  ;;  %v2090_v42 = vpop.permute.xlu0 %2089 }
 0x42a   : > { %6819 = vmatmul.mubr.msk.f32.vlgmr.msra.gmra.mrb[22].mxu0 %vm240_vm0, %v1180_v29 }
 0x42b   : > { %6824 = vmatmul.mubr.msk.f32.vlgmr.msra.gmra.mrb[20].mxu1 %vm240_vm0, %v1182_v31  ;;  %6827 = vmatpush3.msra.mxu0 %v1718_v3 }
 0x42c   : > { %6832 = vmatpush3.xpose.msk.msra.mxu1 %vm383_vm1, %v7885_v19  ;;  %6833 = vmatprep.mubr.msk.f32.mxu1 %vm7790_vm2, %v7789_v15 }
 0x42d   : > { %6841 = vmatprep.subr.mxu1 %v7789_v15  ;;  %6828 = vmatprep.mubr.msk.f32.mxu0 %vm7790_vm2, %v7789_v15  ;;  %v2238_v43 = vpop.permute.xlu0 %2237 }
 0x42e   : > { %6836 = vmatprep.subr.mxu0 %v7789_v15 }
 0x42f   : > { %6834 = vmatmul.mubr.msk.f32.vlgmr.msra.gmra.mrb[22].mxu1 %vm383_vm1, %v1794_v27 }
 0x430   : > { %6842 = vmatpush3.xpose.msk.msra.mxu1 %vm383_vm1, %v7896_v23  ;;  %6843 = vmatprep.mubr.msk.f32.mxu1 %vm7790_vm2, %v7789_v15 }
 0x431   : > { %6851 = vmatprep.subr.mxu1 %v7789_v15 }
 0x433   : > { %6844 = vmatmul.mubr.msk.f32.vlgmr.msra.gmra.mrb[24].mxu1 %vm383_vm1, %v1942_v41 }
 0x434   : > { %6852 = vmatpush3.xpose.msk.msra.mxu1 %vm383_vm1, %v7909_v28  ;;  %6853 = vmatprep.mubr.msk.f32.mxu1 %vm7790_vm2, %v7789_v15 }
 0x435   : > { %6861 = vmatprep.subr.mxu1 %v7789_v15 }
 0x437   : > { %6854 = vmatmul.mubr.msk.f32.vlgmr.msra.gmra.mrb[26].mxu1 %vm383_vm1, %v2090_v42 }
 0x438   : > { %6862 = vmatpush3.xpose.msk.msra.mxu1 %vm383_vm1, %v7917_v32  ;;  %6863 = vmatprep.mubr.msk.f32.mxu1 %vm7790_vm2, %v7789_v15 }
 0x439   : > { %6871 = vmatprep.subr.mxu1 %v7789_v15 }
 0x43b   : > { %6864 = vmatmul.mubr.msk.f32.vlgmr.msra.gmra.mrb[28].mxu1 %vm383_vm1, %v2238_v43 }
 0x43c   : > { %6873 = vmatprep.mubr.msk.f32.mxu1 %vm7790_vm2, %v7789_v15 }
 0x451   : > { %v1168_v45 = vpop.xlane.xlu1 %1167 }
 0x452   : > { %7564 = vrcp.f32 %v1168_v45 }
 0x455   : > { %v2016_v48 = vpop.permute.xlu1 %2015 }
 0x459   : > { %v2164_v49 = vpop.permute.xlu1 %2163 }
 0x45c   : > { %v7565_v46 = vpop.eup %7564 }
 0x45d   : > { %v1184_v47 = vmul.f32 %v7565_v46, %v8057_v61  ;;  %v2312_v50 = vpop.permute.xlu1 %2311 }
 0x45f   : > { %6829 = vmatmul.mubr.msk.f32.vlgmr.msra.gmra.mrb[24].mxu0 %vm240_vm0, %v1184_v47 }
 0x460   : > { %6837 = vmatpush3.xpose.msk.msra.mxu0 %vm383_vm1, %v7887_v20  ;;  %6838 = vmatprep.mubr.msk.f32.mxu0 %vm7790_vm2, %v7789_v15 }
 0x461   : > { %6846 = vmatprep.subr.mxu0 %v7789_v15 }
 0x463   : > { %6839 = vmatmul.mubr.msk.f32.vlgmr.msra.gmra.mrb[26].mxu0 %vm383_vm1, %v1868_v44 }
 0x464   : > { %6847 = vmatpush3.xpose.msk.msra.mxu0 %vm383_vm1, %v7898_v24  ;;  %6848 = vmatprep.mubr.msk.f32.mxu0 %vm7790_vm2, %v7789_v15 }
 0x465   : > { %6856 = vmatprep.subr.mxu0 %v7789_v15 }
 0x467   : > { %6849 = vmatmul.mubr.msk.f32.vlgmr.msra.gmra.mrb[28].mxu0 %vm383_vm1, %v2016_v48 }
 0x468   : > { %6857 = vmatpush3.xpose.msk.msra.mxu0 %vm383_vm1, %v7904_v26  ;;  %6858 = vmatprep.mubr.msk.f32.mxu0 %vm7790_vm2, %v7789_v15 }
 0x469   : > { %6866 = vmatprep.subr.mxu0 %v7789_v15 }
 0x46b   : > { %6859 = vmatmul.mubr.msk.f32.vlgmr.msra.gmra.mrb[30].mxu0 %vm383_vm1, %v2164_v49 }
 0x46c   : > { %6867 = vmatpush3.xpose.msk.msra.mxu0 %vm383_vm1, %v7913_v30  ;;  %6868 = vmatprep.mubr.msk.f32.mxu0 %vm7790_vm2, %v7789_v15 }
 0x46d   : > { %6876 = vmatprep.subr.mxu0 %v7789_v15 }
 0x46f   : > { %6869 = vmatmul.mubr.msk.f32.vlgmr.msra.gmra.mrb[32].mxu0 %vm383_vm1, %v2312_v50 }
 0x470   : > { %6878 = vmatprep.mubr.msk.f32.mxu0 %vm7790_vm2, %v7789_v15 }
 0x4c0   : > { %v8151_v51 = vpop.f32.mrb[14].mxu1 }
 0x4c1   : > { %v6795_v52 = vpop.f32.mrb[15].mxu1 }
 0x4c4   : > { %v8153_v53 = vpop.f32.mrb[18].mxu0 }
 0x4c5   : > { %v8155_v54 = vpop.f32.mrb[16].mxu1  ;;  %v6800_v55 = vpop.f32.mrb[19].mxu0 }
 0x4c6   : > { %v6805_v56 = vpop.f32.mrb[17].mxu1 }
 0x4c8   : > { %v8157_v57 = vpop.f32.mrb[20].mxu0 }
 0x4c9   : > { %v8159_v58 = vpop.f32.mrb[18].mxu1  ;;  %v6810_v59 = vpop.f32.mrb[21].mxu0 }
 0x4ca   : > { %v6815_v60 = vpop.f32.mrb[19].mxu1 }
 0x4fd   : > { %v8161_v61 = vpop.f32.mrb[22].mxu0 }
 0x4fe   : > { %v8163_v62 = vpop.f32.mrb[20].mxu1  ;;  %v6820_v63 = vpop.f32.mrb[23].mxu0 }
 0x4ff   : > { %v6825_v0 = vpop.f32.mrb[21].mxu1 }
 0x502   : > { %v1863_v1 = vpop.f32.mrb[22].mxu1 }
 0x503   : > { %v6835_v2 = vpop.f32.mrb[23].mxu1  ;;  %v2385_v5 = vsel %vm240_vm0, %v1863_v1, -inf }
 0x504   : > { %2386 = vmax.xlane.f32.xlu0 %v2385_v5 }
 0x506   : > { %v2011_v6 = vpop.f32.mrb[24].mxu1 }
 0x507   : > { %v6845_v7 = vpop.f32.mrb[25].mxu1  ;;  %v2391_v8 = vsel %vm240_vm0, %v2011_v6, -inf }
 0x508   : > { %2392 = vmax.xlane.f32.xlu0 %v2391_v8 }
 0x50a   : > { %v2159_v9 = vpop.f32.mrb[26].mxu1 }
 0x50b   : > { %v6855_v10 = vpop.f32.mrb[27].mxu1  ;;  %v2397_v29 = vsel %vm240_vm0, %v2159_v9, -inf }
 0x50e   : > { %v8167_v11 = vpop.f32.mrb[28].mxu1 }
 0x50f   : > { %v6865_v12 = vpop.f32.mrb[29].mxu1  ;;  %v2403_v43 = vsel %vm240_vm0, %v8167_v11, -inf }
 0x532   : > { %v8169_v13 = vpop.f32.mrb[24].mxu0 }
 0x533   : > { %v6830_v14 = vpop.f32.mrb[25].mxu0 }
 0x536   : > { %v1937_v4 = vpop.f32.mrb[26].mxu0 }
 0x537   : > { %v6840_v16 = vpop.f32.mrb[27].mxu0  ;;  %v2388_v17 = vsel %vm240_vm0, %v1937_v4, -inf }
 0x538   : > { %2389 = vmax.xlane.f32.xlu1 %v2388_v17 }
 0x53a   : > { %v2085_v3 = vpop.f32.mrb[28].mxu0 }
 0x53b   : > { %v6850_v18 = vpop.f32.mrb[29].mxu0  ;;  %v2394_v21 = vsel %vm240_vm0, %v2085_v3, -inf }
 0x53c   : > { %2395 = vmax.xlane.f32.xlu0 %v2394_v21 }
 0x53e   : > { %v2233_v22 = vpop.f32.mrb[30].mxu0 }
 0x53f   : > { %v6860_v25 = vpop.f32.mrb[31].mxu0  ;;  %v2400_v27 = vsel %vm240_vm0, %v2233_v22, -inf }
 0x540   : > { %2401 = vmax.xlane.f32.xlu1 %v2400_v27  ;;  %2398 = vmax.xlane.f32.xlu0 %v2397_v29 }
 0x542   : > { %v2381_v31 = vpop.f32.mrb[32].mxu0 }
 0x543   : > { %v6870_v41 = vpop.f32.mrb[33].mxu0  ;;  %v2406_v42 = vsel %vm240_vm0, %v2381_v31, -inf }
 0x544   : > { %2407 = vmax.xlane.f32.xlu1 %v2406_v42  ;;  %2404 = vmax.xlane.f32.xlu0 %v2403_v43 }
 0x555   : > { %2549 = vrot.lane.b32.xlu1 %v7927_v33, %s7793_s18 }
 0x559   : > { %2625 = vrot.lane.b32.xlu1 %v7946_v36, %s7793_s18 }
 0x55a   : > { %2473 = vrot.lane.b32.xlu0 %v7931_v34, %s7793_s18 }
 0x55d   : > { %2701 = vrot.lane.b32.xlu1 %v7941_v35, %s7793_s18 }
 0x55e   : > { %2777 = vrot.lane.b32.xlu0 %v7963_v38, %s7793_s18 }
 0x561   : > { %2853 = vrot.lane.b32.xlu1 %v7956_v37, %s7793_s18 }
 0x591   : > { %v2387_v44 = vpop.xlane.xlu0 %2386 }
 0x592   : > { %v2409_v45 = vsub.f32 %v1863_v1, %v2387_v44 }
 0x594   : > { %v2417_v46 = vmul.f32 1.442695, %v2409_v45 }
 0x595   : > { %v2393_v47 = vpop.xlane.xlu0 %2392 }
 0x596   : > { %7566 = vpow2.f32 %v2417_v46  ;;  %v2411_v33 = vsub.f32 %v2011_v6, %v2393_v47 }
 0x598   : > { %v2421_v48 = vmul.f32 1.442695, %v2411_v33 }
 0x59a   : > { %7568 = vpow2.f32 %v2421_v48 }
 0x5a0   : > { %v7567_v36 = vpop.eup %7566 }
 0x5a1   : > { %v2433_v34 = vsel %vm240_vm0, %v7567_v36, 0.0 }
 0x5a2   : > { %2434 = vadd.xlane.f32.xlu0 %v2433_v34 }
 0x5a4   : > { %v8191_v49 = vpop.eup %7568 }
 0x5a5   : > { %v2439_v35 = vsel %vm240_vm0, %v8191_v49, 0.0 }
 0x5a6   : > { %2440 = vadd.xlane.f32.xlu0 %v2439_v35 }
 0x5c5   : > { %v2390_v38 = vpop.xlane.xlu1 %2389 }
 0x5c6   : > { %v2410_v37 = vsub.f32 %v1937_v4, %v2390_v38 }
 0x5c8   : > { %v2419_v50 = vmul.f32 1.442695, %v2410_v37 }
 0x5c9   : > { %v2396_v52 = vpop.xlane.xlu0 %2395 }
 0x5ca   : > { %7570 = vpow2.f32 %v2419_v50  ;;  %v2412_v55 = vsub.f32 %v2085_v3, %v2396_v52 }
 0x5cc   : > { %v2423_v56 = vmul.f32 1.442695, %v2412_v55 }
 0x5cd   : > { %v2402_v59 = vpop.xlane.xlu1 %2401  ;;  %v2399_v60 = vpop.xlane.xlu0 %2398 }
 0x5ce   : > { %7572 = vpow2.f32 %v2423_v56  ;;  %v2414_v63 = vsub.f32 %v2233_v22, %v2402_v59  ;;  %v2413_v0 = vsub.f32 %v2159_v9, %v2399_v60 }
 0x5d0   : > { %v2427_v1 = vmul.f32 1.442695, %v2414_v63  ;;  %v2425_v2 = vmul.f32 1.442695, %v2413_v0 }
 0x5d1   : > { %v2408_v5 = vpop.xlane.xlu1 %2407  ;;  %v2405_v6 = vpop.xlane.xlu0 %2404 }
 0x5d2   : > { %7574 = vpow2.f32 %v2427_v1  ;;  %v2416_v7 = vsub.f32 %v2381_v31, %v2408_v5  ;;  %v2415_v8 = vsub.f32 %v8167_v11, %v2405_v6 }
 0x5d3   : > { %7576 = vpow2.f32 %v2425_v2 }
 0x5d4   : > { %v7571_v10 = vpop.eup %7570  ;;  %v2431_v12 = vmul.f32 1.442695, %v2416_v7  ;;  %v2429_v14 = vmul.f32 1.442695, %v2415_v8  ;;  %v3121_v8 = vld [vmem:[#allocation2 + $0x28] sm:$0xff] }
 0x5d5   : > { %v2550_v4 = vpop.permute.xlu1 %2549  ;;  %v2474_v16 = vpop.permute.xlu0 %2473  ;;  %v2436_v17 = vsel %vm240_vm0, %v7571_v10, 0.0 }
 0x5d6   : > { %7578 = vpow2.f32 %v2431_v12  ;;  %2437 = vadd.xlane.f32.xlu1 %v2436_v17  ;;  %6872 = vmatpush3.msra.mxu1 %v2474_v16  ;;  %v3123_v12 = vld [vmem:[#allocation2 + $0x38] sm:$0xff]  ;;  %v3125_v17 = vld [vmem:[#allocation2 + $0x48] sm:$0xff] }
 0x5d7   : > { %7580 = vpow2.f32 %v2429_v14  ;;  %6877 = vmatpush3.msra.mxu0 %v2550_v4  ;;  %6881 = vmatprep.subr.mxu1 %v7789_v15  ;;  %v3124_v4 = vld [vmem:[#allocation2 + $0x40] sm:$0xff] }
 0x5d8   : > { %v7573_v9 = vpop.eup %7572  ;;  %6886 = vmatprep.subr.mxu0 %v7789_v15  ;;  %v7288_v16 = vpack.c.bf16 %v3124_v4, %v3123_v12 }
 0x5d9   : > { %v2442_v11 = vsel %vm240_vm0, %v7573_v9, 0.0  ;;  %v2778_v41 = vpop.permute.xlu0 %2777  ;;  %v2626_v46 = vpop.permute.xlu1 %2625 }
 0x5da   : > { %2443 = vadd.xlane.f32.xlu1 %v2442_v11 }
 0x5dc   : > { %v7575_v3 = vpop.eup %7574 }
 0x5dd   : > { %v7577_v18 = vpop.eup %7576  ;;  %v2448_v21 = vsel %vm240_vm0, %v7575_v3, 0.0 }
 0x5de   : > { %2449 = vadd.xlane.f32.xlu1 %v2448_v21  ;;  %v2445_v22 = vsel %vm240_vm0, %v7577_v18, 0.0 }
 0x5df   : > { %2446 = vadd.xlane.f32.xlu0 %v2445_v22 }
 0x5e0   : > { %v8202_v25 = vpop.eup %7578 }
 0x5e1   : > { %v8204_v27 = vpop.eup %7580  ;;  %v2454_v29 = vsel %vm240_vm0, %v8202_v25, 0.0 }
 0x5e2   : > { %2455 = vadd.xlane.f32.xlu1 %v2454_v29  ;;  %v2451_v31 = vsel %vm240_vm0, %v8204_v27, 0.0 }
 0x5e3   : > { %2452 = vadd.xlane.f32.xlu0 %v2451_v31 }
 0x5f3   : > { %3005 = vrot.lane.b32.xlu1 %v7976_v39, %s7793_s18 }
 0x5f9   : > { %2929 = vrot.lane.b32.xlu0 %v7980_v40, %s7793_s18  ;;  %v2702_v40 = vpop.permute.xlu1 %2701 }
 0x5fd   : > { %v2854_v33 = vpop.permute.xlu1 %2853 }
 0x62f   : > { %v2435_v42 = vpop.xlane.xlu0 %2434 }
 0x630   : > { %7582 = vrcp.f32 %v2435_v42 }
 0x633   : > { %v2441_v43 = vpop.xlane.xlu0 %2440 }
 0x634   : > { %7584 = vrcp.f32 %v2441_v43 }
 0x63a   : > { %v7583_v44 = vpop.eup %7582 }
 0x63b   : > { %v2458_v45 = vmul.f32 %v7583_v44, %v7567_v36 }
 0x63d   : > { %6874 = vmatmul.mubr.msk.f32.vlgmr.msra.gmra.mrb[30].mxu1 %vm240_vm0, %v2458_v45 }
 0x63e   : > { %v7585_v47 = vpop.eup %7584  ;;  %6882 = vmatpush3.msra.mxu1 %v2626_v46  ;;  %6883 = vmatprep.mubr.msk.f32.mxu1 %vm7790_vm2, %v7789_v15 }
 0x63f   : > { %v2462_v39 = vmul.f32 %v7585_v47, %v8191_v49  ;;  %6891 = vmatprep.subr.mxu1 %v7789_v15 }
 0x641   : > { %6884 = vmatmul.mubr.msk.f32.vlgmr.msra.gmra.mrb[32].mxu1 %vm240_vm0, %v2462_v39 }
 0x642   : > { %6892 = vmatpush3.msra.mxu1 %v2778_v41  ;;  %6893 = vmatprep.mubr.msk.f32.mxu1 %vm7790_vm2, %v7789_v15 }
 0x643   : > { %6901 = vmatprep.subr.mxu1 %v7789_v15 }
 0x663   : > { %v2438_v48 = vpop.xlane.xlu1 %2437 }
 0x664   : > { %7586 = vrcp.f32 %v2438_v48 }
 0x667   : > { %v2444_v36 = vpop.xlane.xlu1 %2443 }
 0x668   : > { %7588 = vrcp.f32 %v2444_v36 }
 0x66b   : > { %v2450_v34 = vpop.xlane.xlu1 %2449 }
 0x66c   : > { %7590 = vrcp.f32 %v2450_v34  ;;  %v2447_v35 = vpop.xlane.xlu0 %2446 }
 0x66d   : > { %7592 = vrcp.f32 %v2447_v35 }
 0x66e   : > { %v7587_v49 = vpop.eup %7586 }
 0x66f   : > { %v2460_v38 = vmul.f32 %v7587_v49, %v7571_v10  ;;  %v2456_v37 = vpop.xlane.xlu1 %2455  ;;  %v3122_v10 = vld [vmem:[#allocation2 + $0x30] sm:$0xff] }
 0x670   : > { %7594 = vrcp.f32 %v2456_v37  ;;  %v2453_v50 = vpop.xlane.xlu0 %2452  ;;  %v7284_v14 = vpack.c.bf16 %v3122_v10, %v3121_v8 }
 0x671   : > { %7596 = vrcp.f32 %v2453_v50  ;;  %6879 = vmatmul.mubr.msk.f32.vlgmr.msra.gmra.mrb[34].mxu0 %vm240_vm0, %v2460_v38 }
 0x672   : > { %v7589_v52 = vpop.eup %7588  ;;  %6887 = vmatpush3.msra.mxu0 %v2702_v40  ;;  %6888 = vmatprep.mubr.msk.f32.mxu0 %vm7790_vm2, %v7789_v15 }
 0x673   : > { %v2464_v55 = vmul.f32 %v7589_v52, %v7573_v9  ;;  %6896 = vmatprep.subr.mxu0 %v7789_v15  ;;  %v3006_v0 = vpop.permute.xlu1 %3005  ;;  %v3126_v9 = vld [vmem:[#allocation2 + $0x50] sm:$0xff] }
 0x674   : > { %v2930_v2 = vpop.permute.xlu0 %2929  ;;  %v7292_v11 = vpack.c.bf16 %v3126_v9, %v3125_v17 }
 0x675   : > { %6889 = vmatmul.mubr.msk.f32.vlgmr.msra.gmra.mrb[36].mxu0 %vm240_vm0, %v2464_v55 }
 0x676   : > { %v7591_v56 = vpop.eup %7590  ;;  %6897 = vmatpush3.msra.mxu0 %v2854_v33  ;;  %6898 = vmatprep.mubr.msk.f32.mxu0 %vm7790_vm2, %v7789_v15 }
 0x677   : > { %v7593_v59 = vpop.eup %7592  ;;  %v2468_v60 = vmul.f32 %v7591_v56, %v7575_v3  ;;  %6906 = vmatprep.subr.mxu0 %v7789_v15  ;;  %v3127_v3 = vld [vmem:[#allocation2 + $0x58] sm:$0xff] }
 0x678   : > { %v2466_v63 = vmul.f32 %v7593_v59, %v7577_v18  ;;  %v3128_v18 = vld [vmem:[#allocation2 + $0x60] sm:$0xff] }
 0x679   : > { %6899 = vmatmul.mubr.msk.f32.vlgmr.msra.gmra.mrb[38].mxu0 %vm240_vm0, %v2468_v60 }
 0x67a   : > { %v7595_v1 = vpop.eup %7594  ;;  %6894 = vmatmul.mubr.msk.f32.vlgmr.msra.gmra.mrb[34].mxu1 %vm240_vm0, %v2466_v63  ;;  %6907 = vmatpush3.msra.mxu0 %v3006_v0 }
 0x67b   : > { %v7597_v5 = vpop.eup %7596  ;;  %v2472_v6 = vmul.f32 %v7595_v1, %v8202_v25  ;;  %6902 = vmatpush3.msra.mxu1 %v2930_v2  ;;  %6903 = vmatprep.mubr.msk.f32.mxu1 %vm7790_vm2, %v7789_v15  ;;  %v7296_v25 = vpack.c.bf16 %v3128_v18, %v3127_v3 }
 0x67c   : > { %v2470_v7 = vmul.f32 %v7597_v5, %v8204_v27  ;;  %6908 = vmatprep.mubr.msk.f32.mxu0 %vm7790_vm2, %v7789_v15  ;;  %7285 = vmatprep.subr.bf16.mxu1 %v7284_v14 }
 0x67d   : > { %6909 = vmatmul.mubr.msk.f32.vlgmr.msra.gmra.mrb[40].mxu0 %vm240_vm0, %v2472_v6 }
 0x67e   : > { %6904 = vmatmul.mubr.msk.f32.vlgmr.msra.gmra.mrb[36].mxu1 %vm240_vm0, %v2470_v7 }
 0x67f   : > { %7287 = vmatpush3.bf16.msra.mxu1 %v7284_v14 }
 0x680   : > { %7289 = vmatprep.subr.bf16.mxu1 %v7288_v16 }
 0x683   : > { %7291 = vmatpush3.bf16.msra.mxu1 %v7288_v16 }
 0x684   : > { %7293 = vmatprep.subr.bf16.mxu1 %v7292_v11 }
 0x687   : > { %7295 = vmatpush3.bf16.msra.mxu1 %v7292_v11 }
 0x688   : > { %7297 = vmatprep.subr.bf16.mxu1 %v7296_v25 }
 0x68b   : > { %7299 = vmatpush3.bf16.msra.mxu1 %v7296_v25 }
 0x710   : > { %v2545_v21 = vpop.f32.mrb[30].mxu1 }
 0x711   : > { %3089 = vrot.lane.b32.xlu0 %v2545_v21, %s7793_s18  ;;  %v6875_v22 = vpop.f32.mrb[31].mxu1 }
 0x714   : > { %v2697_v27 = vpop.f32.mrb[32].mxu1 }
 0x715   : > { %3093 = vrot.lane.b32.xlu0 %v2697_v27, %s7793_s18  ;;  %v6885_v29 = vpop.f32.mrb[33].mxu1 }
 0x744   : > { %v2621_v31 = vpop.f32.mrb[34].mxu0 }
 0x745   : > { %v6880_v41 = vpop.f32.mrb[35].mxu0  ;;  %3091 = vrot.lane.b32.xlu1 %v2621_v31, %s7793_s18 }
 0x748   : > { %v2773_v42 = vpop.f32.mrb[36].mxu0 }
 0x749   : > { %3095 = vrot.lane.b32.xlu1 %v2773_v42, %s7793_s18  ;;  %v6890_v43 = vpop.f32.mrb[37].mxu0 }
 0x74c   : > { %v2925_v44 = vpop.f32.mrb[38].mxu0 }
 0x74d   : > { %v2849_v45 = vpop.f32.mrb[34].mxu1  ;;  %3099 = vrot.lane.b32.xlu1 %v2925_v44, %s7793_s18  ;;  %v6900_v46 = vpop.f32.mrb[39].mxu0 }
 0x74e   : > { %3097 = vrot.lane.b32.xlu0 %v2849_v45, %s7793_s18  ;;  %v6895_v47 = vpop.f32.mrb[35].mxu1 }
 0x750   : > { %v3077_v39 = vpop.f32.mrb[40].mxu0 }
 0x751   : > { %v3001_v40 = vpop.f32.mrb[36].mxu1  ;;  %3103 = vrot.lane.b32.xlu1 %v3077_v39, %s7793_s18  ;;  %v6910_v33 = vpop.f32.mrb[41].mxu0 }
 0x752   : > { %3101 = vrot.lane.b32.xlu0 %v3001_v40, %s7793_s18  ;;  %v6905_v48 = vpop.f32.mrb[37].mxu1 }
 0x783   : > { %v3090_v36 = vpop.permute.xlu0 %3089 }
 0x784   : > { %v3113_v34 = vsel %vm383_vm1, %v8151_v51, %v3090_v36 }
 0x785   : > { %6927 = vmatprep.mubr.msk.f32.mxu1 %vm3129_vm3, %v3113_v34 }
 0x787   : > { %v3094_v35 = vpop.permute.xlu0 %3093 }
 0x788   : > { %v3115_v37 = vsel %vm383_vm1, %v8155_v54, %v3094_v35 }
 0x7b7   : > { %v3092_v49 = vpop.permute.xlu1 %3091 }
 0x7b8   : > { %v3114_v38 = vsel %vm383_vm1, %v8153_v53, %v3092_v49 }
 0x7b9   : > { %6928 = vmatmul.mubr.msk.f32.vlgmr.msra.gmra.mrb[38].mxu1 %vm3129_vm3, %v3114_v38 }
 0x7ba   : > { %6930 = vmatprep.mubr.msk.f32.mxu1 %vm3129_vm3, %v3115_v37 }
 0x7bb   : > { %v3096_v50 = vpop.permute.xlu1 %3095 }
 0x7bc   : > { %v3116_v52 = vsel %vm383_vm1, %v8157_v57, %v3096_v50 }
 0x7bd   : > { %6931 = vmatmul.mubr.msk.f32.gmra.mrb[40].mxu1 %vm3129_vm3, %v3116_v52 }
 0x7bf   : > { %v3100_v51 = vpop.permute.xlu1 %3099 }
 0x7c0   : > { %v3118_v55 = vsel %vm383_vm1, %v8161_v61, %v3100_v51  ;;  %v3098_v56 = vpop.permute.xlu0 %3097 }
 0x7c1   : > { %v3117_v53 = vsel %vm383_vm1, %v8159_v58, %v3098_v56 }
 0x7c2   : > { %6933 = vmatprep.mubr.msk.f32.mxu1 %vm3129_vm3, %v3117_v53 }
 0x7c3   : > { %6934 = vmatmul.mubr.msk.f32.gmra.mrb[42].mxu1 %vm3129_vm3, %v3118_v55  ;;  %v3104_v54 = vpop.permute.xlu1 %3103 }
 0x7c4   : > { %v3120_v59 = vsel %vm383_vm1, %v8169_v13, %v3104_v54  ;;  %v3102_v60 = vpop.permute.xlu0 %3101 }
 0x7c5   : > { %v3119_v57 = vsel %vm383_vm1, %v8163_v62, %v3102_v60 }
 0x7c6   : > { %6936 = vmatprep.mubr.msk.f32.mxu1 %vm3129_vm3, %v3119_v57 }
 0x7c7   : > { %6937 = vmatmul.mubr.msk.f32.gmra.mrb[44].mxu1 %vm3129_vm3, %v3120_v59 }
 0x7c8   : > { %7000 = vmatprep.mubr.msk.f32.mxu1 %vm7790_vm2, %v7789_v15 }
 0x88c   : > { %v6929_v58 = vpop.f32.mrb[38].mxu1 }
 0x88d   : > { %v3260_v61 = vadd.f32 %v6929_v58, %v7887_v20  ;;  %v3220_v63 = vpop.f32.mrb[39].mxu1 }
 0x88e   : > { %v3259_v0 = vadd.f32 %v3220_v63, %v7885_v19  ;;  %v3527_v63 = vld [vmem:[#allocation2 + $0x70] sm:$0xff] }
 0x88f   : > { %v3270_v1 = vsel %vm383_vm1, %v3260_v61, 0.0 }
 0x890   : > { %3271 = vadd.xlane.f32.xlu1 %v3270_v1  ;;  %v6932_v13 = vpop.f32.mrb[40].mxu1  ;;  %v3267_v2 = vsel %vm383_vm1, %v3259_v0, 0.0 }
 0x891   : > { %v3262_v62 = vadd.f32 %v6932_v13, %v7898_v24  ;;  %3268 = vadd.xlane.f32.xlu0 %v3267_v2  ;;  %v3230_v5 = vpop.f32.mrb[41].mxu1  ;;  %v3529_v13 = vld [vmem:[#allocation2 + $0x80] sm:$0xff] }
 0x892   : > { %v3261_v7 = vadd.f32 %v3230_v5, %v7896_v23  ;;  %v3676_v5 = vld [vmem:[#allocation2 + $0xc8] sm:$0xff] }
 0x893   : > { %v3276_v6 = vsel %vm383_vm1, %v3262_v62, 0.0 }
 0x894   : > { %v3273_v12 = vsel %vm383_vm1, %v3261_v7, 0.0 }
 0x895   : > { %3277 = vadd.xlane.f32.xlu0 %v3276_v6  ;;  %v3677_v6 = vld [vmem:[#allocation2 + $0xd0] sm:$0xff] }
 0x896   : > { %v6935_v8 = vpop.f32.mrb[42].mxu1 }
 0x897   : > { %v3264_v20 = vadd.f32 %v6935_v8, %v7904_v26  ;;  %v3240_v10 = vpop.f32.mrb[43].mxu1  ;;  %v3678_v8 = vld [vmem:[#allocation2 + $0xd8] sm:$0xff] }
 0x898   : > { %v3263_v19 = vadd.f32 %v3240_v10, %v7909_v28 }
 0x899   : > { %3274 = vadd.xlane.f32.xlu0 %v3273_v12  ;;  %v3282_v14 = vsel %vm383_vm1, %v3264_v20, 0.0 }
 0x89a   : > { %3283 = vadd.xlane.f32.xlu1 %v3282_v14  ;;  %v6938_v24 = vpop.f32.mrb[44].mxu1  ;;  %v3279_v23 = vsel %vm383_vm1, %v3263_v19, 0.0 }
 0x89b   : > { %v3266_v4 = vadd.f32 %v6938_v24, %v7913_v30  ;;  %v3250_v16 = vpop.f32.mrb[45].mxu1 }
 0x89c   : > { %v3265_v17 = vadd.f32 %v3250_v16, %v7917_v32 }
 0x89d   : > { %3280 = vadd.xlane.f32.xlu0 %v3279_v23  ;;  %v3288_v26 = vsel %vm383_vm1, %v3266_v4, 0.0 }
 0x89e   : > { %3289 = vadd.xlane.f32.xlu1 %v3288_v26  ;;  %v3285_v28 = vsel %vm383_vm1, %v3265_v17, 0.0 }
 0x8a1   : > { %3286 = vadd.xlane.f32.xlu0 %v3285_v28 }
 0x91d   : > { %v3272_v9 = vpop.xlane.xlu1 %3271 }
 0x91e   : > { %v3293_v11 = vmul.f32 0.03125, %v3272_v9  ;;  %v3269_v3 = vpop.xlane.xlu0 %3268 }
 0x91f   : > { %v3292_v18 = vmul.f32 0.03125, %v3269_v3 }
 0x920   : > { %v8291_v21 = vsub.f32 %v3260_v61, %v3293_v11  ;;  %v3526_v61 = vld [vmem:[#allocation2 + $0x68] sm:$0xff] }
 0x921   : > { %v8293_v22 = vsub.f32 %v3259_v0, %v3292_v18  ;;  %v3528_v0 = vld [vmem:[#allocation2 + $0x78] sm:$0xff]  ;;  %v7300_v1 = vpack.c.bf16 %v3527_v63, %v3526_v61 }
 0x922   : > { %v3278_v30 = vpop.xlane.xlu0 %3277  ;;  %v3309_v32 = vmul.f32 %v8291_v21, %v8291_v21  ;;  %v7304_v2 = vpack.c.bf16 %v3529_v13, %v3528_v0 }
 0x923   : > { %v3295_v25 = vmul.f32 0.03125, %v3278_v30  ;;  %v3308_v27 = vmul.f32 %v8293_v22, %v8293_v22  ;;  %7301 = vmatprep.subr.bf16.mxu0 %v7300_v1 }
 0x924   : > { %v3319_v29 = vsel %vm383_vm1, %v3309_v32, 0.0  ;;  %7303 = vmatpush3.bf16.msra.mxu0 %v7300_v1 }
 0x925   : > { %v8300_v31 = vsub.f32 %v3262_v62, %v3295_v25  ;;  %3320 = vadd.xlane.f32.xlu1 %v3319_v29  ;;  %v3316_v41 = vsel %vm383_vm1, %v3308_v27, 0.0  ;;  %7305 = vmatprep.subr.bf16.mxu0 %v7304_v2  ;;  %v7794_v62 = vmov 0.0|0.0  }
 0x926   : > { %v3275_v42 = vpop.xlane.xlu0 %3274  ;;  %3317 = vadd.xlane.f32.xlu0 %v3316_v41  ;;  %7326 = vmatprep.subr.bf16.mxu1 %v7794_v62 }
 0x927   : > { %v3294_v43 = vmul.f32 0.03125, %v3275_v42  ;;  %v3284_v44 = vpop.xlane.xlu1 %3283  ;;  %v3311_v45 = vmul.f32 %v8300_v31, %v8300_v31 }
 0x928   : > { %v3297_v46 = vmul.f32 0.03125, %v3284_v44  ;;  %7307 = vmatpush3.bf16.msra.mxu0 %v7304_v2 }
 0x929   : > { %v8305_v47 = vsub.f32 %v3261_v7, %v3294_v43  ;;  %v3325_v39 = vsel %vm383_vm1, %v3311_v45, 0.0  ;;  %7308 = vmatprep.subr.bf16.mxu0 %v7794_v62  ;;  %v8333_v7 = vpack.c.bf16 %v3677_v6, %v3676_v5 }
 0x92a   : > { %v8308_v40 = vsub.f32 %v3264_v20, %v3297_v46  ;;  %v3281_v33 = vpop.xlane.xlu0 %3280  ;;  %3326 = vadd.xlane.f32.xlu1 %v3325_v39  ;;  %v3679_v20 = vld [vmem:[#allocation2 + $0xe0] sm:$0xff] }
 0x92b   : > { %v3296_v48 = vmul.f32 0.03125, %v3281_v33  ;;  %v3290_v36 = vpop.xlane.xlu1 %3289  ;;  %v3310_v34 = vmul.f32 %v8305_v47, %v8305_v47  ;;  %7328 = vmatpush3.bf16.msra.mxu1 %v8333_v7  ;;  %v8337_v10 = vpack.c.bf16 %v3679_v20, %v3678_v8  ;;  %v7796_v8 = vmov 1934713408  }
 0x92c   : > { %v3299_v35 = vmul.f32 0.03125, %v3290_v36  ;;  %v3313_v49 = vmul.f32 %v8308_v40, %v8308_v40  ;;  %7329 = vmatprep.subr.bf16.mxu1 %v7794_v62  ;;  %v3457_v20 = vunpack.c.l.s4 %v7796_v8 }
 0x92d   : > { %v8314_v38 = vsub.f32 %v3263_v19, %v3296_v48  ;;  %v3322_v37 = vsel %vm383_vm1, %v3310_v34, 0.0 }
 0x92e   : > { %v8317_v50 = vsub.f32 %v3266_v4, %v3299_v35  ;;  %v3331_v52 = vsel %vm383_vm1, %v3313_v49, 0.0  ;;  %3323 = vadd.xlane.f32.xlu0 %v3322_v37  ;;  %v3287_v51 = vpop.xlane.xlu0 %3286  ;;  %v3372_v35 = vld [vmem:[%s8732_s3 + $0x8] sm:$0xff] }
 0x92f   : > { %3332 = vadd.xlane.f32.xlu1 %v3331_v52  ;;  %v3298_v55 = vmul.f32 0.03125, %v3287_v51  ;;  %v3312_v56 = vmul.f32 %v8314_v38, %v8314_v38  ;;  %7331 = vmatpush3.bf16.msra.mxu1 %v8337_v10  ;;  %v7795_v51 = vmov 1983009808  }
 0x930   : > { %v3315_v53 = vmul.f32 %v8317_v50, %v8317_v50  ;;  %7338 = vmatprep.subr.bf16.mxu1 %v7794_v62 }
 0x931   : > { %v8324_v54 = vsub.f32 %v3265_v17, %v3298_v55  ;;  %v3328_v59 = vsel %vm383_vm1, %v3312_v56, 0.0  ;;  %v3393_v55 = vunpack.c.l.s4 %v7795_v51  ;;  %v3395_v56 = vlaneseq }
 0x932   : > { %v3337_v60 = vsel %vm383_vm1, %v3315_v53, 0.0  ;;  %3329 = vadd.xlane.f32.xlu0 %v3328_v59 }
 0x933   : > { %3338 = vadd.xlane.f32.xlu1 %v3337_v60  ;;  %v3314_v57 = vmul.f32 %v8324_v54, %v8324_v54  ;;  %v3394_v0 = vunpack.c.0.s8 %v3393_v55  ;;  %v3396_v5 = vshrl.u32 %v3395_v56, 7 }
 0x935   : > { %v3334_v58 = vsel %vm383_vm1, %v3314_v57, 0.0 }
 0x936   : > { %3335 = vadd.xlane.f32.xlu0 %v3334_v58 }
 0x9b2   : > { %v3321_v19 = vpop.xlane.xlu1 %3320 }
 0x9b3   : > { %v3318_v12 = vpop.xlane.xlu0 %3317  ;;  %v3341_v24 = vmul.f32 0.03125, %v3321_v19 }
 0x9b4   : > { %v3340_v14 = vmul.f32 0.03125, %v3318_v12 }
 0x9b5   : > { %v3349_v23 = vadd.f32 1e-05, %v3341_v24 }
 0x9b6   : > { %v3348_v4 = vadd.f32 1e-05, %v3340_v14 }
 0x9b7   : > { %v3327_v16 = vpop.xlane.xlu1 %3326 }
 0x9b8   : > { %v3343_v17 = vmul.f32 0.03125, %v3327_v16  ;;  %7598 = vrsqrt.f32 %v3348_v4 }
 0x9ba   : > { %v3351_v26 = vadd.f32 1e-05, %v3343_v17 }
 0x9bb   : > { %v3324_v28 = vpop.xlane.xlu0 %3323 }
 0x9bc   : > { %7600 = vrsqrt.f32 %v3351_v26  ;;  %v3333_v9 = vpop.xlane.xlu1 %3332  ;;  %v3342_v11 = vmul.f32 0.03125, %v3324_v28 }
 0x9bd   : > { %v3345_v3 = vmul.f32 0.03125, %v3333_v9  ;;  %7602 = vrsqrt.f32 %v3349_v23 }
 0x9be   : > { %v3350_v18 = vadd.f32 1e-05, %v3342_v11 }
 0x9bf   : > { %v3353_v30 = vadd.f32 1e-05, %v3345_v3  ;;  %v3330_v32 = vpop.xlane.xlu0 %3329 }
 0x9c0   : > { %7604 = vrsqrt.f32 %v3350_v18  ;;  %v3339_v25 = vpop.xlane.xlu1 %3338  ;;  %v3344_v27 = vmul.f32 0.03125, %v3330_v32 }
 0x9c1   : > { %7606 = vrsqrt.f32 %v3353_v30  ;;  %v3347_v29 = vmul.f32 0.03125, %v3339_v25 }
 0x9c2   : > { %v3352_v41 = vadd.f32 1e-05, %v3344_v27  ;;  %v7599_v45 = vpop.eup %7598 }
 0x9c3   : > { %v3355_v42 = vadd.f32 1e-05, %v3347_v29  ;;  %v3336_v43 = vpop.xlane.xlu0 %3335  ;;  %v3364_v48 = vmul.f32 %v7599_v45, %v8293_v22 }
 0x9c4   : > { %7608 = vrsqrt.f32 %v3352_v41  ;;  %v3346_v44 = vmul.f32 0.03125, %v3336_v43 }
 0x9c5   : > { %7610 = vrsqrt.f32 %v3355_v42  ;;  %v3373_v53 = vmul.f32 %v3372_v35, %v3364_v48 }
 0x9c6   : > { %v7601_v46 = vpop.eup %7600  ;;  %v3354_v39 = vadd.f32 1e-05, %v3346_v44 }
 0x9c7   : > { %v7603_v33 = vpop.eup %7602  ;;  %v3367_v36 = vmul.f32 %v7601_v46, %v8300_v31  ;;  %v3381_v31 = vld [vmem:[%s8732_s3 + $0x10] sm:$0xff] }
 0x9c8   : > { %7612 = vrsqrt.f32 %v3354_v39  ;;  %v3365_v37 = vmul.f32 %v7603_v33, %v8291_v21  ;;  %v3382_v1 = vadd.f32 %v3381_v31, %v3373_v53 }
 0x9c9   : > { %v3376_v59 = vmul.f32 %v3372_v35, %v3367_v36 }
 0x9ca   : > { %v7605_v34 = vpop.eup %7604  ;;  %v3374_v61 = vmul.f32 %v3372_v35, %v3365_v37 }
 0x9cb   : > { %v7607_v49 = vpop.eup %7606  ;;  %v3366_v52 = vmul.f32 %v7605_v34, %v8305_v47  ;;  %v3385_v13 = vadd.f32 %v3381_v31, %v3376_v59 }
 0x9cc   : > { %v3369_v60 = vmul.f32 %v7607_v49, %v8308_v40  ;;  %v3383_v19 = vadd.f32 %v3381_v31, %v3374_v61 }
 0x9cd   : > { %v3375_v22 = vmul.f32 %v3372_v35, %v3366_v52 }
 0x9ce   : > { %v7609_v57 = vpop.eup %7608  ;;  %v3378_v2 = vmul.f32 %v3372_v35, %v3369_v60  ;;  %v3406_v23 = vcombine.low %v3383_v19, %v3385_v13  ;;  %v3407_v29 = vcombine.high %v3383_v19, %v3385_v13 }
 0x9cf   : > { %v7611_v58 = vpop.eup %7610  ;;  %v3384_v63 = vadd.f32 %v3381_v31, %v3375_v22  ;;  %v3368_v21 = vmul.f32 %v7609_v57, %v8314_v38  ;;  %v3397_v38 = vsub.s32 %v3394_v0, %v3396_v5  ;;  %v3668_v0 = vld [vmem:[#allocation2 + $0x88] sm:$0xff] }
 0x9d0   : > { %v3371_v47 = vmul.f32 %v7611_v58, %v8317_v50  ;;  %v3387_v16 = vadd.f32 %v3381_v31, %v3378_v2  ;;  %v3458_v50 = vunpack.c.0.s8 %v3457_v20  ;;  %v3670_v2 = vld [vmem:[#allocation2 + $0x98] sm:$0xff] }
 0x9d1   : > { %v3377_v12 = vmul.f32 %v3372_v35, %v3368_v21  ;;  %v3390_v24 = vcombine.low %v3382_v1, %v3384_v63  ;;  %v3391_v3 = vcombine.high %v3382_v1, %v3384_v63  ;;  %v3414_v18 = vrot.slane %v3406_v23, %v3397_v38  ;;  %v3669_v1 = vld [vmem:[#allocation2 + $0x90] sm:$0xff] }
 0x9d2   : > { %v7613_v6 = vpop.eup %7612  ;;  %v3380_v40 = vmul.f32 %v3372_v35, %v3371_v47  ;;  %v3461_v27 = vsub.s32 %v3458_v50, %v3396_v5  ;;  %v3421_v48 = vrot.slane %v3407_v29, %v3397_v38  ;;  %v8369_v13 = vpack.c.bf16 %v3669_v1, %v3668_v0  ;;  %v3671_v5 = vld [vmem:[#allocation2 + $0xa0] sm:$0xff] }
 0x9d3   : > { %v3370_v14 = vmul.f32 %v7613_v6, %v8324_v54  ;;  %v3386_v26 = vadd.f32 %v3381_v31, %v3377_v12  ;;  %v3398_v9 = vrot.slane %v3390_v24, %v3397_v38  ;;  %v3405_v44 = vrot.slane %v3391_v3, %v3397_v38 }
 0x9d4   : > { %v3389_v4 = vadd.f32 %v3381_v31, %v3380_v40  ;;  %v8373_v6 = vpack.c.bf16 %v3671_v5, %v3670_v2  ;;  %v3659_v40 = vld [vmem:[%s8732_s3 + $0x18] sm:$0xff] }
 0x9d5   : > { %v3379_v17 = vmul.f32 %v3372_v35, %v3370_v14  ;;  %v3454_v42 = vcombine.low %v3398_v9, %v3414_v18  ;;  %v3455_v46 = vcombine.high %v3398_v9, %v3414_v18  ;;  %v3470_v55 = vcombine.low %v3405_v44, %v3421_v48 }
 0x9d6   : > { %v3438_v11 = vcombine.low %v3387_v16, %v3389_v4  ;;  %v3439_v25 = vcombine.high %v3387_v16, %v3389_v4  ;;  %v3471_v22 = vcombine.high %v3405_v44, %v3421_v48 }
 0x9d7   : > { %v3388_v28 = vadd.f32 %v3381_v31, %v3379_v17  ;;  %v3462_v36 = vrot.slane %v3454_v42, %v3461_v27  ;;  %v3469_v51 = vrot.slane %v3455_v46, %v3461_v27  ;;  %v3478_v60 = vrot.slane %v3470_v55, %v3461_v27  ;;  %v3672_v46 = vld [vmem:[#allocation2 + $0xa8] sm:$0xff] }
 0x9d8   : > { %v3446_v54 = vrot.slane %v3438_v11, %v3397_v38  ;;  %v3453_v33 = vrot.slane %v3439_v25, %v3397_v38  ;;  %v3485_v61 = vrot.slane %v3471_v22, %v3461_v27 }
 0x9d9   : > { %v3422_v30 = vcombine.low %v3386_v26, %v3388_v28  ;;  %v3423_v32 = vcombine.high %v3386_v26, %v3388_v28 }
 0x9db   : > { %v3430_v41 = vrot.slane %v3422_v30, %v3397_v38  ;;  %v3437_v43 = vrot.slane %v3423_v32, %v3397_v38 }
 0x9dd   : > { %v3486_v45 = vcombine.low %v3430_v41, %v3446_v54  ;;  %v3487_v39 = vcombine.high %v3430_v41, %v3446_v54  ;;  %v3502_v49 = vcombine.low %v3437_v43, %v3453_v33  ;;  %v3503_v59 = vcombine.high %v3437_v43, %v3453_v33  ;;  %v3674_v33 = vld [vmem:[#allocation2 + $0xb8] sm:$0xff] }
 0x9df   : > { %v3494_v34 = vrot.slane %v3486_v45, %v3461_v27  ;;  %v3501_v35 = vrot.slane %v3487_v39, %v3461_v27  ;;  %v3510_v53 = vrot.slane %v3502_v49, %v3461_v27  ;;  %v3517_v58 = vrot.slane %v3503_v59, %v3461_v27  ;;  %v3673_v39 = vld [vmem:[#allocation2 + $0xb0] sm:$0xff] }
 0x9e0   : > { %v8405_v48 = vpack.c.bf16 %v3673_v39, %v3672_v46 }
 0x9e1   : > { %v3518_v37 = vcombine.low %v3462_v36, %v3494_v34  ;;  %v3519_v52 = vcombine.high %v3462_v36, %v3494_v34  ;;  %v3520_v56 = vcombine.low %v3469_v51, %v3501_v35  ;;  %v3521_v57 = vcombine.high %v3469_v51, %v3501_v35  ;;  %v3675_v36 = vld [vmem:[#allocation2 + $0xc0] sm:$0xff] }
 0x9e2   : > { %v3522_v31 = vcombine.low %v3478_v60, %v3510_v53  ;;  %v3523_v63 = vcombine.high %v3478_v60, %v3510_v53  ;;  %v3524_v21 = vcombine.low %v3485_v61, %v3517_v58  ;;  %v3525_v47 = vcombine.high %v3485_v61, %v3517_v58  ;;  %v8432_v51 = vld [vmem:[%s8732_s3 + $0x20] sm:$0xff] }
 0x9e3   : > { %6947 = vmatprep.mubr.msk.f32.mxu0 %vm383_vm1, %v3518_v37  ;;  %v8408_v34 = vpack.c.bf16 %v3675_v36, %v3674_v33 }
 0x9e4   : > { %6948 = vmatmul.mubr.msk.f32.vlgmr.msra.gmra.mrb[42].mxu0 %vm383_vm1, %v3519_v52 }
 0x9e5   : > { %7310 = vmatpush3.bf16.msra.mxu0 %v8333_v7  ;;  %6950 = vmatprep.mubr.msk.f32.mxu0 %vm383_vm1, %v3520_v56 }
 0x9e6   : > { %7311 = vmatprep.subr.bf16.mxu0 %v7794_v62 }
 0x9e8   : > { %6951 = vmatmul.mubr.msk.f32.gmra.mrb[44].mxu0 %vm383_vm1, %v3521_v57 }
 0x9e9   : > { %6953 = vmatprep.mubr.msk.f32.mxu0 %vm383_vm1, %v3522_v31  ;;  %7313 = vmatpush3.bf16.msra.mxu0 %v8337_v10 }
 0x9ea   : > { %7314 = vmatprep.subr.bf16.mxu0 %v7794_v62 }
 0x9ec   : > { %6954 = vmatmul.mubr.msk.f32.gmra.mrb[46].mxu0 %vm383_vm1, %v3523_v63 }
 0x9ed   : > { %6956 = vmatprep.mubr.msk.f32.mxu0 %vm383_vm1, %v3524_v21 }
 0x9f0   : > { %6957 = vmatmul.mubr.msk.f32.gmra.mrb[48].mxu0 %vm383_vm1, %v3525_v47 }
 0x9f1   : > { %6967 = vmatprep.mubr.msk.f32.mxu0 %vm7790_vm2, %v7789_v15 }
 0x9f4   : > { %6968 = vmatmul.mubr.f32.vlgmr.msra.gmra.mrb[50].mxu0 %v7789_v15 }
 0x9f5   : > { %7316 = vmatpush3.bf16.msra.mxu0 %v8369_v13  ;;  %6978 = vmatprep.mubr.msk.f32.mxu0 %vm7790_vm2, %v7789_v15 }
 0x9f6   : > { %7317 = vmatprep.subr.bf16.mxu0 %v7794_v62 }
 0x9f9   : > { %7319 = vmatpush3.bf16.msra.mxu0 %v8373_v6 }
 0x9fa   : > { %7320 = vmatprep.subr.bf16.mxu0 %v7794_v62 }
 0x9fc   : > { %6979 = vmatmul.mubr.f32.vlgmr.msra.gmra.mrb[52].mxu0 %v7789_v15 }
 0x9fd   : > { %6989 = vmatprep.mubr.msk.f32.mxu0 %vm7790_vm2, %v7789_v15  ;;  %7322 = vmatpush3.bf16.msra.mxu0 %v8405_v48 }
 0x9fe   : > { %7323 = vmatprep.subr.bf16.mxu0 %v7794_v62 }
 0xa01   : > { %7325 = vmatpush3.bf16.msra.mxu0 %v8408_v34 }
 0xa02   : > { %7332 = vmatprep.subr.bf16.mxu0 %v7794_v62 }
 0xab7   : > { %v6949_v8 = vpop.f32.mrb[42].mxu0 }
 0xab8   : > { %v8386_v20 = vadd.f32 %v6949_v8, %v3659_v40  ;;  %v3620_v19 = vpop.f32.mrb[43].mxu0 }
 0xab9   : > { %v3660_v11 = vadd.f32 %v3659_v40, %v3620_v19 }
 0xabb   : > { %v6952_v12 = vpop.f32.mrb[44].mxu0 }
 0xabc   : > { %v8388_v14 = vadd.f32 %v6952_v12, %v3659_v40  ;;  %v3630_v24 = vpop.f32.mrb[45].mxu0 }
 0xabd   : > { %v8390_v4 = vadd.f32 %v3659_v40, %v3630_v24 }
 0xabf   : > { %v6955_v16 = vpop.f32.mrb[46].mxu0 }
 0xac0   : > { %v8392_v17 = vadd.f32 %v6955_v16, %v3659_v40  ;;  %v3640_v38 = vpop.f32.mrb[47].mxu0 }
 0xac1   : > { %v8394_v23 = vadd.f32 %v3659_v40, %v3640_v38 }
 0xac3   : > { %v6958_v50 = vpop.f32.mrb[48].mxu0 }
 0xac4   : > { %v8396_v26 = vadd.f32 %v6958_v50, %v3659_v40  ;;  %v3650_v28 = vpop.f32.mrb[49].mxu0 }
 0xac5   : > { %v8398_v9 = vadd.f32 %v3659_v40, %v3650_v28 }
 0xacf   : > { %v3820_v3 = vpop.f32.mrb[52].mxu0 }
 0xad0   : > { %v3824_v18 = vadd.f32 %v3820_v3, %v3660_v11  ;;  %v6980_v30 = vpop.f32.mrb[53].mxu0 }
 0xad2   : > { %7614 = vtanh.f32 %v3824_v18  ;;  %v6411_v25 = vmul.f32 -1.442695, %v3824_v18 }
 0xad4   : > { %7616 = vpow2.f32 %v6411_v25 }
 0xadc   : > { %v7615_v32 = vpop.eup %7614 }
 0xadd   : > { %3834 = vrot.lane.b32.xlu0 %v7615_v32, %s7791_s14 }
 0xade   : > { %v7617_v27 = vpop.eup %7616 }
 0xadf   : > { %v3828_v29 = vadd.f32 1.0, %v7617_v27 }
 0xae1   : > { %7618 = vrcp.f32 %v3828_v29 }
 0xaeb   : > { %v7619_v41 = vpop.eup %7618 }
 0xaec   : > { %v3832_v43 = vmul.f32 0.0, %v7619_v41 }
 0xb4f   : > { %v3835_v54 = vpop.permute.xlu0 %3834 }
 0xb50   : > { %v3837_v42 = vmul.f32 %v7619_v41, %v3835_v54 }
 0xb52   : > { %3839 = vrot.lane.b32.xlu1 %v3837_v42, %s7793_s18 }
 0xbc4   : > { %v3840_v44 = vpop.permute.xlu1 %3839 }
 0xbc5   : > { %v8402_v45 = vadd.f32 %v3840_v44, %v3832_v43 }
 0xbc7   : > { %7620 = vtanh.f32 %v8402_v45 }
 0xbd1   : > { %v7621_v35 = vpop.eup %7620 }
 0xbd2   : > { %3845 = vrot.lane.b32.xlu1 %v7621_v35, %s7791_s14 }
 0xc44   : > { %v3846_v49 = vpop.permute.xlu1 %3845 }
 0xc45   : > { %v3848_v37 = vmul.f32 %v7619_v41, %v3846_v49 }
 0xc47   : > { %3850 = vrot.lane.b32.xlu1 %v3848_v37, %s7793_s18 }
 0xcb9   : > { %v3851_v52 = vpop.permute.xlu1 %3850 }
 0xcba   : > { %6990 = vmatmul.mubr.msk.f32.vlgmr.msra.gmra.mrb[50].mxu0 %vm383_vm1, %v3851_v52 }
 0xcbb   : > { %7334 = vmatpush3.bf16.msra.mxu0 %v8369_v13  ;;  %7011 = vmatprep.mubr.msk.f32.mxu0 %vm7790_vm2, %v7789_v15 }
 0xcbc   : > { %7335 = vmatprep.subr.bf16.mxu0 %v7794_v62 }
 0xcbf   : > { %7337 = vmatpush3.bf16.msra.mxu0 %v8373_v6 }
 0xcc0   : > { %7344 = vmatprep.subr.bf16.mxu0 %v7794_v62 }
 0xcc2   : > { %7012 = vmatmul.mubr.msk.f32.vlgmr.msra.gmra.mrb[54].mxu0 %vm383_vm1, %v3851_v52 }
 0xcc3   : > { %7346 = vmatpush3.bf16.msra.mxu0 %v8333_v7  ;;  %7033 = vmatprep.mubr.msk.f32.mxu0 %vm7790_vm2, %v7789_v15 }
 0xcc4   : > { %7347 = vmatprep.subr.bf16.mxu0 %v7794_v62 }
 0xcc7   : > { %7349 = vmatpush3.bf16.msra.mxu0 %v8337_v10 }
 0xcc8   : > { %7356 = vmatprep.subr.bf16.mxu0 %v7794_v62 }
 0xd8d   : > { %v3920_v55 = vpop.f32.mrb[50].mxu0 }
 0xd8e   : > { %v7480_v56 = vadd.f32 %v3920_v55, %v8432_v51  ;;  %v6991_v53 = vpop.f32.mrb[51].mxu0 }
 0xd90   : > { %7622 = vtanh.f32 %v7480_v56  ;;  %v6413_v58 = vmul.f32 -1.442695, %v7480_v56 }
 0xd95   : > { %v4089_v59 = vpop.f32.mrb[54].mxu0 }
 0xd96   : > { %v4093_v60 = vadd.f32 %v4089_v59, %v8386_v20  ;;  %v7013_v22 = vpop.f32.mrb[55].mxu0 }
 0xd98   : > { %7624 = vtanh.f32 %v4093_v60  ;;  %v6416_v61 = vmul.f32 -1.442695, %v4093_v60 }
 0xd99   : > { %7626 = vpow2.f32 %v6413_v58 }
 0xd9a   : > { %v7623_v57 = vpop.eup %7622  ;;  %7628 = vpow2.f32 %v6416_v61 }
 0xd9b   : > { %3933 = vrot.lane.b32.xlu0 %v7623_v57, %s7791_s14 }
 0xda2   : > { %v7625_v31 = vpop.eup %7624 }
 0xda3   : > { %4103 = vrot.lane.b32.xlu1 %v7625_v31, %s7791_s14  ;;  %v7627_v63 = vpop.eup %7626 }
 0xda4   : > { %v3927_v21 = vadd.f32 1.0, %v7627_v63  ;;  %v7629_v47 = vpop.eup %7628 }
 0xda5   : > { %v4097_v0 = vadd.f32 1.0, %v7629_v47 }
 0xda6   : > { %7630 = vrcp.f32 %v3927_v21 }
 0xda7   : > { %7632 = vrcp.f32 %v4097_v0 }
 0xdb0   : > { %v7631_v1 = vpop.eup %7630 }
 0xdb1   : > { %v7633_v40 = vpop.eup %7632  ;;  %v3931_v19 = vmul.f32 0.0, %v7631_v1 }
 0xdb2   : > { %v4101_v16 = vmul.f32 %v7633_v40, %v8402_v45 }
 0xe0d   : > { %v3934_v2 = vpop.permute.xlu0 %3933 }
 0xe0e   : > { %v3936_v5 = vmul.f32 %v7631_v1, %v3934_v2 }
 0xe10   : > { %3938 = vrot.lane.b32.xlu0 %v3936_v5, %s7793_s18 }
 0xe15   : > { %v4104_v8 = vpop.permute.xlu1 %4103 }
 0xe16   : > { %v4106_v20 = vmul.f32 %v7633_v40, %v4104_v8 }
 0xe18   : > { %4108 = vrot.lane.b32.xlu1 %v4106_v20, %s7793_s18 }
 0xe82   : > { %v3939_v12 = vpop.permute.xlu0 %3938 }
 0xe83   : > { %v8440_v24 = vadd.f32 %v3939_v12, %v3931_v19 }
 0xe85   : > { %7634 = vtanh.f32 %v8440_v24 }
 0xe8a   : > { %v4109_v38 = vpop.permute.xlu1 %4108 }
 0xe8b   : > { %v8444_v50 = vadd.f32 %v4109_v38, %v4101_v16 }
 0xe8d   : > { %7636 = vtanh.f32 %v8444_v50 }
 0xe8f   : > { %v7635_v28 = vpop.eup %7634 }
 0xe90   : > { %3944 = vrot.lane.b32.xlu0 %v7635_v28, %s7791_s14 }
 0xe97   : > { %v7637_v11 = vpop.eup %7636 }
 0xe98   : > { %4114 = vrot.lane.b32.xlu1 %v7637_v11, %s7791_s14 }
 0xf02   : > { %v3945_v3 = vpop.permute.xlu0 %3944 }
 0xf03   : > { %v3947_v18 = vmul.f32 %v7631_v1, %v3945_v3 }
 0xf05   : > { %3949 = vrot.lane.b32.xlu0 %v3947_v18, %s7793_s18 }
 0xf0a   : > { %v4115_v30 = vpop.permute.xlu1 %4114 }
 0xf0b   : > { %v4117_v32 = vmul.f32 %v7633_v40, %v4115_v30 }
 0xf0d   : > { %4119 = vrot.lane.b32.xlu1 %v4117_v32, %s7793_s18 }
 0xf77   : > { %v3950_v25 = vpop.permute.xlu0 %3949 }
 0xf78   : > { %7001 = vmatmul.mubr.msk.f32.vlgmr.msra.gmra.mrb[46].mxu1 %vm383_vm1, %v3950_v25 }
 0xf79   : > { %7340 = vmatpush3.bf16.msra.mxu1 %v8405_v48  ;;  %7022 = vmatprep.mubr.msk.f32.mxu1 %vm7790_vm2, %v7789_v15 }
 0xf7a   : > { %7341 = vmatprep.subr.bf16.mxu1 %v7794_v62 }
 0xf7d   : > { %7343 = vmatpush3.bf16.msra.mxu1 %v8408_v34 }
 0xf7e   : > { %7350 = vmatprep.subr.bf16.mxu1 %v7794_v62 }
 0xf7f   : > { %v4120_v27 = vpop.permute.xlu1 %4119 }
 0xf80   : > { %7023 = vmatmul.mubr.msk.f32.vlgmr.msra.gmra.mrb[46].mxu1 %vm383_vm1, %v4120_v27 }
 0xf81   : > { %7352 = vmatpush3.bf16.msra.mxu1 %v8369_v13  ;;  %7044 = vmatprep.mubr.msk.f32.mxu1 %vm7790_vm2, %v7789_v15 }
 0xf82   : > { %7353 = vmatprep.subr.bf16.mxu1 %v7794_v62 }
 0xf85   : > { %7355 = vmatpush3.bf16.msra.mxu1 %v8373_v6 }
 0xf86   : > { %7362 = vmatprep.subr.bf16.mxu1 %v7794_v62 }
 0xf88   : > { %7045 = vmatmul.mubr.msk.f32.vlgmr.msra.gmra.mrb[48].mxu1 %vm383_vm1, %v4120_v27 }
 0xf89   : > { %7364 = vmatpush3.bf16.msra.mxu1 %v8333_v7  ;;  %7066 = vmatprep.mubr.msk.f32.mxu1 %vm7790_vm2, %v7789_v15 }
 0xf8a   : > { %7365 = vmatprep.subr.bf16.mxu1 %v7794_v62 }
 0xf8d   : > { %7367 = vmatpush3.bf16.msra.mxu1 %v8337_v10 }
 0xf8e   : > { %7374 = vmatprep.subr.bf16.mxu1 %v7794_v62 }
0x1053   : > { %v4189_v29 = vpop.f32.mrb[46].mxu1 }
0x1054   : > { %v7481_v41 = vadd.f32 %v4189_v29, %v8432_v51  ;;  %v7024_v54 = vpop.f32.mrb[47].mxu1 }
0x1056   : > { %7638 = vtanh.f32 %v7481_v41  ;;  %v6418_v39 = vmul.f32 -1.442695, %v7481_v41 }
0x105b   : > { %v4358_v42 = vpop.f32.mrb[48].mxu1 }
0x105c   : > { %v4362_v43 = vadd.f32 %v4358_v42, %v8390_v4  ;;  %v7046_v44 = vpop.f32.mrb[49].mxu1 }
0x105e   : > { %7640 = vtanh.f32 %v4362_v43  ;;  %v6421_v33 = vmul.f32 -1.442695, %v4362_v43 }
0x105f   : > { %7642 = vpow2.f32 %v6418_v39 }
0x1060   : > { %v7639_v45 = vpop.eup %7638  ;;  %7644 = vpow2.f32 %v6421_v33 }
0x1061   : > { %4202 = vrot.lane.b32.xlu0 %v7639_v45, %s7791_s14 }
0x1068   : > { %v7641_v46 = vpop.eup %7640 }
0x1069   : > { %4372 = vrot.lane.b32.xlu1 %v7641_v46, %s7791_s14  ;;  %v7643_v36 = vpop.eup %7642 }
0x106a   : > { %v4196_v35 = vadd.f32 1.0, %v7643_v36  ;;  %v7645_v49 = vpop.eup %7644 }
0x106b   : > { %v4366_v37 = vadd.f32 1.0, %v7645_v49 }
0x106c   : > { %7646 = vrcp.f32 %v4196_v35 }
0x106d   : > { %7648 = vrcp.f32 %v4366_v37 }
0x1076   : > { %v7647_v52 = vpop.eup %7646 }
0x1077   : > { %v7649_v56 = vpop.eup %7648  ;;  %v4200_v60 = vmul.f32 %v7647_v52, %v8440_v24 }
0x1078   : > { %v4370_v31 = vmul.f32 %v7649_v56, %v8444_v50 }
0x10d3   : > { %v4203_v4 = vpop.permute.xlu0 %4202 }
0x10d4   : > { %v4205_v55 = vmul.f32 %v7647_v52, %v4203_v4 }
0x10d6   : > { %4207 = vrot.lane.b32.xlu0 %v4205_v55, %s7793_s18 }
0x10db   : > { %v4373_v53 = vpop.permute.xlu1 %4372 }
0x10dc   : > { %v4375_v59 = vmul.f32 %v7649_v56, %v4373_v53 }
0x10de   : > { %4377 = vrot.lane.b32.xlu1 %v4375_v59, %s7793_s18 }
0x1148   : > { %v4208_v22 = vpop.permute.xlu0 %4207 }
0x1149   : > { %v8479_v57 = vadd.f32 %v4208_v22, %v4200_v60 }
0x114b   : > { %7650 = vtanh.f32 %v8479_v57 }
0x1150   : > { %v4378_v58 = vpop.permute.xlu1 %4377 }
0x1151   : > { %v8483_v61 = vadd.f32 %v4378_v58, %v4370_v31 }
0x1153   : > { %7652 = vtanh.f32 %v8483_v61 }
0x1155   : > { %v7651_v63 = vpop.eup %7650 }
0x1156   : > { %4213 = vrot.lane.b32.xlu0 %v7651_v63, %s7791_s14 }
0x115d   : > { %v7653_v21 = vpop.eup %7652 }
0x115e   : > { %4383 = vrot.lane.b32.xlu1 %v7653_v21, %s7791_s14 }
0x11c8   : > { %v4214_v47 = vpop.permute.xlu0 %4213 }
0x11c9   : > { %v4216_v0 = vmul.f32 %v7647_v52, %v4214_v47 }
0x11cb   : > { %4218 = vrot.lane.b32.xlu0 %v4216_v0, %s7793_s18 }
0x11d0   : > { %v4384_v1 = vpop.permute.xlu1 %4383 }
0x11d1   : > { %v4386_v2 = vmul.f32 %v7649_v56, %v4384_v1 }
0x11d3   : > { %4388 = vrot.lane.b32.xlu1 %v4386_v2, %s7793_s18 }
0x123d   : > { %v4219_v5 = vpop.permute.xlu0 %4218 }
0x123e   : > { %7034 = vmatmul.mubr.msk.f32.vlgmr.msra.gmra.mrb[56].mxu0 %vm383_vm1, %v4219_v5 }
0x123f   : > { %7358 = vmatpush3.bf16.msra.mxu0 %v8405_v48  ;;  %7055 = vmatprep.mubr.msk.f32.mxu0 %vm7790_vm2, %v7789_v15 }
0x1240   : > { %7359 = vmatprep.subr.bf16.mxu0 %v7794_v62 }
0x1243   : > { %7361 = vmatpush3.bf16.msra.mxu0 %v8408_v34 }
0x1244   : > { %7368 = vmatprep.subr.bf16.mxu0 %v7794_v62 }
0x1245   : > { %v4389_v40 = vpop.permute.xlu1 %4388 }
0x1246   : > { %7056 = vmatmul.mubr.msk.f32.vlgmr.msra.gmra.mrb[56].mxu0 %vm383_vm1, %v4389_v40 }
0x1247   : > { %7370 = vmatpush3.bf16.msra.mxu0 %v8369_v13  ;;  %7077 = vmatprep.mubr.msk.f32.mxu0 %vm7790_vm2, %v7789_v15 }
0x1248   : > { %7371 = vmatprep.subr.bf16.mxu0 %v7794_v62 }
0x124b   : > { %7373 = vmatpush3.bf16.msra.mxu0 %v8373_v6 }
0x124c   : > { %7380 = vmatprep.subr.bf16.mxu0 %v7794_v62 }
0x124e   : > { %7078 = vmatmul.mubr.msk.f32.vlgmr.msra.gmra.mrb[58].mxu0 %vm383_vm1, %v4389_v40 }
0x124f   : > { %7382 = vmatpush3.bf16.msra.mxu0 %v8333_v7  ;;  %7099 = vmatprep.mubr.msk.f32.mxu0 %vm7790_vm2, %v7789_v15 }
0x1250   : > { %7383 = vmatprep.subr.bf16.mxu0 %v7794_v62 }
0x1253   : > { %7385 = vmatpush3.bf16.msra.mxu0 %v8337_v10 }
0x1254   : > { %7392 = vmatprep.subr.bf16.mxu0 %v7794_v62 }
0x1319   : > { %v4458_v8 = vpop.f32.mrb[56].mxu0 }
0x131a   : > { %v7482_v20 = vadd.f32 %v4458_v8, %v8432_v51  ;;  %v7057_v19 = vpop.f32.mrb[57].mxu0 }
0x131c   : > { %7654 = vtanh.f32 %v7482_v20  ;;  %v6423_v28 = vmul.f32 -1.442695, %v7482_v20 }
0x1321   : > { %v4627_v12 = vpop.f32.mrb[58].mxu0 }
0x1322   : > { %v4631_v24 = vadd.f32 %v4627_v12, %v8388_v14  ;;  %v7079_v16 = vpop.f32.mrb[59].mxu0 }
0x1324   : > { %7656 = vtanh.f32 %v4631_v24  ;;  %v6426_v11 = vmul.f32 -1.442695, %v4631_v24 }
0x1325   : > { %7658 = vpow2.f32 %v6423_v28 }
0x1326   : > { %v7655_v38 = vpop.eup %7654  ;;  %7660 = vpow2.f32 %v6426_v11 }
0x1327   : > { %4471 = vrot.lane.b32.xlu0 %v7655_v38, %s7791_s14 }
0x132e   : > { %v7657_v50 = vpop.eup %7656 }
0x132f   : > { %4641 = vrot.lane.b32.xlu1 %v7657_v50, %s7791_s14  ;;  %v7659_v3 = vpop.eup %7658 }
0x1330   : > { %v4465_v18 = vadd.f32 1.0, %v7659_v3  ;;  %v7661_v30 = vpop.eup %7660 }
0x1331   : > { %v4635_v32 = vadd.f32 1.0, %v7661_v30 }
0x1332   : > { %7662 = vrcp.f32 %v4465_v18 }
0x1333   : > { %7664 = vrcp.f32 %v4635_v32 }
0x133c   : > { %v7663_v25 = vpop.eup %7662 }
0x133d   : > { %v7665_v29 = vpop.eup %7664  ;;  %v4469_v42 = vmul.f32 %v7663_v25, %v8479_v57 }
0x133e   : > { %v4639_v45 = vmul.f32 %v7665_v29, %v8483_v61 }
0x1399   : > { %v4472_v14 = vpop.permute.xlu0 %4471 }
0x139a   : > { %v4474_v27 = vmul.f32 %v7663_v25, %v4472_v14 }
0x139c   : > { %4476 = vrot.lane.b32.xlu0 %v4474_v27, %s7793_s18 }
0x13a1   : > { %v4642_v41 = vpop.permute.xlu1 %4641 }
0x13a2   : > { %v4644_v54 = vmul.f32 %v7665_v29, %v4642_v41 }
0x13a4   : > { %4646 = vrot.lane.b32.xlu1 %v4644_v54, %s7793_s18 }
0x140e   : > { %v4477_v43 = vpop.permute.xlu0 %4476 }
0x140f   : > { %v8518_v44 = vadd.f32 %v4477_v43, %v4469_v42 }
0x1411   : > { %7666 = vtanh.f32 %v8518_v44 }
0x1416   : > { %v4647_v46 = vpop.permute.xlu1 %4646 }
0x1417   : > { %v8522_v39 = vadd.f32 %v4647_v46, %v4639_v45 }
0x1419   : > { %7668 = vtanh.f32 %v8522_v39 }
0x141b   : > { %v7667_v33 = vpop.eup %7666 }
0x141c   : > { %4482 = vrot.lane.b32.xlu0 %v7667_v33, %s7791_s14 }
0x1423   : > { %v7669_v36 = vpop.eup %7668 }
0x1424   : > { %4652 = vrot.lane.b32.xlu1 %v7669_v36, %s7791_s14 }
0x148e   : > { %v4483_v35 = vpop.permute.xlu0 %4482 }
0x148f   : > { %v4485_v49 = vmul.f32 %v7663_v25, %v4483_v35 }
0x1491   : > { %4487 = vrot.lane.b32.xlu0 %v4485_v49, %s7793_s18 }
0x1496   : > { %v4653_v37 = vpop.permute.xlu1 %4652 }
0x1497   : > { %v4655_v52 = vmul.f32 %v7665_v29, %v4653_v37 }
0x1499   : > { %4657 = vrot.lane.b32.xlu1 %v4655_v52, %s7793_s18 }
0x1503   : > { %v4488_v4 = vpop.permute.xlu0 %4487 }
0x1504   : > { %7067 = vmatmul.mubr.msk.f32.vlgmr.msra.gmra.mrb[50].mxu1 %vm383_vm1, %v4488_v4 }
0x1505   : > { %7376 = vmatpush3.bf16.msra.mxu1 %v8405_v48  ;;  %7088 = vmatprep.mubr.msk.f32.mxu1 %vm7790_vm2, %v7789_v15 }
0x1506   : > { %7377 = vmatprep.subr.bf16.mxu1 %v7794_v62 }
0x1509   : > { %7379 = vmatpush3.bf16.msra.mxu1 %v8408_v34 }
0x150a   : > { %7386 = vmatprep.subr.bf16.mxu1 %v7794_v62 }
0x150b   : > { %v4658_v55 = vpop.permute.xlu1 %4657 }
0x150c   : > { %7089 = vmatmul.mubr.msk.f32.vlgmr.msra.gmra.mrb[50].mxu1 %vm383_vm1, %v4658_v55 }
0x150d   : > { %7388 = vmatpush3.bf16.msra.mxu1 %v8369_v13  ;;  %7110 = vmatprep.mubr.msk.f32.mxu1 %vm7790_vm2, %v7789_v15 }
0x150e   : > { %7389 = vmatprep.subr.bf16.mxu1 %v7794_v62 }
0x1511   : > { %7391 = vmatpush3.bf16.msra.mxu1 %v8373_v6 }
0x1512   : > { %7398 = vmatprep.subr.bf16.mxu1 %v7794_v62 }
0x1514   : > { %7111 = vmatmul.mubr.msk.f32.vlgmr.msra.gmra.mrb[52].mxu1 %vm383_vm1, %v4658_v55 }
0x1515   : > { %7400 = vmatpush3.bf16.msra.mxu1 %v8333_v7  ;;  %7132 = vmatprep.mubr.msk.f32.mxu1 %vm7790_vm2, %v7789_v15 }
0x1516   : > { %7401 = vmatprep.subr.bf16.mxu1 %v7794_v62 }
0x1519   : > { %7403 = vmatpush3.bf16.msra.mxu1 %v8337_v10 }
0x151a   : > { %7410 = vmatprep.subr.bf16.mxu1 %v7794_v62 }
0x15df   : > { %v4727_v56 = vpop.f32.mrb[50].mxu1 }
0x15e0   : > { %v7483_v53 = vadd.f32 %v4727_v56, %v8432_v51  ;;  %v7090_v59 = vpop.f32.mrb[51].mxu1 }
0x15e2   : > { %7670 = vtanh.f32 %v7483_v53  ;;  %v6428_v61 = vmul.f32 -1.442695, %v7483_v53 }
0x15e7   : > { %v4896_v60 = vpop.f32.mrb[52].mxu1 }
0x15e8   : > { %v4900_v22 = vadd.f32 %v4896_v60, %v8394_v23  ;;  %v7112_v57 = vpop.f32.mrb[53].mxu1 }
0x15ea   : > { %7672 = vtanh.f32 %v4900_v22  ;;  %v6431_v63 = vmul.f32 -1.442695, %v4900_v22 }
0x15eb   : > { %7674 = vpow2.f32 %v6428_v61 }
0x15ec   : > { %v7671_v31 = vpop.eup %7670  ;;  %7676 = vpow2.f32 %v6431_v63 }
0x15ed   : > { %4740 = vrot.lane.b32.xlu0 %v7671_v31, %s7791_s14 }
0x15f4   : > { %v7673_v58 = vpop.eup %7672 }
0x15f5   : > { %4910 = vrot.lane.b32.xlu1 %v7673_v58, %s7791_s14  ;;  %v7675_v21 = vpop.eup %7674 }
0x15f6   : > { %v4734_v47 = vadd.f32 1.0, %v7675_v21  ;;  %v7677_v0 = vpop.eup %7676 }
0x15f7   : > { %v4904_v1 = vadd.f32 1.0, %v7677_v0 }
0x15f8   : > { %7678 = vrcp.f32 %v4734_v47 }
0x15f9   : > { %7680 = vrcp.f32 %v4904_v1 }
0x1602   : > { %v7679_v2 = vpop.eup %7678 }
0x1603   : > { %v7681_v40 = vpop.eup %7680  ;;  %v4738_v19 = vmul.f32 %v7679_v2, %v8518_v44 }
0x1604   : > { %v4908_v16 = vmul.f32 %v7681_v40, %v8522_v39 }
0x165f   : > { %v4741_v23 = vpop.permute.xlu0 %4740 }
0x1660   : > { %v4743_v5 = vmul.f32 %v7679_v2, %v4741_v23 }
0x1662   : > { %4745 = vrot.lane.b32.xlu0 %v4743_v5, %s7793_s18 }
0x1667   : > { %v4911_v8 = vpop.permute.xlu1 %4910 }
0x1668   : > { %v4913_v20 = vmul.f32 %v7681_v40, %v4911_v8 }
0x166a   : > { %4915 = vrot.lane.b32.xlu1 %v4913_v20, %s7793_s18 }
0x16d4   : > { %v4746_v12 = vpop.permute.xlu0 %4745 }
0x16d5   : > { %v8557_v24 = vadd.f32 %v4746_v12, %v4738_v19 }
0x16d7   : > { %7682 = vtanh.f32 %v8557_v24 }
0x16dc   : > { %v4916_v38 = vpop.permute.xlu1 %4915 }
0x16dd   : > { %v8561_v50 = vadd.f32 %v4916_v38, %v4908_v16 }
0x16df   : > { %7684 = vtanh.f32 %v8561_v50 }
0x16e1   : > { %v7683_v28 = vpop.eup %7682 }
0x16e2   : > { %4751 = vrot.lane.b32.xlu0 %v7683_v28, %s7791_s14 }
0x16e9   : > { %v7685_v11 = vpop.eup %7684 }
0x16ea   : > { %4921 = vrot.lane.b32.xlu1 %v7685_v11, %s7791_s14 }
0x1754   : > { %v4752_v3 = vpop.permute.xlu0 %4751 }
0x1755   : > { %v4754_v18 = vmul.f32 %v7679_v2, %v4752_v3 }
0x1757   : > { %4756 = vrot.lane.b32.xlu0 %v4754_v18, %s7793_s18 }
0x175c   : > { %v4922_v30 = vpop.permute.xlu1 %4921 }
0x175d   : > { %v4924_v32 = vmul.f32 %v7681_v40, %v4922_v30 }
0x175f   : > { %4926 = vrot.lane.b32.xlu1 %v4924_v32, %s7793_s18 }
0x17c9   : > { %v4757_v25 = vpop.permute.xlu0 %4756 }
0x17ca   : > { %7100 = vmatmul.mubr.msk.f32.vlgmr.msra.gmra.mrb[60].mxu0 %vm383_vm1, %v4757_v25 }
0x17cb   : > { %7394 = vmatpush3.bf16.msra.mxu0 %v8405_v48  ;;  %7121 = vmatprep.mubr.msk.f32.mxu0 %vm7790_vm2, %v7789_v15 }
0x17cc   : > { %7395 = vmatprep.subr.bf16.mxu0 %v7794_v62 }
0x17cf   : > { %7397 = vmatpush3.bf16.msra.mxu0 %v8408_v34 }
0x17d0   : > { %7404 = vmatprep.subr.bf16.mxu0 %v7794_v62 }
0x17d1   : > { %v4927_v14 = vpop.permute.xlu1 %4926 }
0x17d2   : > { %7122 = vmatmul.mubr.msk.f32.vlgmr.msra.gmra.mrb[60].mxu0 %vm383_vm1, %v4927_v14 }
0x17d3   : > { %7406 = vmatpush3.bf16.msra.mxu0 %v8369_v13  ;;  %7143 = vmatprep.mubr.msk.f32.mxu0 %vm7790_vm2, %v7789_v15 }
0x17d4   : > { %7407 = vmatprep.subr.bf16.mxu0 %v7794_v62 }
0x17d7   : > { %7409 = vmatpush3.bf16.msra.mxu0 %v8373_v6 }
0x17d8   : > { %7416 = vmatprep.subr.bf16.mxu0 %v7794_v62 }
0x17da   : > { %7144 = vmatmul.mubr.msk.f32.vlgmr.msra.gmra.mrb[62].mxu0 %vm383_vm1, %v4927_v14 }
0x17db   : > { %7418 = vmatpush3.bf16.msra.mxu0 %v8333_v7  ;;  %7165 = vmatprep.mubr.msk.f32.mxu0 %vm7790_vm2, %v7789_v15 }
0x17dc   : > { %7419 = vmatprep.subr.bf16.mxu0 %v7794_v62 }
0x17df   : > { %7421 = vmatpush3.bf16.msra.mxu0 %v8337_v10 }
0x17e0   : > { %7428 = vmatprep.subr.bf16.mxu0 %v7794_v62 }
0x18a5   : > { %v4996_v27 = vpop.f32.mrb[60].mxu0 }
0x18a6   : > { %v7484_v29 = vadd.f32 %v4996_v27, %v8432_v51  ;;  %v7123_v41 = vpop.f32.mrb[61].mxu0 }
0x18a8   : > { %7686 = vtanh.f32 %v7484_v29  ;;  %v6433_v46 = vmul.f32 -1.442695, %v7484_v29 }
0x18ad   : > { %v5165_v54 = vpop.f32.mrb[62].mxu0 }
0x18ae   : > { %v5169_v42 = vadd.f32 %v5165_v54, %v8392_v17  ;;  %v7145_v43 = vpop.f32.mrb[63].mxu0 }
0x18b0   : > { %7688 = vtanh.f32 %v5169_v42  ;;  %v6436_v39 = vmul.f32 -1.442695, %v5169_v42 }
0x18b1   : > { %7690 = vpow2.f32 %v6433_v46 }
0x18b2   : > { %v7687_v44 = vpop.eup %7686  ;;  %7692 = vpow2.f32 %v6436_v39 }
0x18b3   : > { %5009 = vrot.lane.b32.xlu0 %v7687_v44, %s7791_s14 }
0x18ba   : > { %v7689_v45 = vpop.eup %7688 }
0x18bb   : > { %5179 = vrot.lane.b32.xlu1 %v7689_v45, %s7791_s14  ;;  %v7691_v33 = vpop.eup %7690 }
0x18bc   : > { %v5003_v36 = vadd.f32 1.0, %v7691_v33  ;;  %v7693_v35 = vpop.eup %7692 }
0x18bd   : > { %v5173_v49 = vadd.f32 1.0, %v7693_v35 }
0x18be   : > { %7694 = vrcp.f32 %v5003_v36 }
0x18bf   : > { %7696 = vrcp.f32 %v5173_v49 }
0x18c8   : > { %v7695_v37 = vpop.eup %7694 }
0x18c9   : > { %v7697_v4 = vpop.eup %7696  ;;  %v5007_v53 = vmul.f32 %v7695_v37, %v8557_v24 }
0x18ca   : > { %v5177_v22 = vmul.f32 %v7697_v4, %v8561_v50 }
0x1925   : > { %v5010_v17 = vpop.permute.xlu0 %5009 }
0x1926   : > { %v5012_v52 = vmul.f32 %v7695_v37, %v5010_v17 }
0x1928   : > { %5014 = vrot.lane.b32.xlu0 %v5012_v52, %s7793_s18 }
0x192d   : > { %v5180_v55 = vpop.permute.xlu1 %5179 }
0x192e   : > { %v5182_v56 = vmul.f32 %v7697_v4, %v5180_v55 }
0x1930   : > { %5184 = vrot.lane.b32.xlu1 %v5182_v56, %s7793_s18 }
0x199a   : > { %v5015_v59 = vpop.permute.xlu0 %5014 }
0x199b   : > { %v8596_v60 = vadd.f32 %v5015_v59, %v5007_v53 }
0x199d   : > { %7698 = vtanh.f32 %v8596_v60 }
0x19a2   : > { %v5185_v57 = vpop.permute.xlu1 %5184 }
0x19a3   : > { %v8600_v31 = vadd.f32 %v5185_v57, %v5177_v22 }
0x19a5   : > { %7700 = vtanh.f32 %v8600_v31 }
0x19a7   : > { %v7699_v58 = vpop.eup %7698 }
0x19a8   : > { %5020 = vrot.lane.b32.xlu0 %v7699_v58, %s7791_s14 }
0x19af   : > { %v7701_v61 = vpop.eup %7700 }
0x19b0   : > { %5190 = vrot.lane.b32.xlu1 %v7701_v61, %s7791_s14 }
0x1a1a   : > { %v5021_v63 = vpop.permute.xlu0 %5020 }
0x1a1b   : > { %v5023_v21 = vmul.f32 %v7695_v37, %v5021_v63 }
0x1a1d   : > { %5025 = vrot.lane.b32.xlu0 %v5023_v21, %s7793_s18 }
0x1a22   : > { %v5191_v47 = vpop.permute.xlu1 %5190 }
0x1a23   : > { %v5193_v0 = vmul.f32 %v7697_v4, %v5191_v47 }
0x1a25   : > { %5195 = vrot.lane.b32.xlu1 %v5193_v0, %s7793_s18 }
0x1a8f   : > { %v5026_v1 = vpop.permute.xlu0 %5025 }
0x1a90   : > { %7133 = vmatmul.mubr.msk.f32.vlgmr.msra.gmra.mrb[54].mxu1 %vm383_vm1, %v5026_v1 }
0x1a91   : > { %7412 = vmatpush3.bf16.msra.mxu1 %v8405_v48  ;;  %7154 = vmatprep.mubr.msk.f32.mxu1 %vm7790_vm2, %v7789_v15 }
0x1a92   : > { %7413 = vmatprep.subr.bf16.mxu1 %v7794_v62 }
0x1a95   : > { %7415 = vmatpush3.bf16.msra.mxu1 %v8408_v34 }
0x1a96   : > { %7422 = vmatprep.subr.bf16.mxu1 %v7794_v62 }
0x1a97   : > { %v5196_v2 = vpop.permute.xlu1 %5195 }
0x1a98   : > { %7155 = vmatmul.mubr.msk.f32.vlgmr.msra.gmra.mrb[54].mxu1 %vm383_vm1, %v5196_v2 }
0x1a99   : > { %7424 = vmatpush3.bf16.msra.mxu1 %v8369_v13  ;;  %7176 = vmatprep.mubr.msk.f32.mxu1 %vm7790_vm2, %v7789_v15 }
0x1a9a   : > { %7425 = vmatprep.subr.bf16.mxu1 %v7794_v62 }
0x1a9d   : > { %7427 = vmatpush3.bf16.msra.mxu1 %v8373_v6 }
0x1a9e   : > { %7434 = vmatprep.subr.bf16.mxu1 %v7794_v62 }
0x1aa0   : > { %7177 = vmatmul.mubr.msk.f32.vlgmr.msra.gmra.mrb[56].mxu1 %vm383_vm1, %v5196_v2 }
0x1aa1   : > { %7436 = vmatpush3.bf16.msra.mxu1 %v8333_v7  ;;  %7198 = vmatprep.mubr.msk.f32.mxu1 %vm7790_vm2, %v7789_v15 }
0x1aa2   : > { %7437 = vmatprep.subr.bf16.mxu1 %v7794_v62 }
0x1aa5   : > { %7439 = vmatpush3.bf16.msra.mxu1 %v8337_v10 }
0x1aa6   : > { %7446 = vmatprep.subr.bf16.mxu1 %v7794_v62 }
0x1b6b   : > { %v5265_v23 = vpop.f32.mrb[54].mxu1 }
0x1b6c   : > { %v7485_v5 = vadd.f32 %v5265_v23, %v8432_v51  ;;  %v7156_v40 = vpop.f32.mrb[55].mxu1 }
0x1b6e   : > { %7702 = vtanh.f32 %v7485_v5  ;;  %v6438_v24 = vmul.f32 -1.442695, %v7485_v5 }
0x1b73   : > { %v5434_v8 = vpop.f32.mrb[56].mxu1 }
0x1b74   : > { %v5438_v20 = vadd.f32 %v5434_v8, %v8398_v9  ;;  %v7178_v19 = vpop.f32.mrb[57].mxu1 }
0x1b76   : > { %7704 = vtanh.f32 %v5438_v20  ;;  %v6441_v10 = vmul.f32 -1.442695, %v5438_v20 }
0x1b77   : > { %7706 = vpow2.f32 %v6438_v24  ;;  %v5831_v24 = vld [vmem:[#allocation2 + $0xe8] sm:$0xff] }
0x1b78   : > { %v7703_v7 = vpop.eup %7702  ;;  %7708 = vpow2.f32 %v6441_v10  ;;  %v5832_v10 = vld [vmem:[#allocation2 + $0xf0] sm:$0xff] }
0x1b79   : > { %5278 = vrot.lane.b32.xlu0 %v7703_v7, %s7791_s14 }
0x1b80   : > { %v7705_v12 = vpop.eup %7704 }
0x1b81   : > { %5448 = vrot.lane.b32.xlu1 %v7705_v12, %s7791_s14  ;;  %v7707_v16 = vpop.eup %7706 }
0x1b82   : > { %v5272_v38 = vadd.f32 1.0, %v7707_v16  ;;  %v7709_v50 = vpop.eup %7708  ;;  %v7459_v16 = vpack.c.bf16 %v5832_v10, %v5831_v24 }
0x1b83   : > { %v5442_v28 = vadd.f32 1.0, %v7709_v50  ;;  %v5834_v50 = vld [vmem:[#allocation2 + $0x100] sm:$0xff] }
0x1b84   : > { %7710 = vrcp.f32 %v5272_v38  ;;  %v5833_v38 = vld [vmem:[#allocation2 + $0xf8] sm:$0xff] }
0x1b85   : > { %7712 = vrcp.f32 %v5442_v28 }
0x1b8e   : > { %v7711_v11 = vpop.eup %7710 }
0x1b8f   : > { %v7713_v18 = vpop.eup %7712  ;;  %v5276_v25 = vmul.f32 %v7711_v11, %v8596_v60 }
0x1b90   : > { %v5446_v29 = vmul.f32 %v7713_v18, %v8600_v31 }
0x1beb   : > { %v5279_v9 = vpop.permute.xlu0 %5278 }
0x1bec   : > { %v5281_v3 = vmul.f32 %v7711_v11, %v5279_v9 }
0x1bee   : > { %5283 = vrot.lane.b32.xlu0 %v5281_v3, %s7793_s18 }
0x1bf3   : > { %v5449_v30 = vpop.permute.xlu1 %5448 }
0x1bf4   : > { %v5451_v32 = vmul.f32 %v7713_v18, %v5449_v30 }
0x1bf6   : > { %5453 = vrot.lane.b32.xlu1 %v5451_v32, %s7793_s18 }
0x1c60   : > { %v5284_v14 = vpop.permute.xlu0 %5283 }
0x1c61   : > { %v5286_v27 = vadd.f32 %v5284_v14, %v5276_v25 }
0x1c63   : > { %7714 = vtanh.f32 %v5286_v27 }
0x1c68   : > { %v5454_v41 = vpop.permute.xlu1 %5453 }
0x1c69   : > { %v5456_v54 = vadd.f32 %v5454_v41, %v5446_v29 }
0x1c6b   : > { %7716 = vtanh.f32 %v5456_v54 }
0x1c6d   : > { %v7715_v42 = vpop.eup %7714 }
0x1c6e   : > { %5289 = vrot.lane.b32.xlu0 %v7715_v42, %s7791_s14 }
0x1c75   : > { %v7717_v43 = vpop.eup %7716 }
0x1c76   : > { %5459 = vrot.lane.b32.xlu1 %v7717_v43, %s7791_s14  ;;  %v5835_v43 = vld [vmem:[#allocation2 + $0x108] sm:$0xff] }
0x1ce0   : > { %v5290_v44 = vpop.permute.xlu0 %5289 }
0x1ce1   : > { %v5292_v45 = vmul.f32 %v7711_v11, %v5290_v44  ;;  %v7462_v11 = vpack.c.bf16 %v5834_v50, %v5833_v38  ;;  %v5836_v44 = vld [vmem:[#allocation2 + $0x110] sm:$0xff] }
0x1ce3   : > { %5294 = vrot.lane.b32.xlu0 %v5292_v45, %s7793_s18  ;;  %v5837_v45 = vld [vmem:[#allocation2 + $0x118] sm:$0xff] }
0x1ce8   : > { %v5460_v46 = vpop.permute.xlu1 %5459 }
0x1ce9   : > { %v5462_v39 = vmul.f32 %v7713_v18, %v5460_v46  ;;  %v7453_v46 = vpack.c.bf16 %v5836_v44, %v5835_v43 }
0x1ceb   : > { %5464 = vrot.lane.b32.xlu1 %v5462_v39, %s7793_s18  ;;  %v5838_v39 = vld [vmem:[#allocation2 + $0x120] sm:$0xff] }
0x1d55   : > { %v5295_v33 = vpop.permute.xlu0 %5294 }
0x1d56   : > { %7166 = vmatmul.mubr.msk.f32.vlgmr.msra.gmra.mrb[64].mxu0 %vm383_vm1, %v5295_v33  ;;  %v7456_v33 = vpack.c.bf16 %v5838_v39, %v5837_v45 }
0x1d57   : > { %7430 = vmatpush3.bf16.msra.mxu0 %v8405_v48  ;;  %7187 = vmatprep.mubr.msk.f32.mxu0 %vm7790_vm2, %v7789_v15 }
0x1d58   : > { %7431 = vmatprep.subr.bf16.mxu0 %v7794_v62 }
0x1d5b   : > { %7433 = vmatpush3.bf16.msra.mxu0 %v8408_v34 }
0x1d5c   : > { %7440 = vmatprep.subr.bf16.mxu0 %v7794_v62 }
0x1d5d   : > { %v5465_v36 = vpop.permute.xlu1 %5464 }
0x1d5e   : > { %7188 = vmatmul.mubr.msk.f32.vlgmr.msra.gmra.mrb[64].mxu0 %vm383_vm1, %v5465_v36 }
0x1d5f   : > { %7442 = vmatpush3.bf16.msra.mxu0 %v8369_v13  ;;  %7209 = vmatprep.mubr.msk.f32.mxu0 %vm7790_vm2, %v7789_v15 }
0x1d60   : > { %7443 = vmatprep.subr.bf16.mxu0 %v7794_v62 }
0x1d63   : > { %7445 = vmatpush3.bf16.msra.mxu0 %v8373_v6 }
0x1d64   : > { %7452 = vmatprep.subr.bf16.mxu0 %v7794_v62 }
0x1d66   : > { %7210 = vmatmul.mubr.msk.f32.vlgmr.msra.gmra.mrb[66].mxu0 %vm383_vm1, %v5465_v36 }
0x1d67   : > { %7231 = vmatprep.mubr.msk.f32.mxu0 %vm7790_vm2, %v7789_v15  ;;  %7454 = vmatpush3.bf16.msra.mxu0 %v7453_v46 }
0x1d68   : > { %7455 = vmatprep.subr.bf16.mxu0 %v7794_v62 }
0x1d6b   : > { %7457 = vmatpush3.bf16.msra.mxu0 %v7456_v33 }
0x1d6c   : > { %7464 = vmatprep.subr.bf16.mxu0 %v7794_v62 }
0x1e31   : > { %v5534_v35 = vpop.f32.mrb[64].mxu0 }
0x1e32   : > { %v7486_v49 = vadd.f32 %v5534_v35, %v8432_v51  ;;  %v7189_v37 = vpop.f32.mrb[65].mxu0 }
0x1e33   : > { %v5992_v37 = vld [vmem:[#allocation2 + $0x170] sm:$0xff] }
0x1e34   : > { %7718 = vtanh.f32 %v7486_v49  ;;  %v6443_v55 = vmul.f32 -1.442695, %v7486_v49 }
0x1e39   : > { %v5703_v13 = vpop.f32.mrb[66].mxu0 }
0x1e3a   : > { %v5707_v17 = vadd.f32 %v5703_v13, %v8396_v26  ;;  %v7211_v52 = vpop.f32.mrb[67].mxu0  ;;  %v5993_v13 = vld [vmem:[#allocation2 + $0x178] sm:$0x7f] }
0x1e3c   : > { %7720 = vtanh.f32 %v5707_v17  ;;  %v6446_v56 = vmul.f32 -1.442695, %v5707_v17  ;;  %v7465_v17 = vpack.c.bf16 %v5993_v13, %v5992_v37 }
0x1e3d   : > { %7722 = vpow2.f32 %v6443_v55  ;;  %v6080_v55 = vld [vmem:[#allocation2 + $0x130] sm:$0xff] }
0x1e3e   : > { %v7719_v4 = vpop.eup %7718  ;;  %7724 = vpow2.f32 %v6446_v56 }
0x1e3f   : > { %5547 = vrot.lane.b32.xlu0 %v7719_v4, %s7791_s14  ;;  %v238_v4 = vld [vmem:[%s225_s30] sm:$0xff] }
0x1e46   : > { %v7721_v6 = vpop.eup %7720 }
0x1e47   : > { %5717 = vrot.lane.b32.xlu1 %v7721_v6, %s7791_s14  ;;  %v7723_v53 = vpop.eup %7722  ;;  %v6079_v6 = vld [vmem:[#allocation2 + $0x128] sm:$0xff] }
0x1e48   : > { %v5541_v59 = vadd.f32 1.0, %v7723_v53  ;;  %v7725_v60 = vpop.eup %7724  ;;  %v7469_v56 = vpack.c.bf16 %v6080_v55, %v6079_v6  ;;  %v6081_v53 = vld [vmem:[#allocation2 + $0x138] sm:$0xff] }
0x1e49   : > { %v5711_v22 = vadd.f32 1.0, %v7725_v60 }
0x1e4a   : > { %7726 = vrcp.f32 %v5541_v59  ;;  %v6082_v59 = vld [vmem:[#allocation2 + $0x140] sm:$0xff] }
0x1e4b   : > { %7728 = vrcp.f32 %v5711_v22  ;;  %v7472_v60 = vpack.c.bf16 %v6082_v59, %v6081_v53  ;;  %v6083_v22 = vld [vmem:[#allocation2 + $0x148] sm:$0xff] }
0x1e54   : > { %v7727_v57 = vpop.eup %7726 }
0x1e55   : > { %v7729_v58 = vpop.eup %7728  ;;  %v5545_v21 = vmul.f32 %v7727_v57, %v5286_v27 }
0x1e56   : > { %v5715_v1 = vmul.f32 %v7729_v58, %v5456_v54 }
0x1eb1   : > { %v5548_v26 = vpop.permute.xlu0 %5547 }
0x1eb2   : > { %v5550_v31 = vmul.f32 %v7727_v57, %v5548_v26 }
0x1eb4   : > { %5552 = vrot.lane.b32.xlu0 %v5550_v31, %s7793_s18  ;;  %v6085_v31 = vld [vmem:[#allocation2 + $0x158] sm:$0xff] }
0x1eb9   : > { %v5718_v61 = vpop.permute.xlu1 %5717 }
0x1eba   : > { %v5720_v63 = vmul.f32 %v7729_v58, %v5718_v61  ;;  %v6087_v61 = vld [vmem:[#allocation2 + $0x168] sm:$0x1f] }
0x1ebc   : > { %5722 = vrot.lane.b32.xlu1 %v5720_v63, %s7793_s18 }
0x1f26   : > { %v5553_v47 = vpop.permute.xlu0 %5552 }
0x1f27   : > { %v5555_v0 = vadd.f32 %v5553_v47, %v5545_v21  ;;  %v5984_v21 = vld [vmem:[%s8732_s3 + $0x28] sm:$0xff] }
0x1f29   : > { %7730 = vtanh.f32 %v5555_v0 }
0x1f2e   : > { %v5723_v2 = vpop.permute.xlu1 %5722 }
0x1f2f   : > { %v5725_v23 = vadd.f32 %v5723_v2, %v5715_v1  ;;  %v5994_v1 = vld [vmem:[%s8732_s3 + $0x38] sm:$0xff] }
0x1f31   : > { %7732 = vtanh.f32 %v5725_v23 }
0x1f33   : > { %v7731_v5 = vpop.eup %7730 }
0x1f34   : > { %5558 = vrot.lane.b32.xlu0 %v7731_v5, %s7791_s14 }
0x1f3b   : > { %v7733_v40 = vpop.eup %7732 }
0x1f3c   : > { %5728 = vrot.lane.b32.xlu1 %v7733_v40, %s7791_s14 }
0x1fa6   : > { %v5559_v8 = vpop.permute.xlu0 %5558 }
0x1fa7   : > { %v5561_v20 = vmul.f32 %v7727_v57, %v5559_v8  ;;  %v6084_v57 = vld [vmem:[#allocation2 + $0x150] sm:$0xff] }
0x1fa8   : > { %v7475_v26 = vpack.c.bf16 %v6084_v57, %v6083_v22 }
0x1fa9   : > { %5563 = vrot.lane.b32.xlu0 %v5561_v20, %s7793_s18 }
0x1fae   : > { %v5729_v19 = vpop.permute.xlu1 %5728 }
0x1faf   : > { %v5731_v7 = vmul.f32 %v7729_v58, %v5729_v19 }
0x1fb1   : > { %5733 = vrot.lane.b32.xlu1 %v5731_v7, %s7793_s18 }
0x201b   : > { %v5564_v12 = vpop.permute.xlu0 %5563 }
0x201c   : > { %7199 = vmatmul.mubr.msk.f32.vlgmr.msra.gmra.mrb[58].mxu1 %vm383_vm1, %v5564_v12 }
0x201d   : > { %7448 = vmatpush3.bf16.msra.mxu1 %v8405_v48  ;;  %7220 = vmatprep.mubr.msk.f32.mxu1 %vm7790_vm2, %v7789_v15 }
0x201e   : > { %7449 = vmatprep.subr.bf16.mxu1 %v7794_v62 }
0x2021   : > { %7451 = vmatpush3.bf16.msra.mxu1 %v8408_v34 }
0x2022   : > { %7458 = vmatprep.subr.bf16.mxu1 %v7794_v62 }
0x2023   : > { %v5734_v28 = vpop.permute.xlu1 %5733 }
0x2024   : > { %7221 = vmatmul.mubr.msk.f32.vlgmr.msra.gmra.mrb[58].mxu1 %vm383_vm1, %v5734_v28 }
0x2025   : > { %7460 = vmatpush3.bf16.msra.mxu1 %v7459_v16  ;;  %7242 = vmatprep.mubr.msk.f32.mxu1 %vm7790_vm2, %v7789_v15 }
0x2026   : > { %7461 = vmatprep.subr.bf16.mxu1 %v7794_v62 }
0x2029   : > { %7463 = vmatpush3.bf16.msra.mxu1 %v7462_v11 }
0x202a   : > { %7468 = vmatprep.subr.bf16.mxu1 %v7794_v62 }
0x202c   : > { %7243 = vmatmul.mubr.msk.f32.vlgmr.msra.gmra.mrb[60].mxu1 %vm383_vm1, %v5734_v28 }
0x202d   : > { %7273 = vmatprep.mubr.msk.f32.mxu1 %vm7790_vm2, %v7789_v15  ;;  %7470 = vmatpush3.bf16.msra.mxu1 %v7469_v56 }
0x202e   : > { %7471 = vmatprep.subr.bf16.mxu1 %v7794_v62 }
0x2031   : > { %7473 = vmatpush3.bf16.msra.mxu1 %v7472_v60 }
0x2032   : > { %7474 = vmatprep.subr.bf16.mxu1 %v7794_v62 }
0x2035   : > { %7476 = vmatpush3.bf16.msra.mxu1 %v7475_v26 }
0x2036   : > { %7477 = vmatprep.subr.bf16.mxu1 %v7794_v62 }
0x20f7   : > { %v5803_v48 = vpop.f32.mrb[58].mxu1 }
0x20f8   : > { %v7487_v34 = vadd.f32 %v5803_v48, %v8432_v51  ;;  %v7222_v9 = vpop.f32.mrb[59].mxu1  ;;  %v6239_v48 = vld [vmem:[%s8732_s3 + $0x30] sm:$0xff] }
0x20fa   : > { %7734 = vtanh.f32 %v7487_v34  ;;  %v6448_v32 = vmul.f32 -1.442695, %v7487_v34 }
0x20fc   : > { %7736 = vpow2.f32 %v6448_v32 }
0x20ff   : > { %v8683_v3 = vpop.f32.mrb[60].mxu1 }
0x2100   : > { %v7244_v18 = vpop.f32.mrb[61].mxu1 }
0x2104   : > { %v7735_v30 = vpop.eup %7734 }
0x2105   : > { %5816 = vrot.lane.b32.xlu0 %v7735_v30, %s7791_s14 }
0x2106   : > { %v7737_v25 = vpop.eup %7736 }
0x2107   : > { %v5810_v14 = vadd.f32 1.0, %v7737_v25 }
0x2109   : > { %7738 = vrcp.f32 %v5810_v14 }
0x2113   : > { %v7739_v27 = vpop.eup %7738 }
0x2114   : > { %v5814_v54 = vmul.f32 %v7739_v27, %v5555_v0 }
0x2177   : > { %v5817_v29 = vpop.permute.xlu0 %5816 }
0x2178   : > { %v5819_v41 = vmul.f32 %v7739_v27, %v5817_v29 }
0x217a   : > { %5821 = vrot.lane.b32.xlu1 %v5819_v41, %s7793_s18 }
0x21ec   : > { %v5822_v51 = vpop.permute.xlu1 %5821 }
0x21ed   : > { %v5824_v42 = vadd.f32 %v5822_v51, %v5814_v54 }
0x21ef   : > { %7740 = vtanh.f32 %v5824_v42 }
0x21f9   : > { %v7741_v36 = vpop.eup %7740 }
0x21fa   : > { %5827 = vrot.lane.b32.xlu0 %v7741_v36, %s7791_s14 }
0x226c   : > { %v5828_v35 = vpop.permute.xlu0 %5827 }
0x226d   : > { %v5830_v49 = vmul.f32 %v7739_v27, %v5828_v35 }
0x226f   : > { %5840 = vrot.lane.b32.xlu1 %v5830_v49, %s7793_s18 }
0x22e1   : > { %v5841_v52 = vpop.permute.xlu1 %5840 }
0x22e2   : > { %7232 = vmatmul.mubr.msk.f32.vlgmr.msra.gmra.mrb[68].mxu0 %vm383_vm1, %v5841_v52 }
0x22e3   : > { %7467 = vmatpush3.bf16.msk.msra.mxu0 %vm7466_vm6, %v7465_v17  ;;  %7249 = vmatprep.mubr.msk.f32.mxu0 %vm7790_vm2, %v7789_v15 }
0x22e4   : > { %7252 = vmatprep.subr.mxu0 %v7789_v15 }
0x22e6   : > { %7250 = vmatmul.mubr.msk.f32.vlgmr.msra.gmra.mrb[70].mxu0 %vm5995_vm7, %v238_v4 }
0x22e7   : > { %7254 = vmatprep.mubr.msk.f32.mxu0 %vm7790_vm2, %v7789_v15  ;;  %v6086_v15 = vld [vmem:[#allocation2 + $0x160] sm:$0xff]  ;;  %7253 = vmatpush3.msk.msra.mxu0 %vm6092_vm8, %v6087_v61 }
0x22e8   : > { %v7478_v58 = vpack.c.bf16 %v6086_v15, %v6085_v31 }
0x22ea   : > { %7479 = vmatpush3.bf16.msra.mxu1 %v7478_v58 }
0x23b5   : > { %v5910_v63 = vpop.f32.mrb[68].mxu0 }
0x23b6   : > { %v5981_v47 = vadd.f32 %v8683_v3, %v5910_v63  ;;  %v7233_v0 = vpop.f32.mrb[69].mxu0 }
0x23b8   : > { %v5985_v62 = vadd.f32 %v5984_v21, %v5981_v47 }
0x23b9   : > { %v6069_v2 = vpop.f32.mrb[70].mxu0 }
0x23ba   : > { %v5987_v23 = vmin.f32 %v5985_v62, 0.0  ;;  %v6070_v5 = vadd.f32 %v6069_v2, %v5994_v1  ;;  %v7251_v40 = vpop.f32.mrb[71].mxu0  ;;  %vm5986_vm9 = vcmp.gt.f32.partialorder %v5985_v62, 0.0 }
0x23bc   : > { %v5988_v8 = vmul.f32 1.442695, %v5987_v23  ;;  %v6074_v20 = vmin.f32 %v6070_v5, 0.0  ;;  %vm6073_vm11 = vcmp.gt.f32.partialorder %v6070_v5, 0.0 }
0x23be   : > { %7742 = vpow2.f32 %v5988_v8  ;;  %v6075_v19 = vmul.f32 1.442695, %v6074_v20 }
0x23c0   : > { %7744 = vpow2.f32 %v6075_v19 }
0x23c8   : > { %v7743_v7 = vpop.eup %7742 }
0x23c9   : > { %v6451_v12 = vadd.f32 -1.0, %v7743_v7 }
0x23ca   : > { %v7745_v24 = vpop.eup %7744 }
0x23cb   : > { %v6454_v10 = vadd.f32 -1.0, %v7745_v24  ;;  %v5991_v16 = vsel %vm5986_vm9, %v5985_v62, %v6451_v12 }
0x23cc   : > { %7274 = vmatmul.mubr.msk.f32.vlgmr.msra.gmra.mrb[62].mxu1 %vm3129_vm3, %v5991_v16 }
0x23cd   : > { %v6078_v38 = vsel %vm6073_vm11, %v6070_v5, %v6454_v10 }
0x23ce   : > { %7255 = vmatmul.mubr.msk.f32.vlgmr.msra.gmra.mrb[72].mxu0 %vm6088_vm10, %v6078_v38 }
0x249f   : > { %v6235_v50 = vpop.f32.mrb[62].mxu1 }
0x24a0   : > { %v7275_v28 = vpop.f32.mrb[63].mxu1 }
0x24a1   : > { %v6162_v11 = vpop.f32.mrb[72].mxu0 }
0x24a2   : > { %v6236_v34 = vadd.f32 %v6235_v50, %v6162_v11  ;;  %v7256_v9 = vpop.f32.mrb[73].mxu0 }
0x24a4   : > { %v6240_v3 = vadd.f32 %v6239_v48, %v6236_v34 }
0x24a6   : > { %6242 = vst.msk [vmem:[%s229_s13] sm:$0xff] %vm6241_vm12, %v6240_v3 }
0x24a7 PF: > { %s15_s15 = sadd.s32 1, %s7784_s15  }
0x24a8   : > { %p12_p5 = scmp.ge.s32.totalorder %s15_s15, 4  }
0x24aa   :  { %14 = sbr.rel (!%p12_p5) target bundleno = 1 (0x1), region = 74 }
0x24b1   :  { %6262 = vsyncpa [#allocation3], 1 }
0x24b2   :  { %6264 = vsyncpa [#allocation3 + $0x1], 1 }

</bundles_post_ra>
